<compile_context>
chip_gen: v7x
topology: tpu7x:2x2x1
jax: 0.10.0
libtpu: 0.0.40
codegen_flags: <defaults>
</compile_context>

<pallas_src>
import functools

import jax
import jax.numpy as jnp
from jax import lax
from jax.experimental import pallas as pl
from jax.experimental.pallas import tpu as pltpu


def _round_up(x, m):
    return ((x + m - 1) // m) * m


def _cdiv(a, b):
    return -(-a // b)


def _default_vmem_limit():
    # v7x has 64 MiB physical VMEM (vs 128 MiB on v5e/v6e): budget ~3/4 of
    # physical, capped at 96 MiB, floored at 32 MiB.
    try:
        phys = pltpu.get_tpu_info().vmem_capacity_bytes
    except Exception:
        phys = 64 * 1024 * 1024
    return int(max(32 * 1024 * 1024, min(3 * phys // 4, 96 * 1024 * 1024)))


_VMEM_LIMIT = _default_vmem_limit()
_PALLAS_MIN_COUT = 32           # below this output lane width, use plain XLA


# ----------------------------------------------------------------------------
# Pallas kernel 1: grid-tiled matmul + bias + optional ReLU with f32 accumulator.
# ----------------------------------------------------------------------------
def _matmul_bias_kernel(x_ref, w_ref, b_ref, o_ref, acc_ref, *, relu):
    k = pl.program_id(2)

    @pl.when(k == 0)
    def _init():
        acc_ref[...] = jnp.zeros_like(acc_ref)

    acc_ref[...] += jnp.dot(x_ref[...], w_ref[...],
                            preferred_element_type=jnp.float32)

    @pl.when(k == pl.num_programs(2) - 1)
    def _finalize():
        out = acc_ref[...] + b_ref[...]          # bias added once, on last K step
        if relu:
            out = jnp.maximum(out, 0.0)
        o_ref[...] = out.astype(o_ref.dtype)


def pallas_matmul(x, w, bias=None, relu=False,
                  out_dtype=jnp.float32, compute_dtype=jnp.float32):
    """out = relu?(x @ w + bias); x:(M,K) w:(K,N) bias:(N,)."""
    M, K = x.shape
    K2, N = w.shape
    assert K == K2, (x.shape, w.shape)
    x = x.astype(compute_dtype)
    w = w.astype(compute_dtype)
    b = (jnp.zeros((N,), jnp.float32) if bias is None
         else jnp.asarray(bias, jnp.float32).reshape(N))

    # Tile caps: tm=256, tn/tk=512 (tn=512 fills the full 2x256 MXU width on
    # v6e/v7x and halves LHS re-reads for the big WCT matmuls).
    tm = _round_up(M, 8) if _round_up(M, 8) <= 256 else 256
    tk = _round_up(K, 128) if _round_up(K, 128) <= 512 else 512
    tn = _round_up(N, 128) if _round_up(N, 128) <= 512 else 512
    Mp, Kp, Np = _round_up(M, tm), _round_up(K, tk), _round_up(N, tn)

    # Skip padding entirely when already aligned (all 64/128/256/512-ch cases).
    if (Mp, Kp) != (M, K):
        x = jnp.pad(x, ((0, Mp - M), (0, Kp - K)))
    if (Kp, Np) != (K, N):
        w = jnp.pad(w, ((0, Kp - K), (0, Np - N)))
    if Np != N:
        b = jnp.pad(b, (0, Np - N))
    b = b.reshape(1, Np)

    grid = (Mp // tm, Np // tn, Kp // tk)
    kern = functools.partial(_matmul_bias_kernel, relu=relu)
    cost = pl.CostEstimate(
        flops=2 * Mp * Np * Kp,
        transcendentals=0,
        bytes_accessed=int((Mp * Kp + Kp * Np) * x.dtype.itemsize + Mp * Np * 4))

    out = pl.pallas_call(
        kern,
        out_shape=jax.ShapeDtypeStruct((Mp, Np), out_dtype),
        grid=grid,
        in_specs=[
            pl.BlockSpec((tm, tk), lambda i, j, k: (i, k)),
            pl.BlockSpec((tk, tn), lambda i, j, k: (k, j)),
            pl.BlockSpec((1, tn), lambda i, j, k: (0, j)),
        ],
        out_specs=pl.BlockSpec((tm, tn), lambda i, j, k: (i, j)),
        scratch_shapes=[pltpu.VMEM((tm, tn), jnp.float32)],
        compiler_params=pltpu.CompilerParams(
            dimension_semantics=("parallel", "parallel", "arbitrary"),
            vmem_limit_bytes=_VMEM_LIMIT),
        cost_estimate=cost,
    )(x, w, b)
    if (Mp, Np) != (M, N):
        out = out[:M, :N]
    return out


# ----------------------------------------------------------------------------
# Pallas kernel 2: Gram matrix (x @ x.T) * scale without materializing x.T.
# ----------------------------------------------------------------------------
def _gram_kernel(x_ref, o_ref, acc_ref, *, scale):
    k = pl.program_id(0)

    @pl.when(k == 0)
    def _init():
        acc_ref[...] = jnp.zeros_like(acc_ref)

    a = x_ref[...]
    acc_ref[...] += lax.dot_general(a, a, (((1,), (1,)), ((), ())),
                                    preferred_element_type=jnp.float32)

    @pl.when(k == pl.num_programs(0) - 1)
    def _finalize():
        o_ref[...] = acc_ref[...] * scale


def pallas_gram(x, scale):
    """out = (x @ x.T) * scale ; x:(C, L) float32."""
    C, L = x.shape
    Cp = _round_up(C, 8)
    # K-tile raised to 2048 (4x fewer grid steps / operand transposes for
    # real image sizes); 512x2048 f32 double-buffered is ~16 MiB, well in budget.
    if _round_up(L, 128) <= 2048:
        tk = _round_up(L, 128); Lp = tk
    else:
        tk = 2048; Lp = _round_up(L, tk)
    xp = jnp.pad(x.astype(jnp.float32), ((0, Cp - C), (0, Lp - L)))

    kern = functools.partial(_gram_kernel, scale=float(scale))
    out = pl.pallas_call(
        kern,
        out_shape=jax.ShapeDtypeStruct((Cp, Cp), jnp.float32),
        grid=(Lp // tk,),
        in_specs=[pl.BlockSpec((Cp, tk), lambda k: (0, k))],
        out_specs=pl.BlockSpec((Cp, Cp), lambda k: (0, 0)),
        scratch_shapes=[pltpu.VMEM((Cp, Cp), jnp.float32)],
        compiler_params=pltpu.CompilerParams(
            dimension_semantics=("arbitrary",),
            vmem_limit_bytes=_VMEM_LIMIT),
    )(xp)
    return out[:C, :C]


# ----------------------------------------------------------------------------
# Pallas kernel 3: fused reflection-padded 3x3 conv (+bias, +ReLU), NHWC, bf16.
#
# The padded activation is pre-sliced into overlapping row tiles of th+3 rows
# (halo 2 + 1 junk row) and flattened to ((th+3)*(W+2), Cin).  Each of the 9
# taps is then a contiguous static slice of th*(W+2) flattened rows, so the
# kernel does 9 plain 2-D dots with M = th*(W+2) that accumulate into a VMEM
# f32 scratch; lane positions w>=W inside each row carry harmless junk that is
# sliced away after the call.  Grid = (Cout tiles, row tiles), Cout outermost
# so the weight tile is fetched once per Cout tile and stays VMEM-resident.
# ----------------------------------------------------------------------------
def _conv3x3_kernel(x_ref, w_ref, b_ref, o_ref, acc_ref, *, th, wp, cin, relu):
    m = th * wp
    # TODO(synk): for Cin<=128 the 9 taps could be fused into one K=9*Cin dot by
    # concatenating the shifted slices along the lane axis in-kernel; kept
    # per-tap for robust lowering -- the large M=th*(W+2) keeps the MXU busy.
    first = True
    for dy in range(3):
        for dx in range(3):
            lhs = x_ref[0, pl.ds(dy * wp + dx, m), :]                  # (m, Cin)
            w_tap = w_ref[pl.ds((dy * 3 + dx) * cin, cin), :]          # (Cin, tcout)
            part = jnp.dot(lhs, w_tap, preferred_element_type=jnp.float32)
            if first:
                acc_ref[...] = part
                first = False
            else:
                acc_ref[...] += part
    out = acc_ref[...] + b_ref[...]                                    # bias broadcast
    if relu:
        out = jnp.maximum(out, 0.0)
    o_ref[0] = out.astype(o_ref.dtype)


def _pick_row_tile(H, W):
    # ~2048 flattened output positions per grid step (big MXU M-dim, low
    # per-step overhead, small halo re-read), at most 32 rows, at most H.
    return max(1, min(32, _cdiv(2048, W + 2), H))


def conv3x3_pallas_nhwc(x, w_flat, b2, relu):
    """ReflectionPad2d(1)+Conv2d(3x3)[+ReLU]; x:(B,H,W,Cin) NHWC,
    w_flat:(9*Cin,Cout) flattened (dy,dx,cin), b2:(1,Cout) f32."""
    B, H, W, Cin = x.shape
    Cout = w_flat.shape[1]
    Wp = W + 2
    th = _pick_row_tile(H, W)
    nht = _cdiv(H, th)
    Hp = nht * th
    nrows = B * nht

    x = x.astype(jnp.bfloat16)
    xp = jnp.pad(x, ((0, 0), (1, 1), (1, 1), (0, 0)), mode="reflect")   # (B,H+2,Wp,Cin)
    # Zero-pad the bottom: Hp-H rows so every row tile exists, +1 junk row so
    # the flattened (dy=2, dx>0) tap slices stay in-bounds.
    xp = jnp.pad(xp, ((0, 0), (0, Hp - H + 1), (0, 0), (0, 0)))          # (B,Hp+3,Wp,Cin)
    ridx = (jnp.arange(nht) * th)[:, None] + jnp.arange(th + 3)[None, :]
    tiles = xp[:, ridx].reshape(nrows, (th + 3) * Wp, Cin)

    # tcout=256 matches the 2x256 MXU width on v6e/v7x; the net only has
    # Cout in {64,128,256,512} so the heuristic is exact here.
    tcout = 256 if (Cout > 256 and Cout % 256 == 0) else Cout
    ncout = Cout // tcout
    grid = (ncout, nrows)   # Cout OUTERMOST -> weight tile VMEM-resident across rows

    kern = functools.partial(_conv3x3_kernel, th=th, wp=Wp, cin=Cin, relu=relu)
    cost = pl.CostEstimate(
        flops=2 * nrows * th * Wp * 9 * Cin * Cout,
        transcendentals=0,
        bytes_accessed=int(tiles.size * 2 * ncout + w_flat.size * 2
                           + nrows * th * Wp * Cout * 2))

    out = pl.pallas_call(
        kern,
        out_shape=jax.ShapeDtypeStruct((nrows, th * Wp, Cout), jnp.bfloat16),
        grid=grid,
        in_specs=[
            pl.BlockSpec((1, (th + 3) * Wp, Cin), lambda jj, rr: (rr, 0, 0)),
            pl.BlockSpec((9 * Cin, tcout), lambda jj, rr: (0, jj)),
            pl.BlockSpec((1, tcout), lambda jj, rr: (0, jj)),
        ],
        out_specs=pl.BlockSpec((1, th * Wp, tcout), lambda jj, rr: (rr, 0, jj)),
        scratch_shapes=[pltpu.VMEM((th * Wp, tcout), jnp.float32)],
        compiler_params=pltpu.CompilerParams(
            dimension_semantics=("parallel", "parallel"),
            vmem_limit_bytes=_VMEM_LIMIT),
        cost_estimate=cost,
    )(tiles, w_flat.astype(jnp.bfloat16), b2)

    out = out.reshape(B, nht, th, Wp, Cout)[:, :, :, :W, :].reshape(B, Hp, W, Cout)
    if Hp > H:
        out = out[:, :H]
    return out


# ----------------------------------------------------------------------------
# Plain-XLA fallbacks for lane-width<32 layers and data-movement glue (NHWC).
# ----------------------------------------------------------------------------
def conv3x3_ref_nhwc(x, w_flat, b2, relu):
    B, H, W, Cin = x.shape
    Cout = w_flat.shape[1]
    wt = w_flat.astype(jnp.float32).reshape(3, 3, Cin, Cout)
    xp = jnp.pad(x.astype(jnp.float32), ((0, 0), (1, 1), (1, 1), (0, 0)),
                 mode="reflect")
    acc = b2.astype(jnp.float32).reshape(1, 1, 1, Cout)
    for dy in range(3):
        for dx in range(3):
            acc = acc + jnp.einsum("bhwc,cd->bhwd",
                                   xp[:, dy:dy + H, dx:dx + W, :], wt[dy, dx])
    if relu:
        acc = jnp.maximum(acc, 0.0)
    return acc


def conv2d_1x1_nhwc(x, w2, b, relu=False):
    """w2: (Cin, Cout)."""
    B, H, W, Cin = x.shape
    Cout = w2.shape[1]
    if min(Cin, Cout) >= _PALLAS_MIN_COUT:
        rows = x.reshape(B * H * W, Cin)
        out = pallas_matmul(rows, w2, b, relu=relu,
                            out_dtype=jnp.bfloat16, compute_dtype=jnp.bfloat16)
        return out.reshape(B, H, W, Cout)
    # tiny-channel layer (3->3): lane width 3 would hit masked partial stores in Pallas
    out = jnp.einsum("bhwc,cd->bhwd", x.astype(jnp.float32),
                     w2.astype(jnp.float32)) + jnp.asarray(b, jnp.float32)
    if relu:
        out = jnp.maximum(out, 0.0)
    return out


def maxpool2x2_ceil_nhwc(x):
    """nn.MaxPool2d(2, ceil_mode=True) on NHWC."""
    B, H, W, C = x.shape
    Ho, Wo = -(-H // 2), -(-W // 2)
    xp = jnp.pad(x, ((0, 0), (0, 2 * Ho - H), (0, 2 * Wo - W), (0, 0)),
                 constant_values=-jnp.inf)
    return jnp.max(xp.reshape(B, Ho, 2, Wo, 2, C), axis=(2, 4))


def upsample2x_nhwc(x):
    """F.interpolate(scale_factor=2, mode='nearest') on NHWC."""
    return jnp.repeat(jnp.repeat(x, 2, axis=1), 2, axis=2)


# ----------------------------------------------------------------------------
# whiten_and_color (WCT) on NHWC features; matmuls via Pallas, f32 throughout.
# ----------------------------------------------------------------------------
def whiten_and_color_nhwc(content_feature, style_feature, alpha=1.0):
    # features: (1, H, W, C) float32 (batch must be 1, as in the reference)
    _, ch, cw, c = content_feature.shape
    cf = content_feature.reshape(ch * cw, c).T               # (C, HW)
    c_mean = jnp.mean(cf, axis=1, keepdims=True)
    cf = cf - c_mean
    c_cov = pallas_gram(cf, 1.0 / float(ch * cw - 1))        # cf @ cf.T / (hw-1), fused
    # TODO(synk): SVD / eigendecomposition has no Pallas equivalent; use jnp.linalg.svd.
    _, c_e, c_vh = jnp.linalg.svd(c_cov)
    c_v = c_vh.T
    # torch loop: keep leading eigenvalues until the first one < 1e-5
    keep_c = jnp.cumprod((c_e >= 1e-5).astype(jnp.float32))
    c_d = keep_c * jnp.where(keep_c > 0, c_e, 1.0) ** (-0.5)
    w_step1 = c_v * c_d[None, :]                             # == c_v[:, :k] @ diag(c_d)
    w_step2 = pallas_matmul(w_step1, c_v.T)
    whitened = pallas_matmul(w_step2, cf)

    _, sh, sw, c2 = style_feature.shape
    sf = style_feature.reshape(sh * sw, c2).T
    s_mean = jnp.mean(sf, axis=1, keepdims=True)
    sf = sf - s_mean
    s_cov = pallas_gram(sf, 1.0 / float(sh * sw - 1))
    _, s_e, s_vh = jnp.linalg.svd(s_cov)
    s_v = s_vh.T
    keep_s = jnp.cumprod((s_e >= 1e-5).astype(jnp.float32))
    s_d = keep_s * jnp.sqrt(jnp.where(keep_s > 0, s_e, 0.0))
    c_step1 = s_v * s_d[None, :]
    c_step2 = pallas_matmul(c_step1, s_v.T)
    colored = pallas_matmul(c_step2, whitened) + s_mean      # (C, HW)

    colored_feature = colored.T.reshape(1, ch, cw, c).astype(jnp.float32)
    return alpha * colored_feature + (1.0 - alpha) * content_feature


# ----------------------------------------------------------------------------
# Network specs (mirror normalised_vgg_relu5_1 slices and decoder slices).
# ----------------------------------------------------------------------------
def encoder_spec(level):
    spec = [("conv1x1", 3, 3, False), ("conv", 3, 64, True)]
    if level >= 2:
        spec += [("conv", 64, 64, True), ("pool",), ("conv", 64, 128, True)]
    if level >= 3:
        spec += [("conv", 128, 128, True), ("pool",), ("conv", 128, 256, True)]
    if level >= 4:
        spec += [("conv", 256, 256, True)] * 3 + [("pool",), ("conv", 256, 512, True)]
    if level >= 5:
        spec += [("conv", 512, 512, True)] * 3 + [("pool",), ("conv", 512, 512, True)]
    return spec


def decoder_spec(level):
    spec = []
    if level >= 5:
        spec += [("conv", 512, 512, True), ("up",),
                 ("conv", 512, 512, True), ("conv", 512, 512, True), ("conv", 512, 512, True)]
    if level >= 4:
        spec += [("conv", 512, 256, True), ("up",),
                 ("conv", 256, 256, True), ("conv", 256, 256, True), ("conv", 256, 256, True)]
    if level >= 3:
        spec += [("conv", 256, 128, True), ("up",), ("conv", 128, 128, True)]
    if level >= 2:
        spec += [("conv", 128, 64, True), ("up",), ("conv", 64, 64, True)]
    spec += [("conv", 64, 3, False)]
    return spec


def _init_conv(key, cout, cin, k):
    wkey, bkey = jax.random.split(key)
    fan_in = cin * k * k
    w = jax.random.normal(wkey, (cout, cin, k, k), jnp.float32) / jnp.sqrt(float(fan_in))
    b = 0.01 * jax.random.normal(bkey, (cout,), jnp.float32)
    return w, b


def init_params(spec, key):
    params = []
    for i, op in enumerate(spec):
        if op[0] in ("conv", "conv1x1"):
            k = 1 if op[0] == "conv1x1" else 3
            cin, cout = op[1], op[2]
            params.append(_init_conv(jax.random.fold_in(key, i), cout, cin, k))
        else:
            params.append(None)
    return params


def prepare_params(spec, params):
    """Hoist per-layer weight transposes/casts out of the forward pass."""
    prepared = []
    for op, p in zip(spec, params):
        if p is None:
            prepared.append(None)
        elif op[0] == "conv1x1":
            w, b = p
            cout, cin = w.shape[0], w.shape[1]
            prepared.append((w.reshape(cout, cin).T.astype(jnp.float32),
                             jnp.asarray(b, jnp.float32)))
        else:  # 3x3 conv -> flattened (9*Cin, Cout) in (dy, dx, cin) order
            w, b = p
            cout, cin = w.shape[0], w.shape[1]
            w_flat = jnp.transpose(w, (2, 3, 1, 0)).reshape(9 * cin, cout)
            wdt = jnp.bfloat16 if cout >= _PALLAS_MIN_COUT else jnp.float32
            prepared.append((w_flat.astype(wdt),
                             jnp.asarray(b, jnp.float32).reshape(1, cout)))
    return prepared


def apply_net(spec, params, x):
    """x: NHWC activations (bf16/f32 inside the network)."""
    for op, p in zip(spec, params):
        if op[0] == "conv1x1":
            x = conv2d_1x1_nhwc(x, p[0], p[1], relu=op[3])
        elif op[0] == "conv":
            if op[2] >= _PALLAS_MIN_COUT:
                x = conv3x3_pallas_nhwc(x, p[0], p[1], relu=op[3])
            else:
                x = conv3x3_ref_nhwc(x, p[0], p[1], relu=op[3])
        elif op[0] == "pool":
            x = maxpool2x2_ceil_nhwc(x)
        elif op[0] == "up":
            x = upsample2x_nhwc(x)
        else:
            raise ValueError(op)
    return x


def single_level_ae_forward(enc_spec, enc_params, dec_spec, dec_params,
                            content_image, style_image, alpha):
    # NCHW <-> NHWC only once at the module boundary (stay NHWC internally).
    c_nhwc = jnp.transpose(content_image, (0, 2, 3, 1))
    s_nhwc = jnp.transpose(style_image, (0, 2, 3, 1))
    content_feature = apply_net(enc_spec, enc_params, c_nhwc).astype(jnp.float32)
    style_feature = apply_net(enc_spec, enc_params, s_nhwc).astype(jnp.float32)
    res = whiten_and_color_nhwc(content_feature, style_feature, alpha)
    res = apply_net(dec_spec, dec_params, res)
    return jnp.transpose(res.astype(jnp.float32), (0, 3, 1, 2))


# ----------------------------------------------------------------------------
if __name__ == "__main__":
    level = 2                 # SingleLevelAE(level=2): encoder -> relu2_1, decoder level 2
    key = jax.random.PRNGKey(0)
    k_enc, k_dec, k_c, k_s = jax.random.split(key, 4)

    e_spec = encoder_spec(level)
    d_spec = decoder_spec(level)
    e_params = prepare_params(e_spec, init_params(e_spec, k_enc))
    d_params = prepare_params(d_spec, init_params(d_spec, k_dec))

    # WCT squeezes batch dim 0 -> batch must be 1 (as in the reference code).
    content_image = jax.random.normal(k_c, (1, 3, 16, 16), jnp.float32)
    style_image = jax.random.normal(k_s, (1, 3, 16, 16), jnp.float32)
    alpha = 0.6

    out = single_level_ae_forward(e_spec, e_params, d_spec, d_params,
                                  content_image, style_image, alpha)
    out = jax.block_until_ready(out)
    assert out.shape == (1, 3, 16, 16), out.shape
    assert bool(jnp.all(jnp.isfinite(out)))
    print("KERNEL_OK")
</pallas_src>

<mosaic_0001>
module attributes {stable_mosaic.version = 11 : i64} {
  func.func @_conv3x3_kernel(%arg0: i32, %arg1: i32, %arg2: memref<1x342x3xbf16, #tpu.memory_space<vmem>>, %arg3: memref<27x64xbf16, #tpu.memory_space<vmem>>, %arg4: memref<1x64xf32, #tpu.memory_space<vmem>>, %arg5: memref<1x288x64xbf16, #tpu.memory_space<vmem>>, %arg6: memref<288x64xf32, #tpu.memory_space<vmem>>) attributes {dimension_semantics = [#tpu.dimension_semantics<parallel>, #tpu.dimension_semantics<parallel>], iteration_bounds = array<i64: 1, 1>, scalar_prefetch = 0 : i64, scratch_operands = 1 : i64, tpu.core_type = #tpu.core_type<tc>, window_params = [{transform_indices = @transform_0, window_bounds = array<i64: 1, 342, 3>}, {transform_indices = @transform_1, window_bounds = array<i64: 27, 64>}, {transform_indices = @transform_2, window_bounds = array<i64: 1, 64>}, {transform_indices = @transform_3, window_bounds = array<i64: 1, 288, 64>}]} {
    %c0 = arith.constant 0 : index
    %c0_0 = arith.constant 0 : index
    %c0_1 = arith.constant 0 : index
    %0 = vector.load %arg2[%c0, %c0_0, %c0_1] : memref<1x342x3xbf16, #tpu.memory_space<vmem>>, vector<1x288x3xbf16>
    %1 = vector.shape_cast %0 : vector<1x288x3xbf16> to vector<288x3xbf16>
    %c0_2 = arith.constant 0 : index
    %c0_3 = arith.constant 0 : index
    %2 = vector.load %arg3[%c0_2, %c0_3] : memref<27x64xbf16, #tpu.memory_space<vmem>>, vector<3x64xbf16>
    %cst = arith.constant dense<0.000000e+00> : vector<288x64xf32>
    %3 = tpu.matmul %1, %2, %cst {dimension_numbers = #tpu.dot_dimension_numbers<[1], [0], [0], [1], [0, 0, 1, 1], [], []>} : vector<288x3xbf16>, vector<3x64xbf16>, vector<288x64xf32> -> vector<288x64xf32>
    %c0_4 = arith.constant 0 : index
    %c0_5 = arith.constant 0 : index
    %4 = vector.load %arg6[%c0_4, %c0_5] : memref<288x64xf32, #tpu.memory_space<vmem>>, vector<288x64xf32>
    tpu.vector_store %arg6[%c0_4, %c0_5], %3 {strides = array<i32>} : memref<288x64xf32, #tpu.memory_space<vmem>>, vector<288x64xf32>,
    %c0_6 = arith.constant 0 : index
    %c1 = arith.constant 1 : index
    %c0_7 = arith.constant 0 : index
    %5 = vector.load %arg2[%c0_6, %c1, %c0_7] : memref<1x342x3xbf16, #tpu.memory_space<vmem>>, vector<1x288x3xbf16>
    %6 = vector.shape_cast %5 : vector<1x288x3xbf16> to vector<288x3xbf16>
    %c3 = arith.constant 3 : index
    %c0_8 = arith.constant 0 : index
    %7 = vector.load %arg3[%c3, %c0_8] : memref<27x64xbf16, #tpu.memory_space<vmem>>, vector<3x64xbf16>
    %cst_9 = arith.constant dense<0.000000e+00> : vector<288x64xf32>
    %8 = tpu.matmul %6, %7, %cst_9 {dimension_numbers = #tpu.dot_dimension_numbers<[1], [0], [0], [1], [0, 0, 1, 1], [], []>} : vector<288x3xbf16>, vector<3x64xbf16>, vector<288x64xf32> -> vector<288x64xf32>
    %c0_10 = arith.constant 0 : index
    %c0_11 = arith.constant 0 : index
    %9 = vector.load %arg6[%c0_10, %c0_11] : memref<288x64xf32, #tpu.memory_space<vmem>>, vector<288x64xf32>
    %10 = arith.addf %9, %8 : vector<288x64xf32>
    %c0_12 = arith.constant 0 : index
    %c0_13 = arith.constant 0 : index
    %11 = vector.load %arg6[%c0_12, %c0_13] : memref<288x64xf32, #tpu.memory_space<vmem>>, vector<288x64xf32>
    tpu.vector_store %arg6[%c0_12, %c0_13], %10 {strides = array<i32>} : memref<288x64xf32, #tpu.memory_space<vmem>>, vector<288x64xf32>,
    %c0_14 = arith.constant 0 : index
    %c2 = arith.constant 2 : index
    %c0_15 = arith.constant 0 : index
    %12 = vector.load %arg2[%c0_14, %c2, %c0_15] : memref<1x342x3xbf16, #tpu.memory_space<vmem>>, vector<1x288x3xbf16>
    %13 = vector.shape_cast %12 : vector<1x288x3xbf16> to vector<288x3xbf16>
    %c6 = arith.constant 6 : index
    %c0_16 = arith.constant 0 : index
    %14 = vector.load %arg3[%c6, %c0_16] : memref<27x64xbf16, #tpu.memory_space<vmem>>, vector<3x64xbf16>
    %cst_17 = arith.constant dense<0.000000e+00> : vector<288x64xf32>
    %15 = tpu.matmul %13, %14, %cst_17 {dimension_numbers = #tpu.dot_dimension_numbers<[1], [0], [0], [1], [0, 0, 1, 1], [], []>} : vector<288x3xbf16>, vector<3x64xbf16>, vector<288x64xf32> -> vector<288x64xf32>
    %c0_18 = arith.constant 0 : index
    %c0_19 = arith.constant 0 : index
    %16 = vector.load %arg6[%c0_18, %c0_19] : memref<288x64xf32, #tpu.memory_space<vmem>>, vector<288x64xf32>
    %17 = arith.addf %16, %15 : vector<288x64xf32>
    %c0_20 = arith.constant 0 : index
    %c0_21 = arith.constant 0 : index
    %18 = vector.load %arg6[%c0_20, %c0_21] : memref<288x64xf32, #tpu.memory_space<vmem>>, vector<288x64xf32>
    tpu.vector_store %arg6[%c0_20, %c0_21], %17 {strides = array<i32>} : memref<288x64xf32, #tpu.memory_space<vmem>>, vector<288x64xf32>,
    %c0_22 = arith.constant 0 : index
    %c18 = arith.constant 18 : index
    %c0_23 = arith.constant 0 : index
    %19 = vector.load %arg2[%c0_22, %c18, %c0_23] : memref<1x342x3xbf16, #tpu.memory_space<vmem>>, vector<1x288x3xbf16>
    %20 = vector.shape_cast %19 : vector<1x288x3xbf16> to vector<288x3xbf16>
    %c9 = arith.constant 9 : index
    %c0_24 = arith.constant 0 : index
    %21 = vector.load %arg3[%c9, %c0_24] : memref<27x64xbf16, #tpu.memory_space<vmem>>, vector<3x64xbf16>
    %cst_25 = arith.constant dense<0.000000e+00> : vector<288x64xf32>
    %22 = tpu.matmul %20, %21, %cst_25 {dimension_numbers = #tpu.dot_dimension_numbers<[1], [0], [0], [1], [0, 0, 1, 1], [], []>} : vector<288x3xbf16>, vector<3x64xbf16>, vector<288x64xf32> -> vector<288x64xf32>
    %c0_26 = arith.constant 0 : index
    %c0_27 = arith.constant 0 : index
    %23 = vector.load %arg6[%c0_26, %c0_27] : memref<288x64xf32, #tpu.memory_space<vmem>>, vector<288x64xf32>
    %24 = arith.addf %23, %22 : vector<288x64xf32>
    %c0_28 = arith.constant 0 : index
    %c0_29 = arith.constant 0 : index
    %25 = vector.load %arg6[%c0_28, %c0_29] : memref<288x64xf32, #tpu.memory_space<vmem>>, vector<288x64xf32>
    tpu.vector_store %arg6[%c0_28, %c0_29], %24 {strides = array<i32>} : memref<288x64xf32, #tpu.memory_space<vmem>>, vector<288x64xf32>,
    %c0_30 = arith.constant 0 : index
    %c19 = arith.constant 19 : index
    %c0_31 = arith.constant 0 : index
    %26 = vector.load %arg2[%c0_30, %c19, %c0_31] : memref<1x342x3xbf16, #tpu.memory_space<vmem>>, vector<1x288x3xbf16>
    %27 = vector.shape_cast %26 : vector<1x288x3xbf16> to vector<288x3xbf16>
    %c12 = arith.constant 12 : index
    %c0_32 = arith.constant 0 : index
    %28 = vector.load %arg3[%c12, %c0_32] : memref<27x64xbf16, #tpu.memory_space<vmem>>, vector<3x64xbf16>
    %cst_33 = arith.constant dense<0.000000e+00> : vector<288x64xf32>
    %29 = tpu.matmul %27, %28, %cst_33 {dimension_numbers = #tpu.dot_dimension_numbers<[1], [0], [0], [1], [0, 0, 1, 1], [], []>} : vector<288x3xbf16>, vector<3x64xbf16>, vector<288x64xf32> -> vector<288x64xf32>
    %c0_34 = arith.constant 0 : index
    %c0_35 = arith.constant 0 : index
    %30 = vector.load %arg6[%c0_34, %c0_35] : memref<288x64xf32, #tpu.memory_space<vmem>>, vector<288x64xf32>
    %31 = arith.addf %30, %29 : vector<288x64xf32>
    %c0_36 = arith.constant 0 : index
    %c0_37 = arith.constant 0 : index
    %32 = vector.load %arg6[%c0_36, %c0_37] : memref<288x64xf32, #tpu.memory_space<vmem>>, vector<288x64xf32>
    tpu.vector_store %arg6[%c0_36, %c0_37], %31 {strides = array<i32>} : memref<288x64xf32, #tpu.memory_space<vmem>>, vector<288x64xf32>,
    %c0_38 = arith.constant 0 : index
    %c20 = arith.constant 20 : index
    %c0_39 = arith.constant 0 : index
    %33 = vector.load %arg2[%c0_38, %c20, %c0_39] : memref<1x342x3xbf16, #tpu.memory_space<vmem>>, vector<1x288x3xbf16>
    %34 = vector.shape_cast %33 : vector<1x288x3xbf16> to vector<288x3xbf16>
    %c15 = arith.constant 15 : index
    %c0_40 = arith.constant 0 : index
    %35 = vector.load %arg3[%c15, %c0_40] : memref<27x64xbf16, #tpu.memory_space<vmem>>, vector<3x64xbf16>
    %cst_41 = arith.constant dense<0.000000e+00> : vector<288x64xf32>
    %36 = tpu.matmul %34, %35, %cst_41 {dimension_numbers = #tpu.dot_dimension_numbers<[1], [0], [0], [1], [0, 0, 1, 1], [], []>} : vector<288x3xbf16>, vector<3x64xbf16>, vector<288x64xf32> -> vector<288x64xf32>
    %c0_42 = arith.constant 0 : index
    %c0_43 = arith.constant 0 : index
    %37 = vector.load %arg6[%c0_42, %c0_43] : memref<288x64xf32, #tpu.memory_space<vmem>>, vector<288x64xf32>
    %38 = arith.addf %37, %36 : vector<288x64xf32>
    %c0_44 = arith.constant 0 : index
    %c0_45 = arith.constant 0 : index
    %39 = vector.load %arg6[%c0_44, %c0_45] : memref<288x64xf32, #tpu.memory_space<vmem>>, vector<288x64xf32>
    tpu.vector_store %arg6[%c0_44, %c0_45], %38 {strides = array<i32>} : memref<288x64xf32, #tpu.memory_space<vmem>>, vector<288x64xf32>,
    %c0_46 = arith.constant 0 : index
    %c36 = arith.constant 36 : index
    %c0_47 = arith.constant 0 : index
    %40 = vector.load %arg2[%c0_46, %c36, %c0_47] : memref<1x342x3xbf16, #tpu.memory_space<vmem>>, vector<1x288x3xbf16>
    %41 = vector.shape_cast %40 : vector<1x288x3xbf16> to vector<288x3xbf16>
    %c18_48 = arith.constant 18 : index
    %c0_49 = arith.constant 0 : index
    %42 = vector.load %arg3[%c18_48, %c0_49] : memref<27x64xbf16, #tpu.memory_space<vmem>>, vector<3x64xbf16>
    %cst_50 = arith.constant dense<0.000000e+00> : vector<288x64xf32>
    %43 = tpu.matmul %41, %42, %cst_50 {dimension_numbers = #tpu.dot_dimension_numbers<[1], [0], [0], [1], [0, 0, 1, 1], [], []>} : vector<288x3xbf16>, vector<3x64xbf16>, vector<288x64xf32> -> vector<288x64xf32>
    %c0_51 = arith.constant 0 : index
    %c0_52 = arith.constant 0 : index
    %44 = vector.load %arg6[%c0_51, %c0_52] : memref<288x64xf32, #tpu.memory_space<vmem>>, vector<288x64xf32>
    %45 = arith.addf %44, %43 : vector<288x64xf32>
    %c0_53 = arith.constant 0 : index
    %c0_54 = arith.constant 0 : index
    %46 = vector.load %arg6[%c0_53, %c0_54] : memref<288x64xf32, #tpu.memory_space<vmem>>, vector<288x64xf32>
    tpu.vector_store %arg6[%c0_53, %c0_54], %45 {strides = array<i32>} : memref<288x64xf32, #tpu.memory_space<vmem>>, vector<288x64xf32>,
    %c0_55 = arith.constant 0 : index
    %c37 = arith.constant 37 : index
    %c0_56 = arith.constant 0 : index
    %47 = vector.load %arg2[%c0_55, %c37, %c0_56] : memref<1x342x3xbf16, #tpu.memory_space<vmem>>, vector<1x288x3xbf16>
    %48 = vector.shape_cast %47 : vector<1x288x3xbf16> to vector<288x3xbf16>
    %c21 = arith.constant 21 : index
    %c0_57 = arith.constant 0 : index
    %49 = vector.load %arg3[%c21, %c0_57] : memref<27x64xbf16, #tpu.memory_space<vmem>>, vector<3x64xbf16>
    %cst_58 = arith.constant dense<0.000000e+00> : vector<288x64xf32>
    %50 = tpu.matmul %48, %49, %cst_58 {dimension_numbers = #tpu.dot_dimension_numbers<[1], [0], [0], [1], [0, 0, 1, 1], [], []>} : vector<288x3xbf16>, vector<3x64xbf16>, vector<288x64xf32> -> vector<288x64xf32>
    %c0_59 = arith.constant 0 : index
    %c0_60 = arith.constant 0 : index
    %51 = vector.load %arg6[%c0_59, %c0_60] : memref<288x64xf32, #tpu.memory_space<vmem>>, vector<288x64xf32>
    %52 = arith.addf %51, %50 : vector<288x64xf32>
    %c0_61 = arith.constant 0 : index
    %c0_62 = arith.constant 0 : index
    %53 = vector.load %arg6[%c0_61, %c0_62] : memref<288x64xf32, #tpu.memory_space<vmem>>, vector<288x64xf32>
    tpu.vector_store %arg6[%c0_61, %c0_62], %52 {strides = array<i32>} : memref<288x64xf32, #tpu.memory_space<vmem>>, vector<288x64xf32>,
    %c0_63 = arith.constant 0 : index
    %c38 = arith.constant 38 : index
    %c0_64 = arith.constant 0 : index
    %54 = vector.load %arg2[%c0_63, %c38, %c0_64] : memref<1x342x3xbf16, #tpu.memory_space<vmem>>, vector<1x288x3xbf16>
    %55 = vector.shape_cast %54 : vector<1x288x3xbf16> to vector<288x3xbf16>
    %c24 = arith.constant 24 : index
    %c0_65 = arith.constant 0 : index
    %56 = vector.load %arg3[%c24, %c0_65] : memref<27x64xbf16, #tpu.memory_space<vmem>>, vector<3x64xbf16>
    %cst_66 = arith.constant dense<0.000000e+00> : vector<288x64xf32>
    %57 = tpu.matmul %55, %56, %cst_66 {dimension_numbers = #tpu.dot_dimension_numbers<[1], [0], [0], [1], [0, 0, 1, 1], [], []>} : vector<288x3xbf16>, vector<3x64xbf16>, vector<288x64xf32> -> vector<288x64xf32>
    %c0_67 = arith.constant 0 : index
    %c0_68 = arith.constant 0 : index
    %58 = vector.load %arg6[%c0_67, %c0_68] : memref<288x64xf32, #tpu.memory_space<vmem>>, vector<288x64xf32>
    %59 = arith.addf %58, %57 : vector<288x64xf32>
    %c0_69 = arith.constant 0 : index
    %c0_70 = arith.constant 0 : index
    %60 = vector.load %arg6[%c0_69, %c0_70] : memref<288x64xf32, #tpu.memory_space<vmem>>, vector<288x64xf32>
    tpu.vector_store %arg6[%c0_69, %c0_70], %59 {strides = array<i32>} : memref<288x64xf32, #tpu.memory_space<vmem>>, vector<288x64xf32>,
    %c0_71 = arith.constant 0 : index
    %c0_72 = arith.constant 0 : index
    %61 = vector.load %arg6[%c0_71, %c0_72] : memref<288x64xf32, #tpu.memory_space<vmem>>, vector<288x64xf32>
    %c0_73 = arith.constant 0 : index
    %c0_74 = arith.constant 0 : index
    %62 = vector.load %arg4[%c0_73, %c0_74] : memref<1x64xf32, #tpu.memory_space<vmem>>, vector<1x64xf32>
    %63 = vector.broadcast %62 : vector<1x64xf32> to vector<288x64xf32>
    %64 = arith.addf %61, %63 : vector<288x64xf32>
    %cst_75 = arith.constant 0.000000e+00 : f32
    %65 = vector.broadcast %cst_75 : f32 to vector<288x64xf32>
    %66 = arith.maximumf %64, %65 : vector<288x64xf32>
    %67 = arith.truncf %66 : vector<288x64xf32> to vector<288x64xbf16>
    %c0_76 = arith.constant 0 : index
    %c0_77 = arith.constant 0 : index
    %c0_78 = arith.constant 0 : index
    %68 = vector.load %arg5[%c0_76, %c0_77, %c0_78] : memref<1x288x64xbf16, #tpu.memory_space<vmem>>, vector<1x288x64xbf16>
    %69 = vector.shape_cast %68 : vector<1x288x64xbf16> to vector<288x64xbf16>
    %70 = vector.shape_cast %67 : vector<288x64xbf16> to vector<1x288x64xbf16>
    tpu.vector_store %arg5[%c0_76, %c0_77, %c0_78], %70 {strides = array<i32>} : memref<1x288x64xbf16, #tpu.memory_space<vmem>>, vector<1x288x64xbf16>,
    return
  }
  func.func @transform_0(%arg0: i32, %arg1: i32) -> (i32, i32, i32) {
    %c0_i32 = arith.constant 0 : i32
    %c0_i32_0 = arith.constant 0 : i32
    %c0_i32_1 = arith.constant 0 : i32
    return %arg1, %c0_i32, %c0_i32_0 : i32, i32, i32
  }
  func.func @transform_1(%arg0: i32, %arg1: i32) -> (i32, i32) {
    %c0_i32 = arith.constant 0 : i32
    %c0_i32_0 = arith.constant 0 : i32
    return %c0_i32, %arg0 : i32, i32
  }
  func.func @transform_2(%arg0: i32, %arg1: i32) -> (i32, i32) {
    %c0_i32 = arith.constant 0 : i32
    %c0_i32_0 = arith.constant 0 : i32
    return %c0_i32, %arg0 : i32, i32
  }
  func.func @transform_3(%arg0: i32, %arg1: i32) -> (i32, i32, i32) {
    %c0_i32 = arith.constant 0 : i32
    %c0_i32_0 = arith.constant 0 : i32
    return %arg1, %c0_i32, %arg0 : i32, i32, i32
  }
}

</mosaic_0001>

<bundles_post_ra>
// kernel: tpu_custom_call.1
= control target key start
LH: loop header
LB: loop body
LE: loop exit
PB: predicated region body
PF: predicated region fallthrough
CT: control target
= control target key end

     0   :  { %vm197_vm0 = vcmask 1040384   ;;  %vm198_vm1 = vcmask 1041408   ;;  %vm142_vm2 = vcmask 23552   ;;  %v6347_v1 = vmov 65535   ;;  %s7901_s1 = inlined_call_operand.vmem [shape: bf16[27,64], index: 1, kind: input, shape index: {}]   ;;  %s7902_s0 = inlined_call_operand.vmem [shape: bf16[1,342,3], index: 0, kind: input, shape index: {}]   ;;  %s7903_s2 = inlined_call_operand.vmem [shape: f32[1,64], index: 2, kind: input, shape index: {}]   ;;  %s7904_s3 = inlined_call_operand.vmem [shape: bf16[1,288,64], index: 3, kind: output, shape index: {}]  }
   0x1   :  { %v51_v0 = vld [vmem:[%s7901_s1] sm:$0x3]  ;;  %v199_v2 = vsel %vm197_vm0, 4294967295, %v6347_v1  ;;  %v6170_v3 = vld [vmem:[%s7902_s0 + $0x50] sm:$0xff]   ;;  %v6171_v6 = vld [vmem:[%s7902_s0 + $0x58] sm:$0xff]   ;;  %vm1183_vm4 = vcmask 1046528  }
   0x2   :  { %v6374_v4 = vsel %vm198_vm1, %v199_v2, 0  ;;  %5847 = vmatprep.mubr.msk.bf16.mxu1 %vm142_vm2, %v6170_v3  ;;  %v6172_v7 = vld [vmem:[%s7902_s0] sm:$0xff]   ;;  %v6173_v8 = vld [vmem:[%s7902_s0 + $0x8] sm:$0xff]   ;;  %v6178_v17 = vld [vmem:[%s7902_s0 + $0x10] sm:$0xff]   ;;  %vm549_vm3 = vsmask.f32 7424 }
   0x3   :  { %v202_v5 = vand.u32 %v6374_v4, %v51_v0  ;;  %v6174_v9 = vld [vmem:[%s7901_s1] ss:$0 sps:$4 sm:$0x66]   ;;  %v6175_v10 = vld [vmem:[%s7901_s1] sm:$0x18]   ;;  %5827 = vmatprep.mubr.msk.bf16.mxu0 %vm142_vm2, %v6172_v7  ;;  %v6177_v20 = vld [vmem:[%s7902_s0 + $0x68] sm:$0xff]  }
   0x4   :  { %v702_v11 = vshrl.u32 %v6174_v9, 16  ;;  %v705_v12 = vshll.u32 %v6174_v9, 16  ;;  %v1226_v13 = vrot.slane %v6175_v10, 3  ;;  %v6176_v14 = vld [vmem:[%s7902_s0 + $0x60] sm:$0xff]   ;;  %v6179_v21 = vld [vmem:[%s7902_s0 + $0x18] sm:$0xff]   ;;  %v6180_v23 = vld [vmem:[%s7902_s0 + $0x70] sm:$0xff]  }
   0x5   :  { %6167 = vmatprep.subr.bf16.mxu1 %v202_v5  ;;  %5825 = vmatprep.subr.bf16.mxu0 %v202_v5  ;;  %v6182_v24 = vld [vmem:[%s7902_s0 + $0x20] sm:$0xff]   ;;  %v6181_v25 = vld [vmem:[%s7902_s0 + $0x78] sm:$0xff]   ;;  %v6183_v26 = vld [vmem:[%s7902_s0 + $0x28] sm:$0xff]   ;;  %vm2220_vm5 = vsmask.f32 6400  ;;  %vm2869_vm6 = vcmask 1045504  }
   0x6   :  { %6168 = vmatpush3.bf16.msra.mxu1 %v202_v5  ;;  %5826 = vmatpush3.bf16.msra.mxu0 %v202_v5  ;;  %v704_v15 = vrot.slane %v702_v11, 1  ;;  %v707_v16 = vrot.slane %v705_v12, 2  ;;  %v1282_v18 = vand.u32 %v1226_v13, %v6374_v4  ;;  %v6184_v27 = vld [vmem:[%s7902_s0 + $0x80] sm:$0xff]   ;;  %v6186_v29 = vld [vmem:[%s7902_s0 + $0x30] sm:$0xff]   ;;  %v6189_v30 = vld [vmem:[%s7902_s0 + $0x8] sm:$0xff]   ;;  %vm381_vm7 = vcmask 523264  }
   0x7   :  { %v6188_v28 = vld [vmem:[%s7902_s0] sm:$0xff]   ;;  %v6190_v32 = vld [vmem:[%s7902_s0 + $0x10] sm:$0xff]   ;;  %v558_v34 = vshll.u32 %v6189_v30, 16  ;;  %v6185_v38 = vld [vmem:[%s7902_s0 + $0x88] sm:$0xff]   ;;  %v562_v45 = vshrl.u32 %v6189_v30, 16  ;;  %vm4562_vm9 = vcmask 1044480  }
   0x8   :  { %v708_v19 = vor.u32 %v707_v16, %v704_v15  ;;  %5901 = vmatprep.subr.bf16.mxu0 %v1282_v18  ;;  %v553_v31 = vshll.u32 %v6188_v28, 16  ;;  %v551_v33 = vshrl.u32 %v6188_v28, 16  ;;  %v566_v36 = vshll.u32 %v6190_v32, 16  ;;  %v6193_v37 = vld [vmem:[%s7901_s1 + $0x4] ss:$0 sps:$4 sm:$0x33]  }
   0x9   :  { %5848 = vmatmul.mubr.msk.bf16.vlgmr.msra.gmra.mrb[0].mxu1 %vm142_vm2, %v6171_v6  ;;  %5828 = vmatmul.mubr.msk.bf16.vlgmr.msra.gmra.mrb[0].mxu0 %vm142_vm2, %v6173_v8  ;;  %v560_v40 = vrot.slane %v558_v34, 1  ;;  %v6194_v41 = vld [vmem:[%s7902_s0 + $0x18] sm:$0xff]   ;;  %v1741_v42 = vshrl.u32 %v6193_v37, 16  ;;  %v1743_v43 = vshll.u32 %v6193_v37, 16  ;;  %v6191_v47 = vld [vmem:[%s7902_s0 + $0x40] sm:$0xff]   ;;  %v570_v49 = vshrl.u32 %v6190_v32, 16 }
   0xa   :  { %5851 = vmatprep.mubr.msk.bf16.mxu1 %vm142_vm2, %v6176_v14  ;;  %5831 = vmatprep.mubr.msk.bf16.mxu0 %vm142_vm2, %v6178_v17  ;;  %v764_v22 = vand.u32 %v708_v19, %v6374_v4  ;;  %v555_v35 = vrot.slane %v553_v31, 1  ;;  %v6187_v44 = vld [vmem:[%s7902_s0 + $0x38] sm:$0xff]   ;;  %v568_v46 = vrot.slane %v566_v36, 1  ;;  %v574_v51 = vshll.u32 %v6194_v41, 16  ;;  %v6197_v52 = vld [vmem:[%s7902_s0 + $0x8] sm:$0xff]   ;;  %v6195_v55 = vld [vmem:[%s7902_s0 + $0x20] sm:$0xff]  }
   0xb   :  { %5902 = vmatpush3.bf16.msra.mxu0 %v1282_v18  ;;  %v1745_v48 = vrot.slane %v1743_v43, 1  ;;  %v6196_v54 = vld [vmem:[%s7902_s0] sm:$0xfe]   ;;  %v564_v57 = vor.u32 %v562_v45, %v560_v40  ;;  %v6200_v62 = vld [vmem:[%s7902_s0 + $0x28] sm:$0xff]   ;;  %v1185_v0 = vrot.slane %v6197_v52, 1  ;;  %v582_v2 = vshll.u32 %v6195_v55, 16 }
   0xc   :  { %5863 = vmatprep.subr.bf16.mxu1 %v764_v22  ;;  %v556_v39 = vor.u32 %v555_v35, %v551_v33  ;;  %v6199_v56 = vld [vmem:[%s7901_s1 + $0x4] ss:$0 sps:$4 sm:$0xcc]   ;;  %v572_v59 = vor.u32 %v570_v49, %v568_v46  ;;  %v576_v60 = vrot.slane %v574_v51, 1  ;;  %v1184_v63 = vrot.slane %v6196_v54, 1  ;;  %v6192_v1 = vld [vmem:[%s7902_s0 + $0x48] sm:$0xff]  }
   0xd   :  { %5864 = vmatpush3.bf16.msra.mxu1 %v764_v22  ;;  %v1746_v53 = vor.u32 %v1745_v48, %v1741_v42  ;;  %v2394_v61 = vrot.slane %v6199_v56, 2  ;;  %v569_v5 = vsel %vm549_vm3, %v564_v57, %v568_v46  ;;  %v578_v6 = vshrl.u32 %v6194_v41, 16  ;;  %v6198_v7 = vld [vmem:[%s7902_s0 + $0x10] sm:$0xff]   ;;  %v6202_v12 = vld [vmem:[%s7902_s0 + $0x18] sm:$0xff]   ;;  %v6205_v32 = vld [vmem:[%s7902_s0 + $0x40] sm:$0xff]  }
   0xe   :  { %v561_v50 = vsel %vm549_vm3, %v556_v39, %v560_v40  ;;  %v577_v8 = vsel %vm549_vm3, %v572_v59, %v576_v60  ;;  %v586_v9 = vshrl.u32 %v6195_v55, 16  ;;  %v590_v10 = vshll.u32 %v6200_v62, 16  ;;  %v6201_v14 = vld [vmem:[%s7902_s0 + $0x30] sm:$0xff]   ;;  %v6204_v19 = vld [vmem:[%s7902_s0 + $0x38] sm:$0xff]   ;;  %v6208_v35 = vld [vmem:[%s7902_s0 + $0x48] sm:$0xff]  }
   0xf   :  { %v1802_v58 = vand.u32 %v1746_v53, %v6374_v4  ;;  %v2450_v3 = vand.u32 %v2394_v61, %v6374_v4  ;;  %v1186_v11 = vsel %vm1183_vm4, %v1184_v63, %v1185_v0  ;;  %v584_v13 = vrot.slane %v582_v2, 1  ;;  %v6207_v43 = vld [vmem:[%s7902_s0 + $0x30] sm:$0xff]   ;;  %v6210_v46 = vld [vmem:[%s7902_s0 + $0x38] sm:$0xff]   ;;  %v6214_v2 = vld [vmem:[%s7902_s0 + $0x48] sm:$0xff]  }
  0x10   :  { %v580_v15 = vor.u32 %v578_v6, %v576_v60  ;;  %v1187_v16 = vrot.slane %v6198_v7, 1  ;;  %v592_v18 = vrot.slane %v590_v10, 1  ;;  %v606_v28 = vshll.u32 %v6204_v19, 16  ;;  %v6212_v56 = vld [vmem:[%s7902_s0 + $0x58] sm:$0xff]   ;;  %v6216_v7 = vld [vmem:[%s7902_s0 + $0x68] sm:$0xff]  }
  0x11   :  { %5852 = vmatmul.mubr.msk.bf16.gmra.mrb[4].mxu1 %vm142_vm2, %v6177_v20  ;;  %5832 = vmatmul.mubr.msk.bf16.gmra.mrb[4].mxu0 %vm142_vm2, %v6179_v21  ;;  %v588_v17 = vor.u32 %v586_v9, %v584_v13  ;;  %v1189_v20 = vrot.slane %v6202_v12, 1  ;;  %v598_v21 = vshll.u32 %v6201_v14, 16  ;;  %v610_v39 = vshrl.u32 %v6204_v19, 16 }
  0x12   :  { %5855 = vmatprep.mubr.msk.bf16.mxu1 %vm142_vm2, %v6180_v23  ;;  %5835 = vmatprep.mubr.msk.bf16.mxu0 %vm142_vm2, %v6182_v24  ;;  %v585_v22 = vsel %vm549_vm3, %v580_v15, %v584_v13  ;;  %v1188_v23 = vsel %vm1183_vm4, %v1185_v0, %v1187_v16  ;;  %v594_v24 = vshrl.u32 %v6200_v62, 16  ;;  %v608_v37 = vrot.slane %v606_v28, 1  ;;  %v6215_v13 = vld [vmem:[%s7902_s0 + $0x50] sm:$0xff]  }
  0x13   :  { %5939 = vmatprep.subr.bf16.mxu1 %v1802_v58  ;;  %5977 = vmatprep.subr.bf16.mxu0 %v2450_v3  ;;  %v1190_v30 = vsel %vm1183_vm4, %v1187_v16, %v1189_v20  ;;  %v600_v31 = vrot.slane %v598_v21, 1  ;;  %v614_v40 = vshll.u32 %v6205_v32, 16  ;;  %v622_v45 = vshll.u32 %v6208_v35, 16 }
  0x14   :  { %v596_v33 = vor.u32 %v594_v24, %v592_v18  ;;  %v612_v51 = vor.u32 %v610_v39, %v608_v37  ;;  %v1195_v52 = vrot.slane %v6207_v43, 1  ;;  %v1197_v55 = vrot.slane %v6210_v46, 1  ;;  %v6233_v24 = vld [vmem:[%s7901_s1 + $0x4] sm:$0x18]  }
  0x15   :  { %v616_v49 = vrot.slane %v614_v40, 1  ;;  %v624_v54 = vrot.slane %v622_v45, 1  ;;  %v626_v61 = vshrl.u32 %v6208_v35, 16  ;;  %v658_v39 = vshrl.u32 %v6216_v7, 16  ;;  %v6222_v45 = vld [vmem:[%s7902_s0 + $0x68] sm:$0xff]  }
  0x16   :  { %v601_v41 = vsel %vm549_vm3, %v596_v33, %v600_v31  ;;  %v1198_v63 = vsel %vm1183_vm4, %v1195_v52, %v1197_v55  ;;  %vm3907_vm8 = vsmask.f32 5376  ;;  %vm5201_vm10 = vcmask 519168  }
  0x17   :  { %v617_v59 = vsel %vm549_vm3, %v612_v51, %v616_v49 }
  0x19   :  { %5856 = vmatmul.mubr.msk.bf16.gmra.mrb[8].mxu1 %vm142_vm2, %v6181_v25  ;;  %5836 = vmatmul.mubr.msk.bf16.gmra.mrb[8].mxu0 %vm142_vm2, %v6183_v26  ;;  %v6203_v25 = vld [vmem:[%s7902_s0 + $0x20] sm:$0xff]   ;;  %v593_v26 = vsel %vm549_vm3, %v588_v17, %v592_v18  ;;  %v642_v17 = vshrl.u32 %v6212_v56, 16  ;;  %v6218_v18 = vld [vmem:[%s7902_s0 + $0x58] sm:$0xff]  }
  0x1a   :  { %5859 = vmatprep.mubr.msk.bf16.mxu1 %vm142_vm2, %v6184_v27  ;;  %5839 = vmatprep.mubr.msk.bf16.mxu0 %vm142_vm2, %v6186_v29  ;;  %v602_v27 = vshrl.u32 %v6201_v14, 16  ;;  %v6206_v29 = vld [vmem:[%s7902_s0 + $0x28] sm:$0xff]   ;;  %v1191_v34 = vrot.slane %v6203_v25, 1  ;;  %v654_v14 = vshll.u32 %v6216_v7, 16  ;;  %v1203_v25 = vrot.slane %v6215_v13, 1  ;;  %v6227_v13 = vld [vmem:[%s7902_s0 + $0x80] sm:$0xff]  }
  0x1b   :  { %v1205_v28 = vrot.slane %v6218_v18, 1 }
  0x1c   :  { %v604_v36 = vor.u32 %v602_v27, %v600_v31  ;;  %v1192_v42 = vsel %vm1183_vm4, %v1189_v20, %v1191_v34  ;;  %v2916_v31 = vshll.u32 %v6233_v24, 16 }
  0x1e   :  { %v2918_v35 = vrot.slane %v2916_v31, 4 }
  0x21   :  { %5860 = vmatmul.mubr.msk.bf16.gmra.mrb[12].mxu1 %vm142_vm2, %v6185_v38  ;;  %5840 = vmatmul.mubr.msk.bf16.gmra.mrb[12].mxu0 %vm142_vm2, %v6187_v44  ;;  %v1193_v38 = vrot.slane %v6206_v29, 1  ;;  %v618_v44 = vshrl.u32 %v6205_v32, 16  ;;  %v6220_v29 = vld [vmem:[%s7902_s0 + $0x78] sm:$0xff]  }
  0x22   :  { %5865 = vmatprep.mubr.msk.bf16.mxu1 %vm142_vm2, %v561_v50  ;;  %5843 = vmatprep.mubr.msk.bf16.mxu0 %vm142_vm2, %v6191_v47  ;;  %v609_v47 = vsel %vm549_vm3, %v604_v36, %v608_v37  ;;  %v6209_v50 = vld [vmem:[%s7902_s0 + $0x50] sm:$0xff]   ;;  %v6219_v36 = vld [vmem:[%s7902_s0 + $0x60] sm:$0xff]  }
  0x23   :  { %v1194_v48 = vsel %vm1183_vm4, %v1191_v34, %v1193_v38  ;;  %v620_v53 = vor.u32 %v618_v44, %v616_v49  ;;  %v630_v57 = vshll.u32 %v6209_v50, 16  ;;  %v1196_v60 = vsel %vm1183_vm4, %v1193_v38, %v1195_v52  ;;  %v6224_v52 = vld [vmem:[%s7902_s0 + $0x88] sm:$0xff]  }
  0x24   :  { %v634_v0 = vshrl.u32 %v6209_v50, 16  ;;  %v670_v44 = vshll.u32 %v6220_v29, 16  ;;  %v1207_v49 = vrot.slane %v6219_v36, 1  ;;  %v6221_v50 = vld [vmem:[%s7902_s0 + $0x80] sm:$0xff]   ;;  %v690_v18 = vshrl.u32 %v6224_v52, 16 }
  0x25   :  { %v625_v62 = vsel %vm549_vm3, %v620_v53, %v624_v54 }
  0x29   :  { %5866 = vmatmul.mubr.msk.bf16.vlgmr.msra.gmra.mrb[16].mxu1 %vm142_vm2, %v569_v5  ;;  %5844 = vmatmul.mubr.msk.bf16.gmra.mrb[16].mxu0 %vm142_vm2, %v6192_v1  ;;  %v638_v1 = vshll.u32 %v6212_v56, 16  ;;  %v632_v5 = vrot.slane %v630_v57, 1  ;;  %v1209_v56 = vrot.slane %v6222_v45, 1 }
  0x2a   :  { %5940 = vmatpush3.bf16.msra.mxu1 %v1802_v58  ;;  %5869 = vmatprep.mubr.msk.bf16.mxu1 %vm142_vm2, %v577_v8  ;;  %v6211_v58 = vld [vmem:[%s7902_s0 + $0x40] sm:$0xff]   ;;  %v628_v8 = vor.u32 %v626_v61, %v624_v54  ;;  %v674_v61 = vshrl.u32 %v6220_v29, 16  ;;  %v6232_v29 = vld [vmem:[%s7902_s0 + $0x90] ss:$0 sps:$4 sm:$0x11]  }
  0x2b   :  { %5903 = vmatprep.mubr.msk.bf16.mxu0 %vm142_vm2, %v1186_v11  ;;  %v1199_v6 = vrot.slane %v6211_v58, 1  ;;  %v636_v9 = vor.u32 %v634_v0, %v632_v5  ;;  %v640_v10 = vrot.slane %v638_v1, 1  ;;  %v1201_v11 = vrot.slane %v6214_v2, 1 }
  0x2c   :  { %v633_v15 = vsel %vm549_vm3, %v628_v8, %v632_v5  ;;  %v678_v58 = vshll.u32 %v6221_v50, 16  ;;  %v1210_v1 = vsel %vm1183_vm4, %v1207_v49, %v1209_v56  ;;  %v686_v2 = vshll.u32 %v6224_v52, 16  ;;  %v6225_v5 = vld [vmem:[%s7902_s0 + $0x90] ss:$0 sps:$4 sm:$0x11]  }
  0x2d   :  { %v1200_v16 = vsel %vm1183_vm4, %v1197_v55, %v1199_v6  ;;  %v641_v19 = vsel %vm549_vm3, %v636_v9, %v640_v10  ;;  %v1202_v20 = vsel %vm1183_vm4, %v1199_v6, %v1201_v11  ;;  %v644_v27 = vor.u32 %v642_v17, %v640_v10 }
  0x2e   :  { %v1204_v38 = vsel %vm1183_vm4, %v1201_v11, %v1203_v25  ;;  %v672_v55 = vrot.slane %v670_v44, 1  ;;  %v680_v6 = vrot.slane %v678_v58, 1  ;;  %v688_v10 = vrot.slane %v686_v2, 1  ;;  %v6235_v58 = vld [vmem:[%s7902_s0 + $0x28] sm:$0xff]   ;;  %v6246_v2 = vld [vmem:[%s7902_s0 + $0x30] sm:$0xff]  }
  0x30   :  { %v676_v7 = vor.u32 %v674_v61, %v672_v55 }
  0x31   :  { %5870 = vmatmul.mubr.msk.bf16.gmra.mrb[20].mxu1 %vm142_vm2, %v585_v22  ;;  %5904 = vmatmul.mubr.msk.bf16.vlgmr.msra.gmra.mrb[20].mxu0 %vm142_vm2, %v1188_v23  ;;  %v6217_v23 = vld [vmem:[%s7902_s0 + $0x70] sm:$0xff]  }
  0x32   :  { %5978 = vmatpush3.bf16.msra.mxu0 %v2450_v3  ;;  %5873 = vmatprep.mubr.msk.bf16.mxu1 %vm142_vm2, %v593_v26  ;;  %v6213_v3 = vld [vmem:[%s7902_s0 + $0x60] sm:$0xff]   ;;  %v656_v26 = vrot.slane %v654_v14, 1  ;;  %v662_v33 = vshll.u32 %v6217_v23, 16  ;;  %v666_v43 = vshrl.u32 %v6217_v23, 16  ;;  %v6228_v14 = vld [vmem:[%s7902_s0 + $0x8] sm:$0xfe]  }
  0x33   :  { %5907 = vmatprep.mubr.msk.bf16.mxu0 %vm142_vm2, %v1190_v30  ;;  %v646_v12 = vshll.u32 %v6213_v3, 16  ;;  %v650_v21 = vshrl.u32 %v6213_v3, 16  ;;  %v2913_v30 = vshrl.u32 %v6233_v24, 16  ;;  %v6226_v3 = vld [vmem:[%s7902_s0 + $0x78] sm:$0xff]   ;;  %v6236_v24 = vld [vmem:[%s7902_s0 + $0x8] sm:$0xfe]  }
  0x34   :  { %v664_v46 = vrot.slane %v662_v33, 1  ;;  %v660_v51 = vor.u32 %v658_v39, %v656_v26  ;;  %v1213_v11 = vrot.slane %v6226_v3, 1  ;;  %v6234_v39 = vld [vmem:[%s7902_s0 + $0x20] sm:$0xff]  }
  0x35   :  { %v648_v22 = vrot.slane %v646_v12, 1  ;;  %v2915_v34 = vrot.slane %v2913_v30, 3  ;;  %v694_v12 = vshll.u32 %v6225_v5, 16  ;;  %v1700_v30 = vrot.slane %v6228_v14, 1  ;;  %v6241_v14 = vld [vmem:[%s7902_s0 + $0x38] sm:$0xff]  }
  0x36   :  { %v668_v54 = vor.u32 %v666_v43, %v664_v46  ;;  %v1219_v43 = vrot.slane %v6232_v29, 1  ;;  %v1705_v52 = vrot.slane %v6234_v39, 1  ;;  %v1711_v29 = vrot.slane %v6241_v14, 1 }
  0x37   :  { %v652_v32 = vor.u32 %v650_v21, %v648_v22  ;;  %v649_v37 = vsel %vm549_vm3, %v644_v27, %v648_v22  ;;  %v2919_v40 = vor.u32 %v2918_v35, %v2915_v34  ;;  %v696_v23 = vrot.slane %v694_v12, 1 }
  0x38   :  { %v673_v0 = vsel %vm549_vm3, %v668_v54, %v672_v55  ;;  %v692_v27 = vor.u32 %v690_v18, %v688_v10  ;;  %v2222_v34 = vshrl.u32 %v6236_v24, 16  ;;  %v2225_v35 = vshll.u32 %v6236_v24, 16 }
  0x39   :  { %5874 = vmatmul.mubr.msk.bf16.gmra.mrb[24].mxu1 %vm142_vm2, %v601_v41  ;;  %5908 = vmatmul.mubr.msk.bf16.gmra.mrb[24].mxu0 %vm142_vm2, %v1192_v42  ;;  %v657_v41 = vsel %vm549_vm3, %v652_v32, %v656_v26  ;;  %v1206_v42 = vsel %vm1183_vm4, %v1203_v25, %v1205_v28  ;;  %v1215_v25 = vrot.slane %v6227_v13, 1  ;;  %v2266_v12 = vshrl.u32 %v6246_v2, 16 }
  0x3a   :  { %5877 = vmatprep.mubr.msk.bf16.mxu1 %vm142_vm2, %v609_v47  ;;  %5911 = vmatprep.mubr.msk.bf16.mxu0 %vm142_vm2, %v1194_v48  ;;  %v6600_v47 = vand.u32 %v2919_v40, %v6374_v4  ;;  %v6239_v48 = vld [vmem:[%s7901_s1 + $0x8] ss:$0 sps:$4 sm:$0x66]   ;;  %v697_v36 = vsel %vm549_vm3, %v692_v27, %v696_v23  ;;  %v6238_v40 = vld [vmem:[%s7902_s0 + $0x18] sm:$0xff]   ;;  %v2224_v45 = vrot.slane %v2222_v34, 1  ;;  %v2269_v13 = vshll.u32 %v6246_v2, 16 }
  0x3b   :  { %v3433_v53 = vrot.slane %v6239_v48, 1  ;;  %v2268_v23 = vrot.slane %v2266_v12, 1  ;;  %v6252_v2 = vld [vmem:[%s7902_s0 + $0x60] sm:$0xff]  }
  0x3c   :  { %6015 = vmatprep.subr.bf16.mxu1 %v6600_v47  ;;  %v2271_v24 = vrot.slane %v2269_v13, 2 }
  0x3d   :  { %v6617_v57 = vand.u32 %v3433_v53, %v6374_v4 }
  0x3f   :  { %6053 = vmatprep.subr.bf16.mxu0 %v6617_v57 }
  0x41   :  { %5878 = vmatmul.mubr.msk.bf16.gmra.mrb[28].mxu1 %vm142_vm2, %v617_v59  ;;  %5912 = vmatmul.mubr.msk.bf16.gmra.mrb[28].mxu0 %vm142_vm2, %v1196_v60  ;;  %v665_v59 = vsel %vm549_vm3, %v660_v51, %v664_v46  ;;  %v1208_v60 = vsel %vm1183_vm4, %v1205_v28, %v1207_v49  ;;  %v6230_v28 = vld [vmem:[%s7902_s0 + $0x18] sm:$0xff]   ;;  %v2227_v46 = vrot.slane %v2225_v35, 2  ;;  %v6242_v49 = vld [vmem:[%s7902_s0 + $0x20] sm:$0xff]   ;;  %v2242_v51 = vshll.u32 %v6238_v40, 16  ;;  %v6245_v35 = vld [vmem:[%s7902_s0 + $0x48] sm:$0xff]  }
  0x42   :  { %5881 = vmatprep.mubr.msk.bf16.mxu1 %vm142_vm2, %v625_v62  ;;  %5915 = vmatprep.mubr.msk.bf16.mxu0 %vm142_vm2, %v1198_v63  ;;  %v6223_v62 = vld [vmem:[%s7902_s0 + $0x70] sm:$0xff]   ;;  %v682_v63 = vshrl.u32 %v6221_v50, 16  ;;  %v2239_v50 = vshrl.u32 %v6238_v40, 16  ;;  %v2248_v55 = vshrl.u32 %v6242_v49, 16 }
  0x43   :  { %v1211_v8 = vrot.slane %v6223_v62, 1  ;;  %v2228_v53 = vor.u32 %v2227_v46, %v2224_v45 }
  0x44   :  { %v684_v9 = vor.u32 %v682_v63, %v680_v6  ;;  %v2241_v62 = vrot.slane %v2239_v50, 1  ;;  %v2244_v63 = vrot.slane %v2242_v51, 2  ;;  %v2250_v5 = vrot.slane %v2248_v55, 1  ;;  %v6254_v50 = vld [vmem:[%s7902_s0 + $0x50] sm:$0xff]   ;;  %v4468_v55 = vld [vmem:[%s7901_s1 + $0xc] sm:$0x3] }
  0x45   :  { %v1212_v17 = vsel %vm1183_vm4, %v1209_v56, %v1211_v8  ;;  %v1214_v22 = vsel %vm1183_vm4, %v1211_v8, %v1213_v11  ;;  %v2251_v56 = vshll.u32 %v6242_v49, 16  ;;  %v1715_v51 = vrot.slane %v6245_v35, 1 }
  0x46   :  { %v689_v21 = vsel %vm549_vm3, %v684_v9, %v688_v10  ;;  %v2245_v9 = vor.u32 %v2244_v63, %v2241_v62  ;;  %v2302_v62 = vshrl.u32 %v6254_v50, 16  ;;  %v2305_v63 = vshll.u32 %v6254_v50, 16 }
  0x49   :  { %5882 = vmatmul.mubr.msk.bf16.gmra.mrb[32].mxu1 %vm142_vm2, %v633_v15  ;;  %5916 = vmatmul.mubr.msk.bf16.gmra.mrb[32].mxu0 %vm142_vm2, %v1200_v16  ;;  %v6229_v15 = vld [vmem:[%s7902_s0 + $0x10] sm:$0xff]   ;;  %v681_v16 = vsel %vm549_vm3, %v676_v7, %v680_v6  ;;  %v2253_v6 = vrot.slane %v2251_v56, 2  ;;  %v1707_v7 = vrot.slane %v6235_v58, 1 }
  0x4a   :  { %5885 = vmatprep.mubr.msk.bf16.mxu1 %vm142_vm2, %v641_v19  ;;  %5919 = vmatprep.mubr.msk.bf16.mxu0 %vm142_vm2, %v1202_v20  ;;  %v6231_v19 = vld [vmem:[%s7902_s0 + $0x88] sm:$0xff]   ;;  %v6237_v20 = vld [vmem:[%s7902_s0 + $0x10] sm:$0xff]   ;;  %v1701_v26 = vrot.slane %v6229_v15, 1 }
  0x4b   :  { %v1217_v31 = vrot.slane %v6231_v19, 1  ;;  %v2230_v32 = vshrl.u32 %v6237_v20, 16  ;;  %v2233_v33 = vshll.u32 %v6237_v20, 16  ;;  %v2254_v15 = vor.u32 %v2253_v6, %v2250_v5 }
  0x4d   :  { %v2232_v44 = vrot.slane %v2230_v32, 1  ;;  %v2235_v48 = vrot.slane %v2233_v33, 2  ;;  %v1220_v61 = vsel %vm1183_vm4, %v1217_v31, %v1219_v43  ;;  %v2272_v33 = vor.u32 %v2271_v24, %v2268_v23 }
  0x4f   :  { %v2236_v54 = vor.u32 %v2235_v48, %v2232_v44 }
  0x51   :  { %5886 = vmatmul.mubr.msk.bf16.gmra.mrb[36].mxu1 %vm142_vm2, %v649_v37  ;;  %5920 = vmatmul.mubr.msk.bf16.gmra.mrb[36].mxu0 %vm142_vm2, %v1204_v38  ;;  %v1216_v37 = vsel %vm1183_vm4, %v1213_v11, %v1215_v25  ;;  %v1703_v38 = vrot.slane %v6230_v28, 1  ;;  %v2237_v3 = vsel %vm2220_vm5, %v2228_v53, %v2236_v54  ;;  %v2246_v18 = vsel %vm2220_vm5, %v2236_v54, %v2245_v9 }
  0x52   :  { %5889 = vmatprep.mubr.msk.bf16.mxu1 %vm142_vm2, %v657_v41  ;;  %5923 = vmatprep.mubr.msk.bf16.mxu0 %vm142_vm2, %v1206_v42  ;;  %v1702_v41 = vsel %vm1183_vm4, %v1700_v30, %v1701_v26  ;;  %v1218_v42 = vsel %vm1183_vm4, %v1215_v25, %v1217_v31  ;;  %v2255_v25 = vsel %vm2220_vm5, %v2245_v9, %v2254_v15  ;;  %v6273_v31 = vld [vmem:[%s7901_s1 + $0x8] ss:$0 sps:$4 sm:$0xcc]  }
  0x59   :  { %5890 = vmatmul.mubr.msk.bf16.gmra.mrb[40].mxu1 %vm142_vm2, %v665_v59  ;;  %5924 = vmatmul.mubr.msk.bf16.gmra.mrb[40].mxu0 %vm142_vm2, %v1208_v60  ;;  %v6240_v59 = vld [vmem:[%s7902_s0 + $0x30] sm:$0xff]   ;;  %v1704_v60 = vsel %vm1183_vm4, %v1701_v26, %v1703_v38 }
  0x5a   :  { %5893 = vmatprep.mubr.msk.bf16.mxu1 %vm142_vm2, %v673_v0  ;;  %5927 = vmatprep.mubr.msk.bf16.mxu0 %vm142_vm2, %v1210_v1  ;;  %v6243_v0 = vld [vmem:[%s7902_s0 + $0x28] sm:$0xff]   ;;  %v1706_v1 = vsel %vm1183_vm4, %v1703_v38, %v1705_v52  ;;  %v1709_v8 = vrot.slane %v6240_v59, 1 }
  0x5b   :  { %v2257_v10 = vshrl.u32 %v6243_v0, 16  ;;  %v2260_v11 = vshll.u32 %v6243_v0, 16  ;;  %v6249_v0 = vld [vmem:[%s7902_s0 + $0x58] sm:$0xff]  }
  0x5c   :  { %v1719_v12 = vrot.slane %v6249_v0, 1 }
  0x5d   :  { %v2259_v19 = vrot.slane %v2257_v10, 1  ;;  %v2262_v20 = vrot.slane %v2260_v11, 2  ;;  %v2304_v10 = vrot.slane %v2302_v62, 1  ;;  %v2307_v11 = vrot.slane %v2305_v63, 2  ;;  %v6261_v62 = vld [vmem:[%s7902_s0 + $0x88] sm:$0xff]  }
  0x5f   :  { %v2263_v30 = vor.u32 %v2262_v20, %v2259_v19  ;;  %v6256_v20 = vld [vmem:[%s7902_s0 + $0x70] sm:$0xff]  }
  0x61   :  { %5894 = vmatmul.mubr.msk.bf16.gmra.mrb[44].mxu1 %vm142_vm2, %v681_v16  ;;  %5928 = vmatmul.mubr.msk.bf16.gmra.mrb[44].mxu0 %vm142_vm2, %v1212_v17  ;;  %v6247_v16 = vld [vmem:[%s7902_s0 + $0x38] sm:$0xff]   ;;  %v1708_v17 = vsel %vm1183_vm4, %v1705_v52, %v1707_v7  ;;  %v2264_v43 = vsel %vm2220_vm5, %v2254_v15, %v2263_v30  ;;  %v2273_v48 = vsel %vm2220_vm5, %v2263_v30, %v2272_v33  ;;  %v6262_v30 = vld [vmem:[%s7902_s0 + $0x70] sm:$0xff]  }
  0x62   :  { %5897 = vmatprep.mubr.msk.bf16.mxu1 %vm142_vm2, %v689_v21  ;;  %5931 = vmatprep.mubr.msk.bf16.mxu0 %vm142_vm2, %v1214_v22  ;;  %v1710_v21 = vsel %vm1183_vm4, %v1707_v7, %v1709_v8  ;;  %v6244_v22 = vld [vmem:[%s7902_s0 + $0x40] sm:$0xff]   ;;  %v2275_v26 = vshrl.u32 %v6247_v16, 16  ;;  %v2278_v27 = vshll.u32 %v6247_v16, 16 }
  0x63   :  { %v1713_v32 = vrot.slane %v6244_v22, 1  ;;  %v6258_v7 = vld [vmem:[%s7902_s0 + $0x60] sm:$0xff]   ;;  %v6259_v22 = vld [vmem:[%s7902_s0 + $0x68] sm:$0xff]  }
  0x64   :  { %v2277_v38 = vrot.slane %v2275_v26, 1  ;;  %v2280_v39 = vrot.slane %v2278_v27, 2  ;;  %v2320_v16 = vshrl.u32 %v6258_v7, 16  ;;  %v2323_v19 = vshll.u32 %v6258_v7, 16 }
  0x65   :  { %v1714_v46 = vsel %vm1183_vm4, %v1711_v29, %v1713_v32  ;;  %v2332_v35 = vshll.u32 %v6259_v22, 16 }
  0x66   :  { %v2281_v56 = vor.u32 %v2280_v39, %v2277_v38  ;;  %v2322_v26 = vrot.slane %v2320_v16, 1  ;;  %v6257_v38 = vld [vmem:[%s7902_s0 + $0x78] sm:$0xff]  }
  0x68   :  { %v2282_v5 = vsel %vm2220_vm5, %v2272_v33, %v2281_v56 }
  0x69   :  { %5898 = vmatmul.mubr.msk.bf16.gmra.mrb[48].mxu1 %vm142_vm2, %v697_v36  ;;  %5932 = vmatmul.mubr.msk.bf16.gmra.mrb[48].mxu0 %vm142_vm2, %v1216_v37  ;;  %v4082_v36 = vshrl.u32 %v6273_v31, 16  ;;  %v4085_v37 = vshll.u32 %v6273_v31, 16 }
  0x6a   :  { %5941 = vmatprep.mubr.msk.bf16.mxu1 %vm142_vm2, %v1702_v41  ;;  %5935 = vmatprep.mubr.msk.bf16.mxu0 %vm142_vm2, %v1218_v42  ;;  %v6251_v41 = vld [vmem:[%s7902_s0 + $0x48] sm:$0xff]   ;;  %v1712_v42 = vsel %vm1183_vm4, %v1709_v8, %v1711_v29  ;;  %v2325_v29 = vrot.slane %v2323_v19, 2 }
  0x6b   :  { %v4084_v44 = vrot.slane %v4082_v36, 2  ;;  %v4087_v45 = vrot.slane %v4085_v37, 3  ;;  %v2293_v54 = vshrl.u32 %v6251_v41, 16  ;;  %v2296_v58 = vshll.u32 %v6251_v41, 16  ;;  %v6263_v41 = vld [vmem:[%s7902_s0 + $0x78] sm:$0xff]  }
  0x6c   :  { %v2338_v36 = vshrl.u32 %v6262_v30, 16  ;;  %v2341_v37 = vshll.u32 %v6262_v30, 16  ;;  %v6268_v19 = vld [vmem:[%s7902_s0 + $0x8] sm:$0xfc]  }
  0x6d   :  { %v4088_v52 = vor.u32 %v4087_v45, %v4084_v44  ;;  %v2298_v6 = vrot.slane %v2296_v58, 2  ;;  %v2334_v44 = vrot.slane %v2332_v35, 2  ;;  %v6266_v45 = vld [vmem:[%s7902_s0 + $0x80] sm:$0xff]  }
  0x6e   :  { %v2343_v50 = vrot.slane %v2341_v37, 2  ;;  %v2356_v58 = vshrl.u32 %v6266_v45, 16  ;;  %v6270_v37 = vld [vmem:[%s7902_s0 + $0x18] sm:$0xff]  }
  0x6f   :  { %v6758_v59 = vand.u32 %v4088_v52, %v6374_v4  ;;  %v1727_v52 = vrot.slane %v6257_v38, 1 }
  0x70   :  { %v2358_v7 = vrot.slane %v2356_v58, 1 }
  0x71   :  { %5942 = vmatmul.mubr.msk.bf16.vlgmr.msra.gmra.mrb[52].mxu1 %vm142_vm2, %v1704_v60  ;;  %5936 = vmatmul.mubr.msk.bf16.gmra.mrb[52].mxu0 %vm142_vm2, %v1220_v61  ;;  %v6761_v60 = vand.u32 %v4468_v55, %v6374_v4  ;;  %v6255_v4 = vld [vmem:[%s7902_s0 + $0x58] sm:$0xff]  }
  0x72   :  { %6016 = vmatpush3.bf16.msra.mxu1 %v6600_v47  ;;  %5945 = vmatprep.mubr.msk.bf16.mxu1 %vm142_vm2, %v1706_v1  ;;  %v6250_v47 = vld [vmem:[%s7902_s0 + $0x40] sm:$0xff]   ;;  %v2295_v1 = vrot.slane %v2293_v54, 1  ;;  %v2311_v13 = vshrl.u32 %v6255_v4, 16  ;;  %v2314_v15 = vshll.u32 %v6255_v4, 16  ;;  %v2350_v54 = vshll.u32 %v6263_v41, 16  ;;  %v6267_v4 = vld [vmem:[%s7902_s0 + $0x88] sm:$0xff]  }
  0x73   :  { %5979 = vmatprep.mubr.msk.bf16.mxu0 %vm142_vm2, %v2237_v3  ;;  %v2284_v28 = vshrl.u32 %v6250_v47, 16  ;;  %v2287_v34 = vshll.u32 %v6250_v47, 16  ;;  %6091 = vmatprep.subr.bf16.mxu1 %v6758_v59  ;;  %v1716_v3 = vsel %vm1183_vm4, %v1713_v32, %v1715_v51  ;;  %v1721_v47 = vrot.slane %v6252_v2, 1 }
  0x74   :  { %v2299_v14 = vor.u32 %v2298_v6, %v2295_v1  ;;  %v2329_v32 = vshrl.u32 %v6259_v22, 16  ;;  %v2352_v2 = vrot.slane %v2350_v54, 2  ;;  %v6264_v6 = vld [vmem:[%s7902_s0 + $0x90] sm:$0xff]   ;;  %v6278_v54 = vld [vmem:[%s7902_s0 + $0x20] sm:$0xff]  }
  0x75   :  { %v2286_v40 = vrot.slane %v2284_v28, 1  ;;  %v2289_v49 = vrot.slane %v2287_v34, 2  ;;  %v1722_v27 = vsel %vm1183_vm4, %v1719_v12, %v1721_v47  ;;  %v1725_v34 = vrot.slane %v6256_v20, 1  ;;  %v6269_v20 = vld [vmem:[%s7902_s0 + $0x10] sm:$0xff]  }
  0x76   :  { %v2331_v39 = vrot.slane %v2329_v32, 1 }
  0x77   :  { %v2290_v61 = vor.u32 %v2289_v49, %v2286_v40  ;;  %v6260_v40 = vld [vmem:[%s7902_s0 + $0x80] sm:$0xff]   ;;  %v2340_v49 = vrot.slane %v2338_v36, 1  ;;  %v1728_v0 = vsel %vm1183_vm4, %v1725_v34, %v1727_v52 }
  0x78   :  { %v1729_v55 = vrot.slane %v6260_v40, 1 }
  0x79   :  { %5946 = vmatmul.mubr.msk.bf16.gmra.mrb[56].mxu1 %vm142_vm2, %v1708_v17  ;;  %5980 = vmatmul.mubr.msk.bf16.vlgmr.msra.gmra.mrb[56].mxu0 %vm142_vm2, %v2246_v18  ;;  %v2291_v9 = vsel %vm2220_vm5, %v2281_v56, %v2290_v61  ;;  %v6253_v17 = vld [vmem:[%s7902_s0 + $0x68] sm:$0xff]   ;;  %v2308_v18 = vor.u32 %v2307_v11, %v2304_v10  ;;  %v2300_v24 = vsel %vm2220_vm5, %v2290_v61, %v2299_v14  ;;  %v2359_v61 = vshll.u32 %v6266_v45, 16 }
  0x7a   :  { %6054 = vmatpush3.bf16.msra.mxu0 %v6617_v57  ;;  %5949 = vmatprep.mubr.msk.bf16.mxu1 %vm142_vm2, %v1710_v21  ;;  %v6737_v57 = vld [vmem:[%s7902_s0 + $0x50] sm:$0xff]   ;;  %v2313_v21 = vrot.slane %v2311_v13, 1  ;;  %v1723_v31 = vrot.slane %v6253_v17, 1  ;;  %v2344_v56 = vor.u32 %v2343_v50, %v2340_v49  ;;  %v1731_v10 = vrot.slane %v6261_v62, 1 }
  0x7b   :  { %5983 = vmatprep.mubr.msk.bf16.mxu0 %vm142_vm2, %v2255_v25  ;;  %v1717_v53 = vrot.slane %v6737_v57, 1  ;;  %6129 = vmatprep.subr.bf16.mxu0 %v6761_v60  ;;  %v2316_v25 = vrot.slane %v2314_v15, 2  ;;  %v2309_v28 = vsel %vm2220_vm5, %v2299_v14, %v2308_v18  ;;  %v2326_v57 = vor.u32 %v2325_v29, %v2322_v26  ;;  %v6265_v17 = vld [vmem:[%s7902_s0 + $0x98] ss:$0 sps:$4 sm:$0x11]  }
  0x7c   :  { %v2368_v13 = vshll.u32 %v6267_v4, 16  ;;  %v1733_v14 = vrot.slane %v6264_v6, 1  ;;  %v1735_v29 = vrot.slane %v6265_v17, 1  ;;  %v2873_v45 = vrot.slane %v6270_v37, 2  ;;  %v6283_v6 = vld [vmem:[%s7902_s0 + $0x40] sm:$0xff]  }
  0x7d   :  { %v1718_v8 = vsel %vm1183_vm4, %v1715_v51, %v1717_v53  ;;  %v1720_v23 = vsel %vm1183_vm4, %v1717_v53, %v1719_v12  ;;  %v2317_v33 = vor.u32 %v2316_v25, %v2313_v21  ;;  %v2347_v51 = vshrl.u32 %v6263_v41, 16  ;;  %v6294_v37 = vld [vmem:[%s7902_s0 + $0x60] sm:$0xff]  }
  0x7e   :  { %v2335_v53 = vor.u32 %v2334_v44, %v2331_v39  ;;  %v2365_v12 = vshrl.u32 %v6267_v4, 16  ;;  %v1732_v21 = vsel %vm1183_vm4, %v1729_v55, %v1731_v10  ;;  %v1734_v25 = vsel %vm1183_vm4, %v1731_v10, %v1733_v14  ;;  %v6277_v44 = vld [vmem:[%s7902_s0 + $0x18] sm:$0xff]  }
  0x7f   :  { %v2349_v63 = vrot.slane %v2347_v51, 1  ;;  %v3394_v50 = vrot.slane %v6277_v44, 2  ;;  %v6275_v51 = vld [vmem:[%s7902_s0 + $0x28] sm:$0xff]  }
  0x80   :  { %v2336_v1 = vsel %vm2220_vm5, %v2326_v57, %v2335_v53  ;;  %v2877_v62 = vrot.slane %v6275_v51, 2 }
  0x81   :  { %5950 = vmatmul.mubr.msk.bf16.gmra.mrb[60].mxu1 %vm142_vm2, %v1712_v42  ;;  %5984 = vmatmul.mubr.msk.bf16.gmra.mrb[60].mxu0 %vm142_vm2, %v2264_v43  ;;  %v1724_v42 = vsel %vm1183_vm4, %v1721_v47, %v1723_v31  ;;  %v2318_v43 = vsel %vm2220_vm5, %v2308_v18, %v2317_v33  ;;  %v2353_v11 = vor.u32 %v2352_v2, %v2349_v63  ;;  %v6272_v18 = vld [vmem:[%s7902_s0 + $0x98] ss:$0 sps:$4 sm:$0x33]   ;;  %v3396_v63 = vrot.slane %v6278_v54, 2 }
  0x82   :  { %5953 = vmatprep.mubr.msk.bf16.mxu1 %vm142_vm2, %v1714_v46  ;;  %5987 = vmatprep.mubr.msk.bf16.mxu0 %vm142_vm2, %v2273_v48  ;;  %v1726_v46 = vsel %vm1183_vm4, %v1723_v31, %v1725_v34  ;;  %v2327_v48 = vsel %vm2220_vm5, %v2317_v33, %v2326_v57  ;;  %v2383_v31 = vshrl.u32 %v6272_v18, 16  ;;  %v2386_v32 = vshll.u32 %v6272_v18, 16  ;;  %v6280_v2 = vld [vmem:[%s7902_s0 + $0x38] sm:$0xff]   ;;  %v6289_v18 = vld [vmem:[%s7902_s0 + $0x48] sm:$0xff]  }
  0x83   :  { %v2354_v22 = vsel %vm2220_vm5, %v2344_v56, %v2353_v11  ;;  %v2870_v33 = vrot.slane %v6268_v19, 2  ;;  %v2871_v34 = vrot.slane %v6269_v20, 2  ;;  %v1736_v57 = vsel %vm1183_vm4, %v1733_v14, %v1735_v29  ;;  %v6286_v14 = vld [vmem:[%s7902_s0 + $0x40] sm:$0xff]  }
  0x84   :  { %v2385_v38 = vrot.slane %v2383_v31, 1  ;;  %v2388_v39 = vrot.slane %v2386_v32, 2  ;;  %v3404_v20 = vrot.slane %v6286_v14, 2  ;;  %v6291_v29 = vld [vmem:[%s7902_s0 + $0x60] sm:$0xff]  }
  0x85   :  { %v2872_v40 = vsel %vm2869_vm6, %v2870_v33, %v2871_v34  ;;  %v2891_v33 = vrot.slane %v6291_v29, 2  ;;  %v6302_v14 = vld [vmem:[%s7902_s0 + $0x80] sm:$0xff]  }
  0x89   :  { %5954 = vmatmul.mubr.msk.bf16.gmra.mrb[64].mxu1 %vm142_vm2, %v1716_v3  ;;  %5988 = vmatmul.mubr.msk.bf16.gmra.mrb[64].mxu0 %vm142_vm2, %v2282_v5  ;;  %v1730_v3 = vsel %vm1183_vm4, %v1727_v52, %v1729_v55  ;;  %v2345_v5 = vsel %vm2220_vm5, %v2335_v53, %v2344_v56  ;;  %v2874_v52 = vsel %vm2869_vm6, %v2871_v34, %v2873_v45  ;;  %v6279_v56 = vld [vmem:[%s7902_s0 + $0x30] sm:$0xff]  }
  0x8a   :  { %5957 = vmatprep.mubr.msk.bf16.mxu1 %vm142_vm2, %v1718_v8  ;;  %5991 = vmatprep.mubr.msk.bf16.mxu0 %vm142_vm2, %v2291_v9  ;;  %v2361_v8 = vrot.slane %v2359_v61, 2  ;;  %v6271_v9 = vld [vmem:[%s7902_s0 + $0x90] sm:$0xff]   ;;  %v6281_v61 = vld [vmem:[%s7902_s0 + $0x28] sm:$0xff]  }
  0x8b   :  { %v2374_v16 = vshrl.u32 %v6271_v9, 16  ;;  %v2377_v47 = vshll.u32 %v6271_v9, 16  ;;  %v2881_v9 = vrot.slane %v6280_v2, 2 }
  0x8c   :  { %v2362_v15 = vor.u32 %v2361_v8, %v2358_v7  ;;  %v6285_v7 = vld [vmem:[%s7902_s0 + $0x38] sm:$0xff]  }
  0x8e   :  { %v2363_v26 = vsel %vm2220_vm5, %v2353_v11, %v2362_v15  ;;  %v2883_v11 = vrot.slane %v6283_v6, 2 }
  0x91   :  { %5958 = vmatmul.mubr.msk.bf16.gmra.mrb[68].mxu1 %vm142_vm2, %v1720_v23  ;;  %5992 = vmatmul.mubr.msk.bf16.gmra.mrb[68].mxu0 %vm142_vm2, %v2300_v24  ;;  %v2367_v23 = vrot.slane %v2365_v12, 1  ;;  %v2370_v24 = vrot.slane %v2368_v13, 2  ;;  %v3402_v12 = vrot.slane %v6285_v7, 2  ;;  %v6284_v13 = vld [vmem:[%s7902_s0 + $0x48] sm:$0xff]  }
  0x92   :  { %5961 = vmatprep.mubr.msk.bf16.mxu1 %vm142_vm2, %v1722_v27  ;;  %5995 = vmatprep.mubr.msk.bf16.mxu0 %vm142_vm2, %v2309_v28  ;;  %v2376_v27 = vrot.slane %v2374_v16, 1  ;;  %v2379_v28 = vrot.slane %v2377_v47, 2  ;;  %v6287_v16 = vld [vmem:[%s7902_s0 + $0x50] sm:$0xff]   ;;  %v2884_v47 = vsel %vm2869_vm6, %v2881_v9, %v2883_v11  ;;  %v2885_v19 = vrot.slane %v6284_v13, 2 }
  0x93   :  { %v2371_v30 = vor.u32 %v2370_v24, %v2367_v23  ;;  %v6288_v23 = vld [vmem:[%s7902_s0 + $0x58] sm:$0xff]  }
  0x94   :  { %v2380_v35 = vor.u32 %v2379_v28, %v2376_v27  ;;  %v2886_v24 = vsel %vm2869_vm6, %v2883_v11, %v2885_v19  ;;  %v2889_v31 = vrot.slane %v6288_v23, 2 }
  0x95   :  { %v2372_v36 = vsel %vm2220_vm5, %v2362_v15, %v2371_v30 }
  0x96   :  { %v2381_v41 = vsel %vm2220_vm5, %v2371_v30, %v2380_v35  ;;  %v6293_v30 = vld [vmem:[%s7902_s0 + $0x58] sm:$0xff]  }
  0x97   :  { %v3410_v34 = vrot.slane %v6293_v30, 2 }
  0x99   :  { %5962 = vmatmul.mubr.msk.bf16.gmra.mrb[72].mxu1 %vm142_vm2, %v1724_v42  ;;  %5996 = vmatmul.mubr.msk.bf16.gmra.mrb[72].mxu0 %vm142_vm2, %v2318_v43  ;;  %v6274_v42 = vld [vmem:[%s7902_s0 + $0x20] sm:$0xff]   ;;  %v6276_v43 = vld [vmem:[%s7902_s0 + $0x10] sm:$0xfc]  }
  0x9a   :  { %5965 = vmatprep.mubr.msk.bf16.mxu1 %vm142_vm2, %v1726_v46  ;;  %5999 = vmatprep.mubr.msk.bf16.mxu0 %vm142_vm2, %v2327_v48  ;;  %v2389_v46 = vor.u32 %v2388_v39, %v2385_v38  ;;  %v2875_v48 = vrot.slane %v6274_v42, 2  ;;  %v3393_v49 = vrot.slane %v6276_v43, 2  ;;  %v2892_v38 = vsel %vm2869_vm6, %v2889_v31, %v2891_v33 }
  0x9b   :  { %v3412_v43 = vrot.slane %v6294_v37, 2 }
  0x9c   :  { %v2390_v53 = vsel %vm2220_vm5, %v2380_v35, %v2389_v46  ;;  %v2876_v55 = vsel %vm2869_vm6, %v2873_v45, %v2875_v48  ;;  %v3395_v58 = vsel %vm2869_vm6, %v3393_v49, %v3394_v50  ;;  %v2878_v4 = vsel %vm2869_vm6, %v2875_v48, %v2877_v62 }
  0x9d   :  { %v3413_v54 = vsel %vm2869_vm6, %v3410_v34, %v3412_v43 }
  0xa1   :  { %5966 = vmatmul.mubr.msk.bf16.gmra.mrb[76].mxu1 %vm142_vm2, %v1728_v0  ;;  %6000 = vmatmul.mubr.msk.bf16.gmra.mrb[76].mxu0 %vm142_vm2, %v2336_v1  ;;  %v2879_v0 = vrot.slane %v6279_v56, 2  ;;  %v3398_v1 = vrot.slane %v6281_v61, 2  ;;  %v6298_v56 = vld [vmem:[%s7902_s0 + $0x70] sm:$0xff]  }
  0xa2   :  { %5969 = vmatprep.mubr.msk.bf16.mxu1 %vm142_vm2, %v1730_v3  ;;  %6003 = vmatprep.mubr.msk.bf16.mxu0 %vm142_vm2, %v2345_v5  ;;  %v3397_v3 = vsel %vm2869_vm6, %v3394_v50, %v3396_v63 }
  0xa3   :  { %v2880_v5 = vsel %vm2869_vm6, %v2877_v62, %v2879_v0  ;;  %v3399_v8 = vsel %vm2869_vm6, %v3396_v63, %v3398_v1  ;;  %v2882_v15 = vsel %vm2869_vm6, %v2879_v0, %v2881_v9  ;;  %v7006_v0 = vld [vmem:[%s7902_s0 + $0x80] sm:$0xff]   ;;  %v6300_v9 = vld [vmem:[%s7902_s0 + $0x88] sm:$0xff]  }
  0xa9   :  { %5970 = vmatmul.mubr.msk.bf16.gmra.mrb[80].mxu1 %vm142_vm2, %v1732_v21  ;;  %6004 = vmatmul.mubr.msk.bf16.gmra.mrb[80].mxu0 %vm142_vm2, %v2354_v22  ;;  %v2887_v21 = vrot.slane %v6287_v16, 2  ;;  %v3406_v22 = vrot.slane %v6289_v18, 2 }
  0xaa   :  { %5973 = vmatprep.mubr.msk.bf16.mxu1 %vm142_vm2, %v1734_v25  ;;  %6007 = vmatprep.mubr.msk.bf16.mxu0 %vm142_vm2, %v2363_v26  ;;  %v3405_v25 = vsel %vm2869_vm6, %v3402_v12, %v3404_v20  ;;  %v6290_v26 = vld [vmem:[%s7902_s0 + $0x50] sm:$0xff]  }
  0xab   :  { %v2888_v27 = vsel %vm2869_vm6, %v2885_v19, %v2887_v21  ;;  %v3407_v28 = vsel %vm2869_vm6, %v3404_v20, %v3406_v22  ;;  %v3408_v32 = vrot.slane %v6290_v26, 2  ;;  %v2890_v35 = vsel %vm2869_vm6, %v2887_v21, %v2889_v31  ;;  %v6307_v19 = vld [vmem:[%s7902_s0 + $0x10] sm:$0xfc]   ;;  %v6308_v20 = vld [vmem:[%s7902_s0 + $0x18] sm:$0xff]  }
  0xac   :  { %v2901_v21 = vrot.slane %v6300_v9, 2  ;;  %v3912_v26 = vshll.u32 %v6307_v19, 16 }
  0xad   :  { %v3411_v39 = vsel %vm2869_vm6, %v3408_v32, %v3410_v34  ;;  %v6306_v34 = vld [vmem:[%s7902_s0 + $0x90] sm:$0xff]  }
  0xb1   :  { %5974 = vmatmul.mubr.msk.bf16.gmra.mrb[84].mxu1 %vm142_vm2, %v1736_v57  ;;  %6008 = vmatmul.mubr.msk.bf16.gmra.mrb[84].mxu0 %vm142_vm2, %v2372_v36  ;;  %v3409_v57 = vsel %vm2869_vm6, %v3406_v22, %v3408_v32  ;;  %v6292_v36 = vld [vmem:[%s7902_s0 + $0x68] sm:$0xff]   ;;  %v3420_v22 = vrot.slane %v6302_v14, 2 }
  0xb2   :  { %6017 = vmatprep.mubr.msk.bf16.mxu1 %vm142_vm2, %v2872_v40  ;;  %6011 = vmatprep.mubr.msk.bf16.mxu0 %vm142_vm2, %v2381_v41  ;;  %v6295_v40 = vld [vmem:[%s7902_s0 + $0x70] sm:$0xff]   ;;  %v6297_v41 = vld [vmem:[%s7902_s0 + $0x68] sm:$0xff]   ;;  %v2893_v42 = vrot.slane %v6292_v36, 2 }
  0xb3   :  { %v2895_v44 = vrot.slane %v6295_v40, 2  ;;  %v3414_v45 = vrot.slane %v6297_v41, 2  ;;  %v6309_v40 = vld [vmem:[%s7902_s0 + $0x20] sm:$0xff]   ;;  %v7081_v41 = vld [vmem:[%s7902_s0 + $0x98] sm:$0xff]  }
  0xb5   :  { %v2896_v62 = vsel %vm2869_vm6, %v2893_v42, %v2895_v44  ;;  %v3415_v63 = vsel %vm2869_vm6, %v3412_v43, %v3414_v45 }
  0xb9   :  { %6018 = vmatmul.mubr.msk.bf16.vlgmr.msra.gmra.mrb[88].mxu1 %vm142_vm2, %v2874_v52  ;;  %6012 = vmatmul.mubr.msk.bf16.gmra.mrb[88].mxu0 %vm142_vm2, %v2390_v53  ;;  %v2894_v53 = vsel %vm2869_vm6, %v2891_v33, %v2893_v42  ;;  %v6304_v33 = vld [vmem:[%s7902_s0 + $0x98] ss:$0 sps:$4 sm:$0x33]   ;;  %v6312_v42 = vld [vmem:[%s7902_s0 + $0x28] sm:$0xff]  }
  0xba   :  { %6092 = vmatpush3.bf16.msra.mxu1 %v6758_v59  ;;  %6021 = vmatprep.mubr.msk.bf16.mxu1 %vm142_vm2, %v2876_v55  ;;  %v6282_v59 = vld [vmem:[%s7902_s0 + $0x30] sm:$0xff]   ;;  %v6296_v55 = vld [vmem:[%s7902_s0 + $0x78] sm:$0xff]  }
  0xbb   :  { %6055 = vmatprep.mubr.msk.bf16.mxu0 %vm142_vm2, %v3395_v58  ;;  %v3400_v10 = vrot.slane %v6282_v59, 2  ;;  %v2897_v2 = vrot.slane %v6296_v55, 2  ;;  %v3938_v55 = vshll.u32 %v6312_v42, 16 }
  0xbd   :  { %v3403_v17 = vsel %vm2869_vm6, %v3400_v10, %v3402_v12  ;;  %v2898_v12 = vsel %vm2869_vm6, %v2895_v44, %v2897_v2 }
  0xc1   :  { %6022 = vmatmul.mubr.msk.bf16.gmra.mrb[92].mxu1 %vm142_vm2, %v2878_v4  ;;  %6056 = vmatmul.mubr.msk.bf16.vlgmr.msra.gmra.mrb[92].mxu0 %vm142_vm2, %v3397_v3  ;;  %v3416_v4 = vrot.slane %v6298_v56, 2  ;;  %v2899_v3 = vrot.slane %v7006_v0, 2 }
  0xc2   :  { %6130 = vmatpush3.bf16.msra.mxu0 %v6761_v60  ;;  %6025 = vmatprep.mubr.msk.bf16.mxu1 %vm142_vm2, %v2880_v5  ;;  %v3401_v60 = vsel %vm2869_vm6, %v3398_v1, %v3400_v10  ;;  %v7011_v1 = vld [vmem:[%s7902_s0 + $0x78] sm:$0xff]  }
  0xc3   :  { %6059 = vmatprep.mubr.msk.bf16.mxu0 %vm142_vm2, %v3399_v8  ;;  %v3418_v59 = vrot.slane %v7011_v1, 2  ;;  %v3417_v13 = vsel %vm2869_vm6, %v3414_v45, %v3416_v4  ;;  %v2902_v36 = vsel %vm2869_vm6, %v2899_v3, %v2901_v21 }
  0xc5   :  { %v3419_v18 = vsel %vm2869_vm6, %v3416_v4, %v3418_v59  ;;  %v3421_v37 = vsel %vm2869_vm6, %v3418_v59, %v3420_v22  ;;  %v6313_v59 = vld [vmem:[%s7902_s0 + $0x30] sm:$0xff]  }
  0xc9   :  { %6026 = vmatmul.mubr.msk.bf16.gmra.mrb[96].mxu1 %vm142_vm2, %v2882_v15  ;;  %6060 = vmatmul.mubr.msk.bf16.gmra.mrb[96].mxu0 %vm142_vm2, %v3401_v60  ;;  %v7036_v15 = vld [vmem:[%s7902_s0 + $0x90] sm:$0xff]   ;;  %v7041_v60 = vld [vmem:[%s7902_s0 + $0x88] sm:$0xff]  }
  0xca   :  { %6029 = vmatprep.mubr.msk.bf16.mxu1 %vm142_vm2, %v2884_v47  ;;  %6063 = vmatprep.mubr.msk.bf16.mxu0 %vm142_vm2, %v3403_v17  ;;  %v2900_v17 = vsel %vm2869_vm6, %v2897_v2, %v2899_v3  ;;  %v2903_v23 = vrot.slane %v7036_v15, 2  ;;  %v6311_v3 = vld [vmem:[%s7902_s0 + $0xa0] ss:$0 sps:$4 sm:$0x33]   ;;  %v6314_v15 = vld [vmem:[%s7902_s0 + $0x10] sm:$0xf8]  }
  0xd1   :  { %6030 = vmatmul.mubr.msk.bf16.gmra.mrb[100].mxu1 %vm142_vm2, %v2886_v24  ;;  %6064 = vmatmul.mubr.msk.bf16.gmra.mrb[100].mxu0 %vm142_vm2, %v3405_v25  ;;  %v3422_v24 = vrot.slane %v7041_v60, 2  ;;  %v3909_v25 = vshrl.u32 %v6307_v19, 16  ;;  %v7122_v60 = vld [vmem:[%s7902_s0 + $0x18] sm:$0xff]   ;;  %v3428_v19 = vrot.slane %v6311_v3, 2  ;;  %v7183_v3 = vld [vmem:[%s7902_s0 + $0x50] sm:$0xff]  }
  0xd2   :  { %6033 = vmatprep.mubr.msk.bf16.mxu1 %vm142_vm2, %v2888_v27  ;;  %6067 = vmatprep.mubr.msk.bf16.mxu0 %vm142_vm2, %v3407_v28  ;;  %v3917_v27 = vshrl.u32 %v6308_v20, 16  ;;  %v3920_v28 = vshll.u32 %v6308_v20, 16 }
  0xd3   :  { %v3911_v45 = vrot.slane %v3909_v25, 2 }
  0xd9   :  { %6034 = vmatmul.mubr.msk.bf16.gmra.mrb[104].mxu1 %vm142_vm2, %v2890_v35  ;;  %6068 = vmatmul.mubr.msk.bf16.gmra.mrb[104].mxu0 %vm142_vm2, %v3409_v57 }
  0xda   :  { %6037 = vmatprep.mubr.msk.bf16.mxu1 %vm142_vm2, %v2892_v38  ;;  %6071 = vmatprep.mubr.msk.bf16.mxu0 %vm142_vm2, %v3411_v39  ;;  %v2904_v38 = vsel %vm2869_vm6, %v2901_v21, %v2903_v23  ;;  %v3423_v39 = vsel %vm2869_vm6, %v3420_v22, %v3422_v24  ;;  %v4563_v21 = vrot.slane %v6314_v15, 3  ;;  %v4564_v22 = vrot.slane %v7122_v60, 3  ;;  %v6325_v60 = vld [vmem:[%s7902_s0 + $0x58] sm:$0xff]  }
  0xdc   :  { %v5849_v46 = vpop.f32.mrb[0].mxu1  ;;  %v5829_v48 = vpop.f32.mrb[0].mxu0 }
  0xdd   :  { %404 = vst.msk [vmem:[#allocation2 + $0xb0] sm:$0xff] %vm381_vm7, %v5849_v46  ;;  %v318_v49 = vpop.f32.mrb[1].mxu1  ;;  %384 = vst.msk [vmem:[#allocation2 + $0x10] sm:$0xff] %vm381_vm7, %v5829_v48  ;;  %v238_v50 = vpop.f32.mrb[1].mxu0  ;;  %v3914_v46 = vrot.slane %v3912_v26, 3  ;;  %v3919_v48 = vrot.slane %v3917_v27, 2 }
  0xde   :  { %402 = vst.msk [vmem:[#allocation2 + $0xa0] sm:$0xff] %vm381_vm7, %v318_v49  ;;  %v5850_v51 = vpop.f32.mrb[2].mxu1  ;;  %382 = vst.msk [vmem:[#allocation2] sm:$0xff] %vm381_vm7, %v238_v50  ;;  %v5830_v52 = vpop.f32.mrb[2].mxu0  ;;  %v3922_v49 = vrot.slane %v3920_v28, 3  ;;  %v2905_v50 = vrot.slane %v6304_v33, 2 }
  0xdf   :  { %405 = vst.msk [vmem:[#allocation2 + $0xb8] sm:$0xff] %vm381_vm7, %v5850_v51  ;;  %v321_v58 = vpop.f32.mrb[3].mxu1  ;;  %385 = vst.msk [vmem:[#allocation2 + $0x18] sm:$0xff] %vm381_vm7, %v5830_v52  ;;  %v241_v61 = vpop.f32.mrb[3].mxu0  ;;  %v3424_v51 = vrot.slane %v6306_v34, 2  ;;  %v3926_v52 = vshrl.u32 %v6309_v40, 16  ;;  %v3915_v56 = vor.u32 %v3914_v46, %v3911_v45 }
  0xe0   :  { %403 = vst.msk [vmem:[#allocation2 + $0xa8] sm:$0xff] %vm381_vm7, %v321_v58  ;;  %383 = vst.msk [vmem:[#allocation2 + $0x8] sm:$0xff] %vm381_vm7, %v241_v61  ;;  %v7094_v58 = vor.u32 %v3922_v49, %v3919_v48  ;;  %v3426_v61 = vrot.slane %v7081_v41, 2  ;;  %v2906_v2 = vsel %vm2869_vm6, %v2903_v23, %v2905_v50  ;;  %v6318_v34 = vld [vmem:[%s7902_s0 + $0x40] sm:$0xff]   ;;  %v4565_v48 = vsel %vm4562_vm9, %v4563_v21, %v4564_v22 }
  0xe1   :  { %6038 = vmatmul.mubr.msk.bf16.gmra.mrb[108].mxu1 %vm142_vm2, %v2894_v53  ;;  %6072 = vmatmul.mubr.msk.bf16.gmra.mrb[108].mxu0 %vm142_vm2, %v3413_v54  ;;  %v3929_v53 = vshll.u32 %v6309_v40, 16  ;;  %v3935_v54 = vshrl.u32 %v6312_v42, 16  ;;  %v3425_v4 = vsel %vm2869_vm6, %v3422_v24, %v3424_v51  ;;  %v6316_v42 = vld [vmem:[%s7902_s0 + $0x20] sm:$0xff]  }
  0xe2   :  { %6041 = vmatprep.mubr.msk.bf16.mxu1 %vm142_vm2, %v2896_v62  ;;  %6075 = vmatprep.mubr.msk.bf16.mxu0 %vm142_vm2, %v3415_v63  ;;  %v3427_v14 = vsel %vm2869_vm6, %v3424_v51, %v3426_v61  ;;  %v7162_v51 = vld [vmem:[%s7902_s0 + $0x28] sm:$0xff]  }
  0xe3   :  { %v3937_v9 = vrot.slane %v3935_v54, 2  ;;  %v3962_v54 = vshrl.u32 %v6318_v34, 16 }
  0xe4   :  { %v5853_v5 = vpop.f32.mrb[4].mxu1  ;;  %v5833_v6 = vpop.f32.mrb[4].mxu0  ;;  %v945_v26 = vld [vmem:[#allocation2 + $0x10] sm:$0xff] }
  0xe5   :  { %408 = vst.msk [vmem:[#allocation2 + $0xd0] sm:$0xff] %vm381_vm7, %v5853_v5  ;;  %v334_v7 = vpop.f32.mrb[5].mxu1  ;;  %388 = vst.msk [vmem:[#allocation2 + $0x30] sm:$0xff] %vm381_vm7, %v5833_v6  ;;  %v254_v8 = vpop.f32.mrb[5].mxu0 }
  0xe6   :  { %406 = vst.msk [vmem:[#allocation2 + $0xc0] sm:$0xff] %vm381_vm7, %v334_v7  ;;  %v5854_v10 = vpop.f32.mrb[6].mxu1  ;;  %386 = vst.msk [vmem:[#allocation2 + $0x20] sm:$0xff] %vm381_vm7, %v254_v8  ;;  %v5834_v11 = vpop.f32.mrb[6].mxu0  ;;  %v3928_v7 = vrot.slane %v3926_v52, 2  ;;  %v3931_v8 = vrot.slane %v3929_v53, 3 }
  0xe7   :  { %409 = vst.msk [vmem:[#allocation2 + $0xd8] sm:$0xff] %vm381_vm7, %v5854_v10  ;;  %v337_v16 = vpop.f32.mrb[7].mxu1  ;;  %389 = vst.msk [vmem:[#allocation2 + $0x38] sm:$0xff] %vm381_vm7, %v5834_v11  ;;  %v257_v47 = vpop.f32.mrb[7].mxu0  ;;  %v3940_v10 = vrot.slane %v3938_v55, 3  ;;  %v944_v46 = vld [vmem:[#allocation2 + $0x8] sm:$0xff] }
  0xe8   :  { %407 = vst.msk [vmem:[#allocation2 + $0xc8] sm:$0xff] %vm381_vm7, %v337_v16  ;;  %387 = vst.msk [vmem:[#allocation2 + $0x28] sm:$0xff] %vm381_vm7, %v257_v47  ;;  %v6317_v16 = vld [vmem:[%s7902_s0 + $0x38] sm:$0xff]   ;;  %v3944_v47 = vshrl.u32 %v6313_v59, 16  ;;  %v3965_v55 = vshll.u32 %v6318_v34, 16  ;;  %v3980_v34 = vshrl.u32 %v7183_v3, 16 }
  0xe9   :  { %6042 = vmatmul.mubr.msk.bf16.gmra.mrb[112].mxu1 %vm142_vm2, %v2898_v12  ;;  %6076 = vmatmul.mubr.msk.bf16.gmra.mrb[112].mxu0 %vm142_vm2, %v3417_v13  ;;  %v3924_v13 = vsel %vm3907_vm8, %v3915_v56, %v7094_v58  ;;  %v7133_v20 = vor.u32 %v3940_v10, %v3937_v9  ;;  %v3953_v23 = vshrl.u32 %v6317_v16, 16  ;;  %v3956_v24 = vshll.u32 %v6317_v16, 16 }
  0xea   :  { %6045 = vmatprep.mubr.msk.bf16.mxu1 %vm142_vm2, %v2900_v17  ;;  %6079 = vmatprep.mubr.msk.bf16.mxu0 %vm142_vm2, %v3419_v18  ;;  %v3947_v17 = vshll.u32 %v6313_v59, 16  ;;  %v3932_v18 = vor.u32 %v3931_v8, %v3928_v7  ;;  %v4566_v56 = vrot.slane %v6316_v42, 3  ;;  %v3964_v9 = vrot.slane %v3962_v54, 2  ;;  %v7239_v54 = vld [vmem:[%s7902_s0 + $0x48] sm:$0xff]  }
  0xeb   :  { %v3955_v49 = vrot.slane %v3953_v23, 2  ;;  %v3958_v50 = vrot.slane %v3956_v24, 3  ;;  %v3967_v10 = vrot.slane %v3965_v55, 3 }
  0xec   :  { %v5857_v29 = vpop.f32.mrb[8].mxu1  ;;  %v5837_v30 = vpop.f32.mrb[8].mxu0  ;;  %v3949_v33 = vrot.slane %v3947_v17, 3  ;;  %v3942_v40 = vsel %vm3907_vm8, %v3932_v18, %v7133_v20 }
  0xed   :  { %412 = vst.msk [vmem:[#allocation2 + $0xf0] sm:$0xff] %vm381_vm7, %v5857_v29  ;;  %v350_v31 = vpop.f32.mrb[9].mxu1  ;;  %392 = vst.msk [vmem:[#allocation2 + $0x50] sm:$0xff] %vm381_vm7, %v5837_v30  ;;  %v270_v32 = vpop.f32.mrb[9].mxu0  ;;  %v943_v30 = vld [vmem:[#allocation2] sm:$0xff] }
  0xee   :  { %410 = vst.msk [vmem:[#allocation2 + $0xe0] sm:$0xff] %vm381_vm7, %v350_v31  ;;  %v5858_v35 = vpop.f32.mrb[10].mxu1  ;;  %390 = vst.msk [vmem:[#allocation2 + $0x40] sm:$0xff] %vm381_vm7, %v270_v32  ;;  %v5838_v57 = vpop.f32.mrb[10].mxu0  ;;  %v3946_v32 = vrot.slane %v3944_v47, 2  ;;  %v4567_v47 = vsel %vm4562_vm9, %v4564_v22, %v4566_v56 }
  0xef   :  { %413 = vst.msk [vmem:[#allocation2 + $0xf8] sm:$0xff] %vm381_vm7, %v5858_v35  ;;  %v353_v43 = vpop.f32.mrb[11].mxu1  ;;  %393 = vst.msk [vmem:[#allocation2 + $0x58] sm:$0xff] %vm381_vm7, %v5838_v57  ;;  %v273_v44 = vpop.f32.mrb[11].mxu0  ;;  %v948_v23 = vld [vmem:[#allocation2 + $0x28] sm:$0xff] }
  0xf0   :  { %411 = vst.msk [vmem:[#allocation2 + $0xe8] sm:$0xff] %vm381_vm7, %v353_v43  ;;  %391 = vst.msk [vmem:[#allocation2 + $0x48] sm:$0xff] %vm381_vm7, %v273_v44  ;;  %v6321_v43 = vld [vmem:[%s7902_s0 + $0x48] sm:$0xff]   ;;  %v3950_v53 = vor.u32 %v3949_v33, %v3946_v32  ;;  %v3968_v32 = vor.u32 %v3967_v10, %v3964_v9 }
  0xf1   :  { %6046 = vmatmul.mubr.msk.bf16.gmra.mrb[116].mxu1 %vm142_vm2, %v2902_v36  ;;  %6080 = vmatmul.mubr.msk.bf16.gmra.mrb[116].mxu0 %vm142_vm2, %v3421_v37  ;;  %v946_v36 = vld [vmem:[#allocation2 + $0x18] sm:$0xff] }
  0xf2   :  { %6049 = vmatprep.mubr.msk.bf16.mxu1 %vm142_vm2, %v2904_v38  ;;  %6083 = vmatprep.mubr.msk.bf16.mxu0 %vm142_vm2, %v3423_v39  ;;  %v3933_v38 = vsel %vm3907_vm8, %v7094_v58, %v3932_v18  ;;  %v3429_v39 = vsel %vm2869_vm6, %v3426_v61, %v3428_v19  ;;  %v3971_v58 = vshrl.u32 %v6321_v43, 16  ;;  %v3974_v61 = vshll.u32 %v6321_v43, 16 }
  0xf3   :  { %v3951_v8 = vsel %vm3907_vm8, %v7133_v20, %v3950_v53 }
  0xf4   :  { %v5861_v62 = vpop.f32.mrb[12].mxu1  ;;  %v5841_v63 = vpop.f32.mrb[12].mxu0  ;;  %v3973_v17 = vrot.slane %v3971_v58, 2  ;;  %v3976_v18 = vrot.slane %v3974_v61, 3  ;;  %v953_v42 = vld [vmem:[#allocation2 + $0x50] sm:$0xff] }
  0xf5   :  { %416 = vst.msk [vmem:[#allocation2 + $0x110] sm:$0xff] %vm381_vm7, %v5861_v62  ;;  %v366_v0 = vpop.f32.mrb[13].mxu1  ;;  %396 = vst.msk [vmem:[#allocation2 + $0x70] sm:$0xff] %vm381_vm7, %v5841_v63  ;;  %v286_v1 = vpop.f32.mrb[13].mxu0  ;;  %v7172_v62 = vor.u32 %v3958_v50, %v3955_v49  ;;  %v4568_v63 = vrot.slane %v7162_v51, 3 }
  0xf6   :  { %414 = vst.msk [vmem:[#allocation2 + $0x100] sm:$0xff] %vm381_vm7, %v366_v0  ;;  %v5862_v5 = vpop.f32.mrb[14].mxu1  ;;  %394 = vst.msk [vmem:[#allocation2 + $0x60] sm:$0xff] %vm381_vm7, %v286_v1  ;;  %v5842_v6 = vpop.f32.mrb[14].mxu0  ;;  %v949_v1 = vld [vmem:[#allocation2 + $0x30] sm:$0xff]  ;;  %v954_v58 = vld [vmem:[#allocation2 + $0x58] sm:$0xff] }
  0xf7   :  { %417 = vst.msk [vmem:[#allocation2 + $0x118] sm:$0xff] %vm381_vm7, %v5862_v5  ;;  %v369_v11 = vpop.f32.mrb[15].mxu1  ;;  %397 = vst.msk [vmem:[#allocation2 + $0x78] sm:$0xff] %vm381_vm7, %v5842_v6  ;;  %v289_v12 = vpop.f32.mrb[15].mxu0  ;;  %v947_v6 = vld [vmem:[#allocation2 + $0x20] sm:$0xff]  ;;  %v3969_v49 = vsel %vm3907_vm8, %v7172_v62, %v3968_v32 }
  0xf8   :  { %415 = vst.msk [vmem:[#allocation2 + $0x108] sm:$0xff] %vm381_vm7, %v369_v11  ;;  %395 = vst.msk [vmem:[#allocation2 + $0x68] sm:$0xff] %vm381_vm7, %v289_v12  ;;  %v7190_v11 = vld [vmem:[%s7902_s0 + $0x38] sm:$0xff]  }
  0xf9   :  { %6050 = vmatmul.mubr.msk.bf16.gmra.mrb[120].mxu1 %vm142_vm2, %v2906_v2  ;;  %6084 = vmatmul.mubr.msk.bf16.gmra.mrb[120].mxu0 %vm142_vm2, %v3425_v4  ;;  %v7178_v4 = vld [vmem:[%s7902_s0 + $0x30] sm:$0xff]  }
  0xfa   :  { %6093 = vmatprep.mubr.msk.bf16.mxu1 %vm142_vm2, %v3924_v13  ;;  %6087 = vmatprep.mubr.msk.bf16.mxu0 %vm142_vm2, %v3427_v14  ;;  %v950_v14 = vld [vmem:[#allocation2 + $0x38] sm:$0xff]  ;;  %v4570_v33 = vrot.slane %v7178_v4, 3 }
  0xfc   :  { %v5867_v25 = vpop.f32.mrb[16].mxu1  ;;  %v5845_v27 = vpop.f32.mrb[16].mxu0  ;;  %v4571_v50 = vsel %vm4562_vm9, %v4568_v63, %v4570_v33 }
  0xfd   :  { %v981_v28 = vadd.f32 %v5867_v25, %v945_v26  ;;  %v800_v29 = vpop.f32.mrb[17].mxu1  ;;  %400 = vst.msk [vmem:[#allocation2 + $0x90] sm:$0xff] %vm381_vm7, %v5845_v27  ;;  %v302_v31 = vpop.f32.mrb[17].mxu0  ;;  %v3960_v26 = vsel %vm3907_vm8, %v3950_v53, %v7172_v62  ;;  %v4569_v27 = vsel %vm4562_vm9, %v4566_v56, %v4568_v63  ;;  %v7234_v53 = vld [vmem:[%s7902_s0 + $0x40] sm:$0xff]  }
  0xfe   :  { %v979_v35 = vadd.f32 %v943_v30, %v800_v29  ;;  %v5868_v57 = vpop.f32.mrb[18].mxu1  ;;  %398 = vst.msk [vmem:[#allocation2 + $0x80] sm:$0xff] %vm381_vm7, %v302_v31  ;;  %v5846_v37 = vpop.f32.mrb[18].mxu0 }
  0xff   :  { %1017 = vst.msk [vmem:[#allocation2 + $0x10] sm:$0xff] %vm381_vm7, %v981_v28  ;;  %v982_v44 = vadd.f32 %v5868_v57, %v946_v36  ;;  %v803_v45 = vpop.f32.mrb[19].mxu1  ;;  %401 = vst.msk [vmem:[#allocation2 + $0x98] sm:$0xff] %vm381_vm7, %v5846_v37  ;;  %v305_v41 = vpop.f32.mrb[19].mxu0  ;;  %v7215_v57 = vor.u32 %v3976_v18, %v3973_v17  ;;  %v3983_v36 = vshll.u32 %v7183_v3, 16  ;;  %v4572_v37 = vrot.slane %v7190_v11, 3 }
 0x100   :  { %1015 = vst.msk [vmem:[#allocation2] sm:$0xff] %vm381_vm7, %v979_v35  ;;  %v980_v52 = vadd.f32 %v944_v46, %v803_v45  ;;  %399 = vst.msk [vmem:[#allocation2 + $0x88] sm:$0xff] %vm381_vm7, %v305_v41  ;;  %v951_v41 = vld [vmem:[#allocation2 + $0x40] sm:$0xff] }
 0x101   :  { %1018 = vst.msk [vmem:[#allocation2 + $0x18] sm:$0xff] %vm381_vm7, %v982_v44  ;;  %6094 = vmatmul.mubr.msk.bf16.vlgmr.msra.gmra.mrb[124].mxu1 %vm142_vm2, %v3933_v38  ;;  %6088 = vmatmul.mubr.msk.bf16.gmra.mrb[124].mxu0 %vm142_vm2, %v3429_v39  ;;  %v3989_v38 = vshrl.u32 %v6325_v60, 16  ;;  %v3992_v39 = vshll.u32 %v6325_v60, 16  ;;  %v7224_v44 = vld [vmem:[%s7902_s0 + $0x60] sm:$0xff]   ;;  %v3978_v51 = vsel %vm3907_vm8, %v3968_v32, %v7215_v57  ;;  %v3985_v63 = vrot.slane %v3983_v36, 3  ;;  %v7270_v60 = vld [vmem:[%s7902_s0 + $0x50] sm:$0xff]  }
 0x102   :  { %1016 = vst.msk [vmem:[#allocation2 + $0x8] sm:$0xff] %vm381_vm7, %v980_v52  ;;  %6097 = vmatprep.mubr.msk.bf16.mxu1 %vm142_vm2, %v3942_v40  ;;  %6131 = vmatprep.mubr.msk.bf16.mxu0 %vm142_vm2, %v4565_v48  ;;  %v3982_v52 = vrot.slane %v3980_v34, 2  ;;  %v7283_v34 = vld [vmem:[%s7902_s0 + $0x58] sm:$0xff]  }
 0x104   :  { %v5871_v0 = vpop.f32.mrb[20].mxu1  ;;  %v5905_v2 = vpop.f32.mrb[20].mxu0  ;;  %v3986_v18 = vor.u32 %v3985_v63, %v3982_v52 }
 0x105   :  { %v985_v59 = vadd.f32 %v5871_v0, %v949_v1  ;;  %v816_v5 = vpop.f32.mrb[21].mxu1  ;;  %v1318_v7 = vpop.f32.mrb[21].mxu0  ;;  %v4573_v0 = vsel %vm4562_vm9, %v4570_v33, %v4572_v37  ;;  %v6329_v1 = vld [vmem:[%s7902_s0 + $0x68] sm:$0xff]   ;;  %v7278_v33 = vld [vmem:[%s7902_s0 + $0x70] sm:$0xff]  }
 0x106   :  { %v983_v12 = vadd.f32 %v947_v6, %v816_v5  ;;  %v5872_v13 = vpop.f32.mrb[22].mxu1  ;;  %v1463_v15 = vld [vmem:[#allocation2 + $0x10] sm:$0xff]  ;;  %v5906_v16 = vpop.f32.mrb[22].mxu0  ;;  %v3987_v11 = vsel %vm3907_vm8, %v7215_v57, %v3986_v18  ;;  %v6333_v57 = vld [vmem:[%s7902_s0 + $0x78] sm:$0xff]  }
 0x107   :  { %1021 = vst.msk [vmem:[#allocation2 + $0x30] sm:$0xff] %vm381_vm7, %v985_v59  ;;  %v986_v19 = vadd.f32 %v5872_v13, %v950_v14  ;;  %v1499_v20 = vadd.f32 %v5905_v2, %v1463_v15  ;;  %v819_v21 = vpop.f32.mrb[23].mxu1  ;;  %v1461_v24 = vld [vmem:[#allocation2] sm:$0xff]  ;;  %v1321_v25 = vpop.f32.mrb[23].mxu0  ;;  %v952_v59 = vld [vmem:[#allocation2 + $0x48] sm:$0xff]  ;;  %v3998_v13 = vshrl.u32 %v7224_v44, 16 }
 0x108   :  { %1019 = vst.msk [vmem:[#allocation2 + $0x20] sm:$0xff] %vm381_vm7, %v983_v12  ;;  %v984_v22 = vadd.f32 %v948_v23, %v819_v21  ;;  %v1497_v28 = vadd.f32 %v1461_v24, %v1318_v7  ;;  %v1464_v29 = vld [vmem:[#allocation2 + $0x18] sm:$0xff]  ;;  %v3991_v7 = vrot.slane %v3989_v38, 2  ;;  %v4576_v23 = vrot.slane %v7239_v54, 3 }
 0x109   :  { %1022 = vst.msk [vmem:[#allocation2 + $0x38] sm:$0xff] %vm381_vm7, %v986_v19  ;;  %1535 = vst.msk [vmem:[#allocation2 + $0x10] sm:$0xff] %vm381_vm7, %v1499_v20  ;;  %v1500_v30 = vadd.f32 %v5906_v16, %v1464_v29  ;;  %v1462_v31 = vld [vmem:[#allocation2 + $0x8] sm:$0xff]  ;;  %6098 = vmatmul.mubr.msk.bf16.gmra.mrb[128].mxu1 %vm142_vm2, %v3951_v8  ;;  %6132 = vmatmul.mubr.msk.bf16.vlgmr.msra.gmra.mrb[128].mxu0 %vm142_vm2, %v4567_v47  ;;  %v3994_v8 = vrot.slane %v3992_v39, 3  ;;  %v4574_v16 = vrot.slane %v7234_v53, 3  ;;  %v4001_v47 = vshll.u32 %v7224_v44, 16 }
 0x10a   :  { %1020 = vst.msk [vmem:[#allocation2 + $0x28] sm:$0xff] %vm381_vm7, %v984_v22  ;;  %1533 = vst.msk [vmem:[#allocation2] sm:$0xff] %vm381_vm7, %v1497_v28  ;;  %v1498_v35 = vadd.f32 %v1462_v31, %v1321_v25  ;;  %6101 = vmatprep.mubr.msk.bf16.mxu1 %vm142_vm2, %v3960_v26  ;;  %6135 = vmatprep.mubr.msk.bf16.mxu0 %vm142_vm2, %v4569_v27  ;;  %v4007_v19 = vshrl.u32 %v6329_v1, 16  ;;  %v4010_v20 = vshll.u32 %v6329_v1, 16  ;;  %v957_v25 = vld [vmem:[#allocation2 + $0x70] sm:$0xff]  ;;  %v4000_v27 = vrot.slane %v3998_v13, 2 }
 0x10b   :  { %1536 = vst.msk [vmem:[#allocation2 + $0x18] sm:$0xff] %vm381_vm7, %v1500_v30  ;;  %v7263_v21 = vor.u32 %v3994_v8, %v3991_v7  ;;  %v955_v29 = vld [vmem:[#allocation2 + $0x60] sm:$0xff]  ;;  %v4575_v31 = vsel %vm4562_vm9, %v4572_v37, %v4574_v16  ;;  %v4003_v32 = vrot.slane %v4001_v47, 3  ;;  %v958_v38 = vld [vmem:[#allocation2 + $0x78] sm:$0xff]  ;;  %v4019_v1 = vshll.u32 %v7278_v33, 16  ;;  %v7329_v47 = vld [vmem:[%s7902_s0 + $0x68] sm:$0xff]  }
 0x10c   :  { %1534 = vst.msk [vmem:[#allocation2 + $0x8] sm:$0xff] %vm381_vm7, %v1498_v35  ;;  %v5875_v40 = vpop.f32.mrb[24].mxu1  ;;  %v5909_v43 = vpop.f32.mrb[24].mxu0  ;;  %v4009_v37 = vrot.slane %v4007_v19, 2  ;;  %v7316_v7 = vld [vmem:[%s7902_s0 + $0x60] sm:$0xff]   ;;  %v962_v19 = vld [vmem:[#allocation2 + $0x98] sm:$0xff] }
 0x10d   :  { %v989_v45 = vadd.f32 %v5875_v40, %v953_v42  ;;  %v832_v46 = vpop.f32.mrb[25].mxu1  ;;  %v1334_v48 = vpop.f32.mrb[25].mxu0  ;;  %v4012_v42 = vrot.slane %v4010_v20, 3 }
 0x10e   :  { %v987_v55 = vadd.f32 %v951_v41, %v832_v46  ;;  %v5876_v56 = vpop.f32.mrb[26].mxu1  ;;  %v1467_v61 = vld [vmem:[#allocation2 + $0x30] sm:$0xff]  ;;  %v5910_v62 = vpop.f32.mrb[26].mxu0  ;;  %v956_v46 = vld [vmem:[#allocation2 + $0x68] sm:$0xff] }
 0x10f   :  { %1025 = vst.msk [vmem:[#allocation2 + $0x50] sm:$0xff] %vm381_vm7, %v989_v45  ;;  %v990_v2 = vadd.f32 %v5876_v56, %v954_v58  ;;  %v1503_v4 = vadd.f32 %v5909_v43, %v1467_v61  ;;  %v835_v3 = vpop.f32.mrb[27].mxu1  ;;  %v1465_v5 = vld [vmem:[#allocation2 + $0x20] sm:$0xff]  ;;  %v1337_v6 = vpop.f32.mrb[27].mxu0  ;;  %v4004_v61 = vor.u32 %v4003_v32, %v4000_v27 }
 0x110   :  { %1023 = vst.msk [vmem:[#allocation2 + $0x40] sm:$0xff] %vm381_vm7, %v987_v55  ;;  %v988_v9 = vadd.f32 %v952_v59, %v835_v3  ;;  %v1501_v10 = vadd.f32 %v1465_v5, %v1334_v48  ;;  %v1468_v12 = vld [vmem:[#allocation2 + $0x38] sm:$0xff]  ;;  %v4028_v3 = vshll.u32 %v6333_v57, 16  ;;  %v961_v5 = vld [vmem:[#allocation2 + $0x90] sm:$0xff] }
 0x111   :  { %1026 = vst.msk [vmem:[#allocation2 + $0x58] sm:$0xff] %vm381_vm7, %v990_v2  ;;  %1539 = vst.msk [vmem:[#allocation2 + $0x30] sm:$0xff] %vm381_vm7, %v1503_v4  ;;  %v1504_v14 = vadd.f32 %v5910_v62, %v1468_v12  ;;  %v1466_v15 = vld [vmem:[#allocation2 + $0x28] sm:$0xff]  ;;  %6102 = vmatmul.mubr.msk.bf16.gmra.mrb[132].mxu1 %vm142_vm2, %v3969_v49  ;;  %6136 = vmatmul.mubr.msk.bf16.gmra.mrb[132].mxu0 %vm142_vm2, %v4571_v50  ;;  %v3996_v49 = vsel %vm3907_vm8, %v3986_v18, %v7263_v21  ;;  %v4578_v62 = vrot.slane %v7270_v60, 3 }
 0x112   :  { %1024 = vst.msk [vmem:[#allocation2 + $0x48] sm:$0xff] %vm381_vm7, %v988_v9  ;;  %1537 = vst.msk [vmem:[#allocation2 + $0x20] sm:$0xff] %vm381_vm7, %v1501_v10  ;;  %v1502_v17 = vadd.f32 %v1466_v15, %v1337_v6  ;;  %6105 = vmatprep.mubr.msk.bf16.mxu1 %vm142_vm2, %v3978_v51  ;;  %6139 = vmatprep.mubr.msk.bf16.mxu0 %vm142_vm2, %v4573_v0  ;;  %v4577_v50 = vsel %vm4562_vm9, %v4574_v16, %v4576_v23  ;;  %v4016_v51 = vshrl.u32 %v7278_v33, 16  ;;  %v959_v10 = vld [vmem:[#allocation2 + $0x80] sm:$0xff] }
 0x113   :  { %1540 = vst.msk [vmem:[#allocation2 + $0x38] sm:$0xff] %vm381_vm7, %v1504_v14  ;;  %v7307_v0 = vor.u32 %v4012_v42, %v4009_v37  ;;  %v4580_v2 = vrot.slane %v7283_v34, 3  ;;  %v4025_v4 = vshrl.u32 %v6333_v57, 16  ;;  %v4005_v13 = vsel %vm3907_vm8, %v7263_v21, %v4004_v61  ;;  %v6334_v16 = vld [vmem:[%s7902_s0 + $0x80] sm:$0xff]   ;;  %v7363_v57 = vld [vmem:[%s7902_s0 + $0x90] sm:$0xff]  }
 0x114   :  { %1538 = vst.msk [vmem:[#allocation2 + $0x28] sm:$0xff] %vm381_vm7, %v1502_v17  ;;  %v5879_v24 = vpop.f32.mrb[28].mxu1  ;;  %v5913_v26 = vpop.f32.mrb[28].mxu0  ;;  %v4579_v14 = vsel %vm4562_vm9, %v4576_v23, %v4578_v62  ;;  %v4018_v15 = vrot.slane %v4016_v51, 2  ;;  %v4021_v21 = vrot.slane %v4019_v1, 3  ;;  %v7371_v51 = vld [vmem:[%s7902_s0 + $0x78] sm:$0xff]  }
 0x115   :  { %v993_v22 = vadd.f32 %v5879_v24, %v957_v25  ;;  %v848_v28 = vpop.f32.mrb[29].mxu1  ;;  %v1350_v30 = vpop.f32.mrb[29].mxu0  ;;  %v4014_v54 = vsel %vm3907_vm8, %v4004_v61, %v7307_v0  ;;  %v4581_v23 = vsel %vm4562_vm9, %v4578_v62, %v4580_v2  ;;  %v6337_v25 = vld [vmem:[%s7902_s0 + $0x88] sm:$0xff]  }
 0x116   :  { %v991_v35 = vadd.f32 %v955_v29, %v848_v28  ;;  %v5880_v36 = vpop.f32.mrb[30].mxu1  ;;  %v1471_v39 = vld [vmem:[#allocation2 + $0x50] sm:$0xff]  ;;  %v5914_v40 = vpop.f32.mrb[30].mxu0  ;;  %v4022_v42 = vor.u32 %v4021_v21, %v4018_v15 }
 0x117   :  { %1029 = vst.msk [vmem:[#allocation2 + $0x70] sm:$0xff] %vm381_vm7, %v993_v22  ;;  %v994_v43 = vadd.f32 %v5880_v36, %v958_v38  ;;  %v1507_v44 = vadd.f32 %v5913_v26, %v1471_v39  ;;  %v851_v45 = vpop.f32.mrb[31].mxu1  ;;  %v1469_v41 = vld [vmem:[#allocation2 + $0x40] sm:$0xff]  ;;  %v1353_v48 = vpop.f32.mrb[31].mxu0  ;;  %v960_v22 = vld [vmem:[#allocation2 + $0x88] sm:$0xff]  ;;  %v4582_v39 = vrot.slane %v7316_v7, 3 }
 0x118   :  { %1027 = vst.msk [vmem:[#allocation2 + $0x60] sm:$0xff] %vm381_vm7, %v991_v35  ;;  %v992_v52 = vadd.f32 %v956_v46, %v851_v45  ;;  %v1505_v53 = vadd.f32 %v1469_v41, %v1350_v30  ;;  %v1472_v55 = vld [vmem:[#allocation2 + $0x58] sm:$0xff]  ;;  %v4027_v30 = vrot.slane %v4025_v4, 2  ;;  %v4584_v46 = vrot.slane %v7329_v47, 3  ;;  %v7422_v47 = vld [vmem:[%s7902_s0 + $0x88] sm:$0xff]  }
 0x119   :  { %1030 = vst.msk [vmem:[#allocation2 + $0x78] sm:$0xff] %vm381_vm7, %v994_v43  ;;  %1543 = vst.msk [vmem:[#allocation2 + $0x50] sm:$0xff] %vm381_vm7, %v1507_v44  ;;  %v1508_v56 = vadd.f32 %v5914_v40, %v1472_v55  ;;  %v1470_v58 = vld [vmem:[#allocation2 + $0x48] sm:$0xff]  ;;  %6106 = vmatmul.mubr.msk.bf16.gmra.mrb[136].mxu1 %vm142_vm2, %v3987_v11  ;;  %6140 = vmatmul.mubr.msk.bf16.gmra.mrb[136].mxu0 %vm142_vm2, %v4575_v31  ;;  %v4030_v31 = vrot.slane %v4028_v3, 3  ;;  %v4034_v40 = vshrl.u32 %v6334_v16, 16  ;;  %v4037_v11 = vshll.u32 %v6334_v16, 16 }
 0x11a   :  { %1028 = vst.msk [vmem:[#allocation2 + $0x68] sm:$0xff] %vm381_vm7, %v992_v52  ;;  %1541 = vst.msk [vmem:[#allocation2 + $0x40] sm:$0xff] %vm381_vm7, %v1505_v53  ;;  %v1506_v63 = vadd.f32 %v1470_v58, %v1353_v48  ;;  %6109 = vmatprep.mubr.msk.bf16.mxu1 %vm142_vm2, %v3996_v49  ;;  %6143 = vmatprep.mubr.msk.bf16.mxu0 %vm142_vm2, %v4577_v50  ;;  %v4043_v43 = vshrl.u32 %v6337_v25, 16  ;;  %v4046_v44 = vshll.u32 %v6337_v25, 16  ;;  %v965_v48 = vld [vmem:[#allocation2 + $0xb0] sm:$0xff]  ;;  %v963_v55 = vld [vmem:[#allocation2 + $0xa0] sm:$0xff] }
 0x11b   :  { %1544 = vst.msk [vmem:[#allocation2 + $0x58] sm:$0xff] %vm381_vm7, %v1508_v56  ;;  %v7351_v45 = vor.u32 %v4030_v31, %v4027_v30  ;;  %v7358_v50 = vld [vmem:[%s7902_s0 + $0x70] sm:$0xff]   ;;  %v4583_v58 = vsel %vm4562_vm9, %v4580_v2, %v4582_v39  ;;  %v4036_v61 = vrot.slane %v4034_v40, 2  ;;  %v4039_v62 = vrot.slane %v4037_v11, 3  ;;  %v966_v4 = vld [vmem:[#allocation2 + $0xb8] sm:$0xff]  ;;  %v7404_v31 = vld [vmem:[%s7902_s0 + $0x80] sm:$0xff]  }
 0x11c   :  { %1542 = vst.msk [vmem:[#allocation2 + $0x48] sm:$0xff] %vm381_vm7, %v1506_v63  ;;  %v5883_v59 = vpop.f32.mrb[32].mxu1  ;;  %v5917_v6 = vpop.f32.mrb[32].mxu0  ;;  %v4048_v7 = vrot.slane %v4046_v44, 3  ;;  %v4055_v25 = vshll.u32 %v7363_v57, 16 }
 0x11d   :  { %v997_v8 = vadd.f32 %v5883_v59, %v961_v5  ;;  %v864_v9 = vpop.f32.mrb[33].mxu1  ;;  %v1366_v12 = vpop.f32.mrb[33].mxu0  ;;  %v4023_v5 = vsel %vm3907_vm8, %v7307_v0, %v4022_v42  ;;  %v6341_v0 = vld [vmem:[%s7902_s0 + $0x98] sm:$0xff]   ;;  %v6342_v40 = vld [vmem:[%s7902_s0 + $0xa0] ss:$0 sps:$4 sm:$0x77]  }
 0x11e   :  { %v995_v17 = vadd.f32 %v959_v10, %v864_v9  ;;  %v5884_v18 = vpop.f32.mrb[34].mxu1  ;;  %v1475_v20 = vld [vmem:[#allocation2 + $0x70] sm:$0xff]  ;;  %v5918_v24 = vpop.f32.mrb[34].mxu0  ;;  %v964_v9 = vld [vmem:[#allocation2 + $0xa8] sm:$0xff] }
 0x11f   :  { %1033 = vst.msk [vmem:[#allocation2 + $0x90] sm:$0xff] %vm381_vm7, %v997_v8  ;;  %v998_v26 = vadd.f32 %v5884_v18, %v962_v19  ;;  %v1511_v27 = vadd.f32 %v5917_v6, %v1475_v20  ;;  %v867_v60 = vpop.f32.mrb[35].mxu1  ;;  %v1473_v28 = vld [vmem:[#allocation2 + $0x60] sm:$0xff]  ;;  %v1369_v29 = vpop.f32.mrb[35].mxu0  ;;  %v4045_v6 = vrot.slane %v4043_v43, 2  ;;  %v4052_v18 = vshrl.u32 %v7363_v57, 16 }
 0x120   :  { %1031 = vst.msk [vmem:[#allocation2 + $0x80] sm:$0xff] %vm381_vm7, %v995_v17  ;;  %v996_v32 = vadd.f32 %v960_v22, %v867_v60  ;;  %v1509_v33 = vadd.f32 %v1473_v28, %v1366_v12  ;;  %v1476_v35 = vld [vmem:[#allocation2 + $0x78] sm:$0xff]  ;;  %v4064_v60 = vshll.u32 %v6341_v0, 16  ;;  %v969_v28 = vld [vmem:[#allocation2 + $0xd0] sm:$0xff]  ;;  %v968_v57 = vld [vmem:[#allocation2 + $0xc8] sm:$0xff] }
 0x121   :  { %1034 = vst.msk [vmem:[#allocation2 + $0x98] sm:$0xff] %vm381_vm7, %v998_v26  ;;  %1547 = vst.msk [vmem:[#allocation2 + $0x70] sm:$0xff] %vm381_vm7, %v1511_v27  ;;  %v1512_v36 = vadd.f32 %v5918_v24, %v1476_v35  ;;  %v1474_v38 = vld [vmem:[#allocation2 + $0x68] sm:$0xff]  ;;  %6110 = vmatmul.mubr.msk.bf16.gmra.mrb[140].mxu1 %vm142_vm2, %v4005_v13  ;;  %6144 = vmatmul.mubr.msk.bf16.gmra.mrb[140].mxu0 %vm142_vm2, %v4579_v14  ;;  %v4032_v13 = vsel %vm3907_vm8, %v4022_v42, %v7351_v45  ;;  %v4588_v26 = vrot.slane %v7371_v51, 3  ;;  %v967_v35 = vld [vmem:[#allocation2 + $0xc0] sm:$0xff] }
 0x122   :  { %1032 = vst.msk [vmem:[#allocation2 + $0x88] sm:$0xff] %vm381_vm7, %v996_v32  ;;  %1545 = vst.msk [vmem:[#allocation2 + $0x60] sm:$0xff] %vm381_vm7, %v1509_v33  ;;  %v1510_v37 = vadd.f32 %v1474_v38, %v1369_v29  ;;  %6113 = vmatprep.mubr.msk.bf16.mxu1 %vm142_vm2, %v4014_v54  ;;  %6147 = vmatprep.mubr.msk.bf16.mxu0 %vm142_vm2, %v4581_v23  ;;  %v4585_v14 = vsel %vm4562_vm9, %v4582_v39, %v4584_v46  ;;  %v4586_v54 = vrot.slane %v7358_v50, 3  ;;  %v970_v42 = vld [vmem:[#allocation2 + $0xd8] sm:$0xff] }
 0x123   :  { %1548 = vst.msk [vmem:[#allocation2 + $0x78] sm:$0xff] %vm381_vm7, %v1512_v36  ;;  %v4040_v24 = vor.u32 %v4039_v62, %v4036_v61  ;;  %v7395_v23 = vor.u32 %v4048_v7, %v4045_v6  ;;  %v4061_v27 = vshrl.u32 %v6341_v0, 16  ;;  %v4054_v30 = vrot.slane %v4052_v18, 2  ;;  %v974_v18 = vld [vmem:[#allocation2 + $0xf8] sm:$0xff] }
 0x124   :  { %1546 = vst.msk [vmem:[#allocation2 + $0x68] sm:$0xff] %vm381_vm7, %v1510_v37  ;;  %v5887_v41 = vpop.f32.mrb[36].mxu1  ;;  %v5921_v49 = vpop.f32.mrb[36].mxu0  ;;  %v4587_v39 = vsel %vm4562_vm9, %v4584_v46, %v4586_v54  ;;  %v4073_v6 = vshll.u32 %v6342_v40, 16 }
 0x125   :  { %v1001_v52 = vadd.f32 %v5887_v41, %v965_v48  ;;  %v880_v53 = vpop.f32.mrb[37].mxu1  ;;  %v1382_v56 = vpop.f32.mrb[37].mxu0  ;;  %v4041_v38 = vsel %vm3907_vm8, %v7351_v45, %v4040_v24  ;;  %v4050_v41 = vsel %vm3907_vm8, %v4040_v24, %v7395_v23  ;;  %v4057_v48 = vrot.slane %v4055_v25, 3 }
 0x126   :  { %v999_v63 = vadd.f32 %v963_v55, %v880_v53  ;;  %v5888_v1 = vpop.f32.mrb[38].mxu1  ;;  %v1479_v3 = vld [vmem:[#allocation2 + $0x90] sm:$0xff]  ;;  %v5922_v59 = vpop.f32.mrb[38].mxu0  ;;  %v4589_v45 = vsel %vm4562_vm9, %v4586_v54, %v4588_v26  ;;  %v4063_v55 = vrot.slane %v4061_v27, 2  ;;  %v972_v27 = vld [vmem:[#allocation2 + $0xe8] sm:$0xff] }
 0x127   :  { %1037 = vst.msk [vmem:[#allocation2 + $0xb0] sm:$0xff] %vm381_vm7, %v1001_v52  ;;  %v1002_v34 = vadd.f32 %v5888_v1, %v966_v4  ;;  %v1515_v2 = vadd.f32 %v5921_v49, %v1479_v3  ;;  %v883_v8 = vpop.f32.mrb[39].mxu1  ;;  %v1477_v10 = vld [vmem:[#allocation2 + $0x80] sm:$0xff]  ;;  %v1385_v12 = vpop.f32.mrb[39].mxu0  ;;  %v4590_v4 = vrot.slane %v7404_v31, 3 }
 0x128   :  { %1035 = vst.msk [vmem:[#allocation2 + $0xa0] sm:$0xff] %vm381_vm7, %v999_v63  ;;  %v1000_v15 = vadd.f32 %v964_v9, %v883_v8  ;;  %v1513_v16 = vadd.f32 %v1477_v10, %v1382_v56  ;;  %v1480_v17 = vld [vmem:[#allocation2 + $0x98] sm:$0xff]  ;;  %v4066_v56 = vrot.slane %v4064_v60, 3  ;;  %v973_v8 = vld [vmem:[#allocation2 + $0xf0] sm:$0xff] }
 0x129   :  { %1038 = vst.msk [vmem:[#allocation2 + $0xb8] sm:$0xff] %vm381_vm7, %v1002_v34  ;;  %1551 = vst.msk [vmem:[#allocation2 + $0x90] sm:$0xff] %vm381_vm7, %v1515_v2  ;;  %v1516_v19 = vadd.f32 %v5922_v59, %v1480_v17  ;;  %v1478_v20 = vld [vmem:[#allocation2 + $0x88] sm:$0xff]  ;;  %6114 = vmatmul.mubr.msk.bf16.gmra.mrb[144].mxu1 %vm142_vm2, %v4023_v5  ;;  %6148 = vmatmul.mubr.msk.bf16.gmra.mrb[144].mxu0 %vm142_vm2, %v4583_v58  ;;  %v4058_v59 = vor.u32 %v4057_v48, %v4054_v30  ;;  %v4070_v5 = vshrl.u32 %v6342_v40, 16 }
 0x12a   :  { %1036 = vst.msk [vmem:[#allocation2 + $0xa8] sm:$0xff] %vm381_vm7, %v1000_v15  ;;  %1549 = vst.msk [vmem:[#allocation2 + $0x80] sm:$0xff] %vm381_vm7, %v1513_v16  ;;  %v1514_v21 = vadd.f32 %v1478_v20, %v1385_v12  ;;  %6117 = vmatprep.mubr.msk.bf16.mxu1 %vm142_vm2, %v4032_v13  ;;  %6151 = vmatprep.mubr.msk.bf16.mxu0 %vm142_vm2, %v4585_v14  ;;  %v7436_v7 = vor.u32 %v4066_v56, %v4063_v55  ;;  %v4592_v34 = vrot.slane %v7422_v47, 3  ;;  %v971_v13 = vld [vmem:[#allocation2 + $0xe0] sm:$0xff]  ;;  %v7446_v15 = vld [vmem:[%s7902_s0 + $0x90] sm:$0xff]  }
 0x12b   :  { %1552 = vst.msk [vmem:[#allocation2 + $0x98] sm:$0xff] %vm381_vm7, %v1516_v19  ;;  %v4591_v0 = vsel %vm4562_vm9, %v4588_v26, %v4590_v4  ;;  %v4059_v24 = vsel %vm3907_vm8, %v7395_v23, %v4058_v59  ;;  %v4072_v54 = vrot.slane %v4070_v5, 2  ;;  %v7459_v23 = vld [vmem:[%s7902_s0 + $0x98] sm:$0xff]  }
 0x12c   :  { %1550 = vst.msk [vmem:[#allocation2 + $0x88] sm:$0xff] %vm381_vm7, %v1514_v21  ;;  %v5891_v22 = vpop.f32.mrb[40].mxu1  ;;  %v5925_v29 = vpop.f32.mrb[40].mxu0  ;;  %v4075_v21 = vrot.slane %v4073_v6, 3  ;;  %v4596_v40 = vrot.slane %v7459_v23, 3 }
 0x12d   :  { %v1005_v32 = vadd.f32 %v5891_v22, %v969_v28  ;;  %v896_v33 = vpop.f32.mrb[41].mxu1  ;;  %v1398_v36 = vpop.f32.mrb[41].mxu0  ;;  %v4068_v28 = vsel %vm3907_vm8, %v4058_v59, %v7436_v7 }
 0x12e   :  { %v1003_v11 = vadd.f32 %v967_v35, %v896_v33  ;;  %v5892_v37 = vpop.f32.mrb[42].mxu1  ;;  %v1483_v43 = vld [vmem:[#allocation2 + $0xb0] sm:$0xff]  ;;  %v5926_v44 = vpop.f32.mrb[42].mxu0 }
 0x12f   :  { %1041 = vst.msk [vmem:[#allocation2 + $0xd0] sm:$0xff] %vm381_vm7, %v1005_v32  ;;  %v1006_v46 = vadd.f32 %v5892_v37, %v970_v42  ;;  %v1519_v49 = vadd.f32 %v5925_v29, %v1483_v43  ;;  %v899_v50 = vpop.f32.mrb[43].mxu1  ;;  %v1481_v52 = vld [vmem:[#allocation2 + $0xa0] sm:$0xff]  ;;  %v1401_v53 = vpop.f32.mrb[43].mxu0  ;;  %v4593_v29 = vsel %vm4562_vm9, %v4590_v4, %v4592_v34  ;;  %v977_v37 = vld [vmem:[#allocation2 + $0x110] sm:$0xff] }
 0x130   :  { %1039 = vst.msk [vmem:[#allocation2 + $0xc0] sm:$0xff] %vm381_vm7, %v1003_v11  ;;  %v1004_v58 = vadd.f32 %v968_v57, %v899_v50  ;;  %v1517_v61 = vadd.f32 %v1481_v52, %v1398_v36  ;;  %v1484_v62 = vld [vmem:[#allocation2 + $0xb8] sm:$0xff] }
 0x131   :  { %1042 = vst.msk [vmem:[#allocation2 + $0xd8] sm:$0xff] %vm381_vm7, %v1006_v46  ;;  %1555 = vst.msk [vmem:[#allocation2 + $0xb0] sm:$0xff] %vm381_vm7, %v1519_v49  ;;  %v1520_v63 = vadd.f32 %v5926_v44, %v1484_v62  ;;  %v1482_v1 = vld [vmem:[#allocation2 + $0xa8] sm:$0xff]  ;;  %6118 = vmatmul.mubr.msk.bf16.gmra.mrb[148].mxu1 %vm142_vm2, %v4041_v38  ;;  %6152 = vmatmul.mubr.msk.bf16.gmra.mrb[148].mxu0 %vm142_vm2, %v4587_v39  ;;  %v4076_v38 = vor.u32 %v4075_v21, %v4072_v54  ;;  %v4594_v39 = vrot.slane %v7446_v15, 3  ;;  %v978_v50 = vld [vmem:[#allocation2 + $0x118] sm:$0xff] }
 0x132   :  { %1040 = vst.msk [vmem:[#allocation2 + $0xc8] sm:$0xff] %vm381_vm7, %v1004_v58  ;;  %1553 = vst.msk [vmem:[#allocation2 + $0xa0] sm:$0xff] %vm381_vm7, %v1517_v61  ;;  %v1518_v3 = vadd.f32 %v1482_v1, %v1401_v53  ;;  %6121 = vmatprep.mubr.msk.bf16.mxu1 %vm142_vm2, %v4050_v41  ;;  %6155 = vmatprep.mubr.msk.bf16.mxu0 %vm142_vm2, %v4589_v45  ;;  %v975_v41 = vld [vmem:[#allocation2 + $0x100] sm:$0xff]  ;;  %v976_v62 = vld [vmem:[#allocation2 + $0x108] sm:$0xff] }
 0x133   :  { %1556 = vst.msk [vmem:[#allocation2 + $0xb8] sm:$0xff] %vm381_vm7, %v1520_v63  ;;  %v6346_v45 = vld [vmem:[%s7902_s0 + $0xa0] ss:$0 sps:$4 sm:$0x77]   ;;  %v4077_v53 = vsel %vm3907_vm8, %v7436_v7, %v4076_v38  ;;  %v4595_v55 = vsel %vm4562_vm9, %v4592_v34, %v4594_v39  ;;  %v4597_v4 = vsel %vm4562_vm9, %v4594_v39, %v4596_v40 }
 0x134   :  { %1554 = vst.msk [vmem:[#allocation2 + $0xa8] sm:$0xff] %vm381_vm7, %v1518_v3  ;;  %v5895_v2 = vpop.f32.mrb[44].mxu1  ;;  %v5929_v9 = vpop.f32.mrb[44].mxu0  ;;  %v4598_v34 = vrot.slane %v6346_v45, 3 }
 0x135   :  { %v1009_v10 = vadd.f32 %v5895_v2, %v973_v8  ;;  %v912_v12 = vpop.f32.mrb[45].mxu1  ;;  %v1414_v14 = vpop.f32.mrb[45].mxu0  ;;  %v1983_v8 = vld [vmem:[#allocation2 + $0x10] sm:$0xff] }
 0x136   :  { %v1007_v16 = vadd.f32 %v971_v13, %v912_v12  ;;  %v5896_v17 = vpop.f32.mrb[46].mxu1  ;;  %v1487_v19 = vld [vmem:[#allocation2 + $0xd0] sm:$0xff]  ;;  %v5930_v20 = vpop.f32.mrb[46].mxu0  ;;  %v1981_v13 = vld [vmem:[#allocation2] sm:$0xff] }
 0x137   :  { %1045 = vst.msk [vmem:[#allocation2 + $0xf0] sm:$0xff] %vm381_vm7, %v1009_v10  ;;  %v1010_v51 = vadd.f32 %v5896_v17, %v974_v18  ;;  %v1523_v25 = vadd.f32 %v5929_v9, %v1487_v19  ;;  %v915_v26 = vpop.f32.mrb[47].mxu1  ;;  %v1485_v60 = vld [vmem:[#allocation2 + $0xc0] sm:$0xff]  ;;  %v1417_v22 = vpop.f32.mrb[47].mxu0  ;;  %v1984_v17 = vld [vmem:[#allocation2 + $0x18] sm:$0xff]  ;;  %v4599_v19 = vsel %vm4562_vm9, %v4596_v40, %v4598_v34 }
 0x138   :  { %1043 = vst.msk [vmem:[#allocation2 + $0xe0] sm:$0xff] %vm381_vm7, %v1007_v16  ;;  %v1008_v30 = vadd.f32 %v972_v27, %v915_v26  ;;  %v1521_v31 = vadd.f32 %v1485_v60, %v1414_v14  ;;  %v1488_v32 = vld [vmem:[#allocation2 + $0xd8] sm:$0xff] }
 0x139   :  { %1046 = vst.msk [vmem:[#allocation2 + $0xf8] sm:$0xff] %vm381_vm7, %v1010_v51  ;;  %1559 = vst.msk [vmem:[#allocation2 + $0xd0] sm:$0xff] %vm381_vm7, %v1523_v25  ;;  %v1524_v33 = vadd.f32 %v5930_v20, %v1488_v32  ;;  %v1486_v35 = vld [vmem:[#allocation2 + $0xc8] sm:$0xff]  ;;  %6122 = vmatmul.mubr.msk.bf16.gmra.mrb[152].mxu1 %vm142_vm2, %v4059_v24  ;;  %6156 = vmatmul.mubr.msk.bf16.gmra.mrb[152].mxu0 %vm142_vm2, %v4591_v0  ;;  %v1988_v40 = vld [vmem:[#allocation2 + $0x38] sm:$0xff] }
 0x13a   :  { %1044 = vst.msk [vmem:[#allocation2 + $0xe8] sm:$0xff] %vm381_vm7, %v1008_v30  ;;  %1557 = vst.msk [vmem:[#allocation2 + $0xc0] sm:$0xff] %vm381_vm7, %v1521_v31  ;;  %v1522_v36 = vadd.f32 %v1486_v35, %v1417_v22  ;;  %6125 = vmatprep.mubr.msk.bf16.mxu1 %vm142_vm2, %v4068_v28  ;;  %6159 = vmatprep.mubr.msk.bf16.mxu0 %vm142_vm2, %v4593_v29  ;;  %v1982_v51 = vld [vmem:[#allocation2 + $0x8] sm:$0xff]  ;;  %v1987_v30 = vld [vmem:[#allocation2 + $0x30] sm:$0xff] }
 0x13b   :  { %1560 = vst.msk [vmem:[#allocation2 + $0xd8] sm:$0xff] %vm381_vm7, %v1524_v33  ;;  %v1985_v35 = vld [vmem:[#allocation2 + $0x20] sm:$0xff] }
 0x13c   :  { %1558 = vst.msk [vmem:[#allocation2 + $0xc8] sm:$0xff] %vm381_vm7, %v1522_v36  ;;  %v5899_v11 = vpop.f32.mrb[48].mxu1  ;;  %v5933_v42 = vpop.f32.mrb[48].mxu0 }
 0x13d   :  { %v1013_v43 = vadd.f32 %v5899_v11, %v977_v37  ;;  %v928_v44 = vpop.f32.mrb[49].mxu1  ;;  %v1430_v48 = vpop.f32.mrb[49].mxu0 }
 0x13e   :  { %v1011_v46 = vadd.f32 %v975_v41, %v928_v44  ;;  %v5900_v49 = vpop.f32.mrb[50].mxu1  ;;  %v1491_v57 = vld [vmem:[#allocation2 + $0xf0] sm:$0xff]  ;;  %v5934_v52 = vpop.f32.mrb[50].mxu0  ;;  %v1986_v41 = vld [vmem:[#allocation2 + $0x28] sm:$0xff] }
 0x13f   :  { %1049 = vst.msk [vmem:[#allocation2 + $0x110] sm:$0xff] %vm381_vm7, %v1013_v43  ;;  %v1014_v56 = vadd.f32 %v5900_v49, %v978_v50  ;;  %v1527_v58 = vadd.f32 %v5933_v42, %v1491_v57  ;;  %v931_v61 = vpop.f32.mrb[51].mxu1  ;;  %v1489_v63 = vld [vmem:[#allocation2 + $0xe0] sm:$0xff]  ;;  %v1433_v1 = vpop.f32.mrb[51].mxu0 }
 0x140   :  { %1047 = vst.msk [vmem:[#allocation2 + $0x100] sm:$0xff] %vm381_vm7, %v1011_v46  ;;  %v1012_v3 = vadd.f32 %v976_v62, %v931_v61  ;;  %v1525_v59 = vadd.f32 %v1489_v63, %v1430_v48  ;;  %v1492_v5 = vld [vmem:[#allocation2 + $0xf8] sm:$0xff]  ;;  %v1989_v63 = vld [vmem:[#allocation2 + $0x40] sm:$0xff] }
 0x141   :  { %1050 = vst.msk [vmem:[#allocation2 + $0x118] sm:$0xff] %vm381_vm7, %v1014_v56  ;;  %1563 = vst.msk [vmem:[#allocation2 + $0xf0] sm:$0xff] %vm381_vm7, %v1527_v58  ;;  %v1528_v47 = vadd.f32 %v5934_v52, %v1492_v5  ;;  %v1490_v6 = vld [vmem:[#allocation2 + $0xe8] sm:$0xff]  ;;  %6126 = vmatmul.mubr.msk.bf16.gmra.mrb[156].mxu1 %vm142_vm2, %v4077_v53  ;;  %6160 = vmatmul.mubr.msk.bf16.gmra.mrb[156].mxu0 %vm142_vm2, %v4595_v55  ;;  %v1991_v56 = vld [vmem:[#allocation2 + $0x50] sm:$0xff] }
 0x142   :  { %1048 = vst.msk [vmem:[#allocation2 + $0x108] sm:$0xff] %vm381_vm7, %v1012_v3  ;;  %1561 = vst.msk [vmem:[#allocation2 + $0xe0] sm:$0xff] %vm381_vm7, %v1525_v59  ;;  %v1526_v7 = vadd.f32 %v1490_v6, %v1433_v1  ;;  %6163 = vmatprep.mubr.msk.bf16.mxu0 %vm142_vm2, %v4597_v4  ;;  %v1992_v59 = vld [vmem:[#allocation2 + $0x58] sm:$0xff] }
 0x143   :  { %1564 = vst.msk [vmem:[#allocation2 + $0xf8] sm:$0xff] %vm381_vm7, %v1528_v47 }
 0x144   :  { %1562 = vst.msk [vmem:[#allocation2 + $0xe8] sm:$0xff] %vm381_vm7, %v1526_v7  ;;  %v5943_v2 = vpop.f32.mrb[52].mxu1  ;;  %v5937_v9 = vpop.f32.mrb[52].mxu0 }
 0x145   :  { %v2019_v10 = vadd.f32 %v5943_v2, %v1983_v8  ;;  %v1838_v12 = vpop.f32.mrb[53].mxu1  ;;  %v1446_v14 = vpop.f32.mrb[53].mxu0  ;;  %v1990_v2 = vld [vmem:[#allocation2 + $0x48] sm:$0xff] }
 0x146   :  { %v2017_v0 = vadd.f32 %v1981_v13, %v1838_v12  ;;  %v1495_v15 = vld [vmem:[#allocation2 + $0x110] sm:$0xff]  ;;  %v5944_v16 = vpop.f32.mrb[54].mxu1  ;;  %v5938_v18 = vpop.f32.mrb[54].mxu0 }
 0x147   :  { %2055 = vst.msk [vmem:[#allocation2 + $0x10] sm:$0xff] %vm381_vm7, %v2019_v10  ;;  %v1531_v20 = vadd.f32 %v5937_v9, %v1495_v15  ;;  %v2020_v24 = vadd.f32 %v5944_v16, %v1984_v17  ;;  %v1493_v54 = vld [vmem:[#allocation2 + $0x100] sm:$0xff]  ;;  %v1841_v21 = vpop.f32.mrb[55].mxu1  ;;  %v1449_v25 = vpop.f32.mrb[55].mxu0  ;;  %v1995_v17 = vld [vmem:[#allocation2 + $0x70] sm:$0xff] }
 0x148   :  { %2053 = vst.msk [vmem:[#allocation2] sm:$0xff] %vm381_vm7, %v2017_v0  ;;  %v1529_v26 = vadd.f32 %v1493_v54, %v1446_v14  ;;  %v2018_v27 = vadd.f32 %v1982_v51, %v1841_v21  ;;  %v1496_v60 = vld [vmem:[#allocation2 + $0x118] sm:$0xff] }
 0x149   :  { %1567 = vst.msk [vmem:[#allocation2 + $0x110] sm:$0xff] %vm381_vm7, %v1531_v20  ;;  %2056 = vst.msk [vmem:[#allocation2 + $0x18] sm:$0xff] %vm381_vm7, %v2020_v24  ;;  %v1532_v22 = vadd.f32 %v5938_v18, %v1496_v60  ;;  %v1494_v28 = vld [vmem:[#allocation2 + $0x108] sm:$0xff]  ;;  %6164 = vmatmul.mubr.msk.bf16.gmra.mrb[160].mxu0 %vm142_vm2, %v4599_v19  ;;  %v1993_v24 = vld [vmem:[#allocation2 + $0x60] sm:$0xff] }
 0x14a   :  { %1565 = vst.msk [vmem:[#allocation2 + $0x100] sm:$0xff] %vm381_vm7, %v1529_v26  ;;  %2054 = vst.msk [vmem:[#allocation2 + $0x8] sm:$0xff] %vm381_vm7, %v2018_v27  ;;  %v1530_v29 = vadd.f32 %v1494_v28, %v1449_v25  ;;  %v1996_v25 = vld [vmem:[#allocation2 + $0x78] sm:$0xff] }
 0x14b   :  { %1568 = vst.msk [vmem:[#allocation2 + $0x118] sm:$0xff] %vm381_vm7, %v1532_v22 }
 0x14c   :  { %1566 = vst.msk [vmem:[#allocation2 + $0x108] sm:$0xff] %vm381_vm7, %v1530_v29  ;;  %v5947_v23 = vpop.f32.mrb[56].mxu1  ;;  %v5981_v31 = vpop.f32.mrb[56].mxu0  ;;  %v1994_v29 = vld [vmem:[#allocation2 + $0x68] sm:$0xff] }
 0x14d   :  { %v2023_v32 = vadd.f32 %v5947_v23, %v1987_v30  ;;  %v1854_v33 = vpop.f32.mrb[57].mxu1  ;;  %v2486_v36 = vpop.f32.mrb[57].mxu0 }
 0x14e   :  { %v2021_v38 = vadd.f32 %v1985_v35, %v1854_v33  ;;  %v5948_v39 = vpop.f32.mrb[58].mxu1  ;;  %v2631_v11 = vld [vmem:[#allocation2 + $0x10] sm:$0xff]  ;;  %v5982_v37 = vpop.f32.mrb[58].mxu0 }
 0x14f   :  { %2059 = vst.msk [vmem:[#allocation2 + $0x30] sm:$0xff] %vm381_vm7, %v2023_v32  ;;  %v2024_v42 = vadd.f32 %v5948_v39, %v1988_v40  ;;  %v2667_v43 = vadd.f32 %v5981_v31, %v2631_v11  ;;  %v1857_v44 = vpop.f32.mrb[59].mxu1  ;;  %v2629_v48 = vld [vmem:[#allocation2] sm:$0xff]  ;;  %v2489_v45 = vpop.f32.mrb[59].mxu0  ;;  %v1999_v40 = vld [vmem:[#allocation2 + $0x90] sm:$0xff] }
 0x150   :  { %2057 = vst.msk [vmem:[#allocation2 + $0x20] sm:$0xff] %vm381_vm7, %v2021_v38  ;;  %v2022_v46 = vadd.f32 %v1986_v41, %v1857_v44  ;;  %v2665_v49 = vadd.f32 %v2629_v48, %v2486_v36  ;;  %v2632_v50 = vld [vmem:[#allocation2 + $0x18] sm:$0xff] }
 0x151   :  { %2060 = vst.msk [vmem:[#allocation2 + $0x38] sm:$0xff] %vm381_vm7, %v2024_v42  ;;  %2703 = vst.msk [vmem:[#allocation2 + $0x10] sm:$0xff] %vm381_vm7, %v2667_v43  ;;  %v2668_v57 = vadd.f32 %v5982_v37, %v2632_v50  ;;  %v2630_v52 = vld [vmem:[#allocation2 + $0x8] sm:$0xff]  ;;  %v1997_v43 = vld [vmem:[#allocation2 + $0x80] sm:$0xff] }
 0x152   :  { %2058 = vst.msk [vmem:[#allocation2 + $0x28] sm:$0xff] %vm381_vm7, %v2022_v46  ;;  %2701 = vst.msk [vmem:[#allocation2] sm:$0xff] %vm381_vm7, %v2665_v49  ;;  %v2666_v53 = vadd.f32 %v2630_v52, %v2489_v45  ;;  %v2000_v45 = vld [vmem:[#allocation2 + $0x98] sm:$0xff] }
 0x153   :  { %2704 = vst.msk [vmem:[#allocation2 + $0x18] sm:$0xff] %vm381_vm7, %v2668_v57 }
 0x154   :  { %2702 = vst.msk [vmem:[#allocation2 + $0x8] sm:$0xff] %vm381_vm7, %v2666_v53  ;;  %v5951_v55 = vpop.f32.mrb[60].mxu1  ;;  %v5985_v58 = vpop.f32.mrb[60].mxu0  ;;  %v1998_v53 = vld [vmem:[#allocation2 + $0x88] sm:$0xff] }
 0x155   :  { %v2027_v61 = vadd.f32 %v5951_v55, %v1991_v56  ;;  %v1870_v62 = vpop.f32.mrb[61].mxu1  ;;  %v2502_v1 = vpop.f32.mrb[61].mxu0 }
 0x156   :  { %v2025_v4 = vadd.f32 %v1989_v63, %v1870_v62  ;;  %v5952_v3 = vpop.f32.mrb[62].mxu1  ;;  %v2635_v5 = vld [vmem:[#allocation2 + $0x30] sm:$0xff]  ;;  %v5986_v47 = vpop.f32.mrb[62].mxu0 }
 0x157   :  { %2063 = vst.msk [vmem:[#allocation2 + $0x50] sm:$0xff] %vm381_vm7, %v2027_v61  ;;  %v2028_v6 = vadd.f32 %v5952_v3, %v1992_v59  ;;  %v2671_v7 = vadd.f32 %v5985_v58, %v2635_v5  ;;  %v1873_v34 = vpop.f32.mrb[63].mxu1  ;;  %v2633_v8 = vld [vmem:[#allocation2 + $0x20] sm:$0xff]  ;;  %v2505_v9 = vpop.f32.mrb[63].mxu0  ;;  %v2003_v59 = vld [vmem:[#allocation2 + $0xb0] sm:$0xff] }
 0x158   :  { %2061 = vst.msk [vmem:[#allocation2 + $0x40] sm:$0xff] %vm381_vm7, %v2025_v4  ;;  %v2026_v10 = vadd.f32 %v1990_v2, %v1873_v34  ;;  %v2669_v12 = vadd.f32 %v2633_v8, %v2502_v1  ;;  %v2636_v13 = vld [vmem:[#allocation2 + $0x38] sm:$0xff] }
 0x159   :  { %2064 = vst.msk [vmem:[#allocation2 + $0x58] sm:$0xff] %vm381_vm7, %v2028_v6  ;;  %2707 = vst.msk [vmem:[#allocation2 + $0x30] sm:$0xff] %vm381_vm7, %v2671_v7  ;;  %v2672_v14 = vadd.f32 %v5986_v47, %v2636_v13  ;;  %v2634_v0 = vld [vmem:[#allocation2 + $0x28] sm:$0xff]  ;;  %v2001_v7 = vld [vmem:[#allocation2 + $0xa0] sm:$0xff] }
 0x15a   :  { %2062 = vst.msk [vmem:[#allocation2 + $0x48] sm:$0xff] %vm381_vm7, %v2026_v10  ;;  %2705 = vst.msk [vmem:[#allocation2 + $0x20] sm:$0xff] %vm381_vm7, %v2669_v12  ;;  %v2670_v15 = vadd.f32 %v2634_v0, %v2505_v9  ;;  %v2004_v9 = vld [vmem:[#allocation2 + $0xb8] sm:$0xff] }
 0x15b   :  { %2708 = vst.msk [vmem:[#allocation2 + $0x38] sm:$0xff] %vm381_vm7, %v2672_v14 }
 0x15c   :  { %2706 = vst.msk [vmem:[#allocation2 + $0x28] sm:$0xff] %vm381_vm7, %v2670_v15  ;;  %v5955_v16 = vpop.f32.mrb[64].mxu1  ;;  %v5989_v18 = vpop.f32.mrb[64].mxu0  ;;  %v2002_v15 = vld [vmem:[#allocation2 + $0xa8] sm:$0xff] }
 0x15d   :  { %v2031_v19 = vadd.f32 %v5955_v16, %v1995_v17  ;;  %v1886_v20 = vpop.f32.mrb[65].mxu1  ;;  %v2518_v54 = vpop.f32.mrb[65].mxu0 }
 0x15e   :  { %v2029_v21 = vadd.f32 %v1993_v24, %v1886_v20  ;;  %v5956_v51 = vpop.f32.mrb[66].mxu1  ;;  %v2639_v26 = vld [vmem:[#allocation2 + $0x50] sm:$0xff]  ;;  %v5990_v27 = vpop.f32.mrb[66].mxu0 }
 0x15f   :  { %2067 = vst.msk [vmem:[#allocation2 + $0x70] sm:$0xff] %vm381_vm7, %v2031_v19  ;;  %v2032_v60 = vadd.f32 %v5956_v51, %v1996_v25  ;;  %v2675_v22 = vadd.f32 %v5989_v18, %v2639_v26  ;;  %v1889_v28 = vpop.f32.mrb[67].mxu1  ;;  %v2637_v23 = vld [vmem:[#allocation2 + $0x40] sm:$0xff]  ;;  %v2521_v30 = vpop.f32.mrb[67].mxu0  ;;  %v2007_v25 = vld [vmem:[#allocation2 + $0xd0] sm:$0xff] }
 0x160   :  { %2065 = vst.msk [vmem:[#allocation2 + $0x60] sm:$0xff] %vm381_vm7, %v2029_v21  ;;  %v2030_v31 = vadd.f32 %v1994_v29, %v1889_v28  ;;  %v2673_v32 = vadd.f32 %v2637_v23, %v2518_v54  ;;  %v2640_v33 = vld [vmem:[#allocation2 + $0x58] sm:$0xff] }
 0x161   :  { %2068 = vst.msk [vmem:[#allocation2 + $0x78] sm:$0xff] %vm381_vm7, %v2032_v60  ;;  %2711 = vst.msk [vmem:[#allocation2 + $0x50] sm:$0xff] %vm381_vm7, %v2675_v22  ;;  %v2676_v35 = vadd.f32 %v5990_v27, %v2640_v33  ;;  %v2638_v36 = vld [vmem:[#allocation2 + $0x48] sm:$0xff]  ;;  %v2005_v22 = vld [vmem:[#allocation2 + $0xc0] sm:$0xff] }
 0x162   :  { %2066 = vst.msk [vmem:[#allocation2 + $0x68] sm:$0xff] %vm381_vm7, %v2030_v31  ;;  %2709 = vst.msk [vmem:[#allocation2 + $0x40] sm:$0xff] %vm381_vm7, %v2673_v32  ;;  %v2674_v38 = vadd.f32 %v2638_v36, %v2521_v30  ;;  %v2008_v30 = vld [vmem:[#allocation2 + $0xd8] sm:$0xff] }
 0x163   :  { %2712 = vst.msk [vmem:[#allocation2 + $0x58] sm:$0xff] %vm381_vm7, %v2676_v35 }
 0x164   :  { %2710 = vst.msk [vmem:[#allocation2 + $0x48] sm:$0xff] %vm381_vm7, %v2674_v38  ;;  %v5959_v39 = vpop.f32.mrb[68].mxu1  ;;  %v5993_v11 = vpop.f32.mrb[68].mxu0  ;;  %v2006_v38 = vld [vmem:[#allocation2 + $0xc8] sm:$0xff] }
 0x165   :  { %v2035_v37 = vadd.f32 %v5959_v39, %v1999_v40  ;;  %v1902_v42 = vpop.f32.mrb[69].mxu1  ;;  %v2534_v44 = vpop.f32.mrb[69].mxu0 }
 0x166   :  { %v2033_v41 = vadd.f32 %v1997_v43, %v1902_v42  ;;  %v5960_v48 = vpop.f32.mrb[70].mxu1  ;;  %v2643_v46 = vld [vmem:[#allocation2 + $0x70] sm:$0xff]  ;;  %v5994_v49 = vpop.f32.mrb[70].mxu0 }
 0x167   :  { %2071 = vst.msk [vmem:[#allocation2 + $0x90] sm:$0xff] %vm381_vm7, %v2035_v37  ;;  %v2036_v50 = vadd.f32 %v5960_v48, %v2000_v45  ;;  %v2679_v57 = vadd.f32 %v5993_v11, %v2643_v46  ;;  %v1905_v52 = vpop.f32.mrb[71].mxu1  ;;  %v2641_v55 = vld [vmem:[#allocation2 + $0x60] sm:$0xff]  ;;  %v2537_v56 = vpop.f32.mrb[71].mxu0  ;;  %v2011_v45 = vld [vmem:[#allocation2 + $0xf0] sm:$0xff] }
 0x168   :  { %2069 = vst.msk [vmem:[#allocation2 + $0x80] sm:$0xff] %vm381_vm7, %v2033_v41  ;;  %v2034_v58 = vadd.f32 %v1998_v53, %v1905_v52  ;;  %v2677_v61 = vadd.f32 %v2641_v55, %v2534_v44  ;;  %v2644_v62 = vld [vmem:[#allocation2 + $0x78] sm:$0xff] }
 0x169   :  { %2072 = vst.msk [vmem:[#allocation2 + $0x98] sm:$0xff] %vm381_vm7, %v2036_v50  ;;  %2715 = vst.msk [vmem:[#allocation2 + $0x70] sm:$0xff] %vm381_vm7, %v2679_v57  ;;  %v2680_v63 = vadd.f32 %v5994_v49, %v2644_v62  ;;  %v2642_v1 = vld [vmem:[#allocation2 + $0x68] sm:$0xff]  ;;  %v2009_v57 = vld [vmem:[#allocation2 + $0xe0] sm:$0xff] }
 0x16a   :  { %2070 = vst.msk [vmem:[#allocation2 + $0x88] sm:$0xff] %vm381_vm7, %v2034_v58  ;;  %2713 = vst.msk [vmem:[#allocation2 + $0x60] sm:$0xff] %vm381_vm7, %v2677_v61  ;;  %v2678_v4 = vadd.f32 %v2642_v1, %v2537_v56  ;;  %v2012_v56 = vld [vmem:[#allocation2 + $0xf8] sm:$0xff] }
 0x16b   :  { %2716 = vst.msk [vmem:[#allocation2 + $0x78] sm:$0xff] %vm381_vm7, %v2680_v63 }
 0x16c   :  { %2714 = vst.msk [vmem:[#allocation2 + $0x68] sm:$0xff] %vm381_vm7, %v2678_v4  ;;  %v5963_v3 = vpop.f32.mrb[72].mxu1  ;;  %v5997_v5 = vpop.f32.mrb[72].mxu0  ;;  %v2010_v4 = vld [vmem:[#allocation2 + $0xe8] sm:$0xff] }
 0x16d   :  { %v2039_v47 = vadd.f32 %v5963_v3, %v2003_v59  ;;  %v1918_v6 = vpop.f32.mrb[73].mxu1  ;;  %v2550_v34 = vpop.f32.mrb[73].mxu0 }
 0x16e   :  { %v2037_v2 = vadd.f32 %v2001_v7, %v1918_v6  ;;  %v5964_v8 = vpop.f32.mrb[74].mxu1  ;;  %v2647_v10 = vld [vmem:[#allocation2 + $0x90] sm:$0xff]  ;;  %v5998_v12 = vpop.f32.mrb[74].mxu0 }
 0x16f   :  { %2075 = vst.msk [vmem:[#allocation2 + $0xb0] sm:$0xff] %vm381_vm7, %v2039_v47  ;;  %v2040_v13 = vadd.f32 %v5964_v8, %v2004_v9  ;;  %v2683_v14 = vadd.f32 %v5997_v5, %v2647_v10  ;;  %v1921_v0 = vpop.f32.mrb[75].mxu1  ;;  %v2645_v16 = vld [vmem:[#allocation2 + $0x80] sm:$0xff]  ;;  %v2553_v17 = vpop.f32.mrb[75].mxu0  ;;  %v2015_v9 = vld [vmem:[#allocation2 + $0x110] sm:$0xff] }
 0x170   :  { %2073 = vst.msk [vmem:[#allocation2 + $0xa0] sm:$0xff] %vm381_vm7, %v2037_v2  ;;  %v2038_v18 = vadd.f32 %v2002_v15, %v1921_v0  ;;  %v2681_v19 = vadd.f32 %v2645_v16, %v2550_v34  ;;  %v2648_v20 = vld [vmem:[#allocation2 + $0x98] sm:$0xff] }
 0x171   :  { %2076 = vst.msk [vmem:[#allocation2 + $0xb8] sm:$0xff] %vm381_vm7, %v2040_v13  ;;  %2719 = vst.msk [vmem:[#allocation2 + $0x90] sm:$0xff] %vm381_vm7, %v2683_v14  ;;  %v2684_v24 = vadd.f32 %v5998_v12, %v2648_v20  ;;  %v2646_v54 = vld [vmem:[#allocation2 + $0x88] sm:$0xff]  ;;  %v2013_v14 = vld [vmem:[#allocation2 + $0x100] sm:$0xff] }
 0x172   :  { %2074 = vst.msk [vmem:[#allocation2 + $0xa8] sm:$0xff] %vm381_vm7, %v2038_v18  ;;  %2717 = vst.msk [vmem:[#allocation2 + $0x80] sm:$0xff] %vm381_vm7, %v2681_v19  ;;  %v2682_v21 = vadd.f32 %v2646_v54, %v2553_v17  ;;  %v2016_v17 = vld [vmem:[#allocation2 + $0x118] sm:$0xff] }
 0x173   :  { %2720 = vst.msk [vmem:[#allocation2 + $0x98] sm:$0xff] %vm381_vm7, %v2684_v24 }
 0x174   :  { %2718 = vst.msk [vmem:[#allocation2 + $0x88] sm:$0xff] %vm381_vm7, %v2682_v21  ;;  %v5967_v51 = vpop.f32.mrb[76].mxu1  ;;  %v6001_v26 = vpop.f32.mrb[76].mxu0  ;;  %v2014_v21 = vld [vmem:[#allocation2 + $0x108] sm:$0xff] }
 0x175   :  { %v2043_v27 = vadd.f32 %v5967_v51, %v2007_v25  ;;  %v1934_v60 = vpop.f32.mrb[77].mxu1  ;;  %v2566_v28 = vpop.f32.mrb[77].mxu0 }
 0x176   :  { %v2041_v29 = vadd.f32 %v2005_v22, %v1934_v60  ;;  %v5968_v23 = vpop.f32.mrb[78].mxu1  ;;  %v2651_v31 = vld [vmem:[#allocation2 + $0xb0] sm:$0xff]  ;;  %v6002_v32 = vpop.f32.mrb[78].mxu0 }
 0x177   :  { %2079 = vst.msk [vmem:[#allocation2 + $0xd0] sm:$0xff] %vm381_vm7, %v2043_v27  ;;  %v2044_v33 = vadd.f32 %v5968_v23, %v2008_v30  ;;  %v2687_v35 = vadd.f32 %v6001_v26, %v2651_v31  ;;  %v1937_v36 = vpop.f32.mrb[79].mxu1  ;;  %v2649_v39 = vld [vmem:[#allocation2 + $0xa0] sm:$0xff]  ;;  %v2569_v40 = vpop.f32.mrb[79].mxu0  ;;  %v3156_v30 = vld [vmem:[#allocation2 + $0x10] sm:$0xff] }
 0x178   :  { %2077 = vst.msk [vmem:[#allocation2 + $0xc0] sm:$0xff] %vm381_vm7, %v2041_v29  ;;  %v2042_v11 = vadd.f32 %v2006_v38, %v1937_v36  ;;  %v2685_v37 = vadd.f32 %v2649_v39, %v2566_v28  ;;  %v2652_v42 = vld [vmem:[#allocation2 + $0xb8] sm:$0xff] }
 0x179   :  { %2080 = vst.msk [vmem:[#allocation2 + $0xd8] sm:$0xff] %vm381_vm7, %v2044_v33  ;;  %2723 = vst.msk [vmem:[#allocation2 + $0xb0] sm:$0xff] %vm381_vm7, %v2687_v35  ;;  %v2688_v43 = vadd.f32 %v6002_v32, %v2652_v42  ;;  %v2650_v44 = vld [vmem:[#allocation2 + $0xa8] sm:$0xff]  ;;  %v3154_v35 = vld [vmem:[#allocation2] sm:$0xff] }
 0x17a   :  { %2078 = vst.msk [vmem:[#allocation2 + $0xc8] sm:$0xff] %vm381_vm7, %v2042_v11  ;;  %2721 = vst.msk [vmem:[#allocation2 + $0xa0] sm:$0xff] %vm381_vm7, %v2685_v37  ;;  %v2686_v41 = vadd.f32 %v2650_v44, %v2569_v40  ;;  %v3157_v11 = vld [vmem:[#allocation2 + $0x18] sm:$0xff] }
 0x17b   :  { %2724 = vst.msk [vmem:[#allocation2 + $0xb8] sm:$0xff] %vm381_vm7, %v2688_v43 }
 0x17c   :  { %2722 = vst.msk [vmem:[#allocation2 + $0xa8] sm:$0xff] %vm381_vm7, %v2686_v41  ;;  %v5971_v48 = vpop.f32.mrb[80].mxu1  ;;  %v6005_v46 = vpop.f32.mrb[80].mxu0 }
 0x17d   :  { %v2047_v49 = vadd.f32 %v5971_v48, %v2011_v45  ;;  %v1950_v50 = vpop.f32.mrb[81].mxu1  ;;  %v2582_v52 = vpop.f32.mrb[81].mxu0  ;;  %v3155_v48 = vld [vmem:[#allocation2 + $0x8] sm:$0xff] }
 0x17e   :  { %v2045_v53 = vadd.f32 %v2009_v57, %v1950_v50  ;;  %v5972_v55 = vpop.f32.mrb[82].mxu1  ;;  %v2655_v58 = vld [vmem:[#allocation2 + $0xd0] sm:$0xff]  ;;  %v6006_v61 = vpop.f32.mrb[82].mxu0 }
 0x17f   :  { %2083 = vst.msk [vmem:[#allocation2 + $0xf0] sm:$0xff] %vm381_vm7, %v2047_v49  ;;  %v2048_v62 = vadd.f32 %v5972_v55, %v2012_v56  ;;  %v2691_v63 = vadd.f32 %v6005_v46, %v2655_v58  ;;  %v1953_v1 = vpop.f32.mrb[83].mxu1  ;;  %v2653_v3 = vld [vmem:[#allocation2 + $0xc0] sm:$0xff]  ;;  %v2585_v59 = vpop.f32.mrb[83].mxu0  ;;  %v3160_v56 = vld [vmem:[#allocation2 + $0x30] sm:$0xff] }
 0x180   :  { %2081 = vst.msk [vmem:[#allocation2 + $0xe0] sm:$0xff] %vm381_vm7, %v2045_v53  ;;  %v2046_v5 = vadd.f32 %v2010_v4, %v1953_v1  ;;  %v2689_v47 = vadd.f32 %v2653_v3, %v2582_v52  ;;  %v2656_v6 = vld [vmem:[#allocation2 + $0xd8] sm:$0xff] }
 0x181   :  { %2084 = vst.msk [vmem:[#allocation2 + $0xf8] sm:$0xff] %vm381_vm7, %v2048_v62  ;;  %2727 = vst.msk [vmem:[#allocation2 + $0xd0] sm:$0xff] %vm381_vm7, %v2691_v63  ;;  %v2692_v7 = vadd.f32 %v6006_v61, %v2656_v6  ;;  %v2654_v34 = vld [vmem:[#allocation2 + $0xc8] sm:$0xff]  ;;  %v3158_v63 = vld [vmem:[#allocation2 + $0x20] sm:$0xff] }
 0x182   :  { %2082 = vst.msk [vmem:[#allocation2 + $0xe8] sm:$0xff] %vm381_vm7, %v2046_v5  ;;  %2725 = vst.msk [vmem:[#allocation2 + $0xc0] sm:$0xff] %vm381_vm7, %v2689_v47  ;;  %v2690_v2 = vadd.f32 %v2654_v34, %v2585_v59  ;;  %v3161_v59 = vld [vmem:[#allocation2 + $0x38] sm:$0xff] }
 0x183   :  { %2728 = vst.msk [vmem:[#allocation2 + $0xd8] sm:$0xff] %vm381_vm7, %v2692_v7 }
 0x184   :  { %2726 = vst.msk [vmem:[#allocation2 + $0xc8] sm:$0xff] %vm381_vm7, %v2690_v2  ;;  %v5975_v8 = vpop.f32.mrb[84].mxu1  ;;  %v6009_v10 = vpop.f32.mrb[84].mxu0  ;;  %v3159_v2 = vld [vmem:[#allocation2 + $0x28] sm:$0xff] }
 0x185   :  { %v2051_v12 = vadd.f32 %v5975_v8, %v2015_v9  ;;  %v1966_v13 = vpop.f32.mrb[85].mxu1  ;;  %v2598_v0 = vpop.f32.mrb[85].mxu0 }
 0x186   :  { %v2049_v15 = vadd.f32 %v2013_v14, %v1966_v13  ;;  %v5976_v16 = vpop.f32.mrb[86].mxu1  ;;  %v2659_v18 = vld [vmem:[#allocation2 + $0xf0] sm:$0xff]  ;;  %v6010_v19 = vpop.f32.mrb[86].mxu0 }
 0x187   :  { %2087 = vst.msk [vmem:[#allocation2 + $0x110] sm:$0xff] %vm381_vm7, %v2051_v12  ;;  %v2052_v20 = vadd.f32 %v5976_v16, %v2016_v17  ;;  %v2695_v24 = vadd.f32 %v6009_v10, %v2659_v18  ;;  %v1969_v54 = vpop.f32.mrb[87].mxu1  ;;  %v2657_v51 = vld [vmem:[#allocation2 + $0xe0] sm:$0xff]  ;;  %v2601_v25 = vpop.f32.mrb[87].mxu0  ;;  %v3164_v17 = vld [vmem:[#allocation2 + $0x50] sm:$0xff] }
 0x188   :  { %2085 = vst.msk [vmem:[#allocation2 + $0x100] sm:$0xff] %vm381_vm7, %v2049_v15  ;;  %v2050_v26 = vadd.f32 %v2014_v21, %v1969_v54  ;;  %v2693_v27 = vadd.f32 %v2657_v51, %v2598_v0  ;;  %v2660_v60 = vld [vmem:[#allocation2 + $0xf8] sm:$0xff] }
 0x189   :  { %2088 = vst.msk [vmem:[#allocation2 + $0x118] sm:$0xff] %vm381_vm7, %v2052_v20  ;;  %2731 = vst.msk [vmem:[#allocation2 + $0xf0] sm:$0xff] %vm381_vm7, %v2695_v24  ;;  %v2696_v22 = vadd.f32 %v6010_v19, %v2660_v60  ;;  %v2658_v28 = vld [vmem:[#allocation2 + $0xe8] sm:$0xff]  ;;  %v3162_v24 = vld [vmem:[#allocation2 + $0x40] sm:$0xff] }
 0x18a   :  { %2086 = vst.msk [vmem:[#allocation2 + $0x108] sm:$0xff] %vm381_vm7, %v2050_v26  ;;  %2729 = vst.msk [vmem:[#allocation2 + $0xe0] sm:$0xff] %vm381_vm7, %v2693_v27  ;;  %v2694_v29 = vadd.f32 %v2658_v28, %v2601_v25  ;;  %v3165_v25 = vld [vmem:[#allocation2 + $0x58] sm:$0xff] }
 0x18b   :  { %2732 = vst.msk [vmem:[#allocation2 + $0xf8] sm:$0xff] %vm381_vm7, %v2696_v22 }
 0x18c   :  { %2730 = vst.msk [vmem:[#allocation2 + $0xe8] sm:$0xff] %vm381_vm7, %v2694_v29  ;;  %v6019_v23 = vpop.f32.mrb[88].mxu1  ;;  %v6013_v31 = vpop.f32.mrb[88].mxu0  ;;  %v3163_v29 = vld [vmem:[#allocation2 + $0x48] sm:$0xff] }
 0x18d   :  { %v3192_v32 = vadd.f32 %v6019_v23, %v3156_v30  ;;  %v3011_v33 = vpop.f32.mrb[89].mxu1  ;;  %v2614_v36 = vpop.f32.mrb[89].mxu0 }
 0x18e   :  { %v3190_v38 = vadd.f32 %v3154_v35, %v3011_v33  ;;  %v2663_v39 = vld [vmem:[#allocation2 + $0x110] sm:$0xff]  ;;  %v6020_v40 = vpop.f32.mrb[90].mxu1  ;;  %v6014_v37 = vpop.f32.mrb[90].mxu0 }
 0x18f   :  { %3228 = vst.msk [vmem:[#allocation2 + $0x10] sm:$0xff] %vm381_vm7, %v3192_v32  ;;  %v2699_v42 = vadd.f32 %v6013_v31, %v2663_v39  ;;  %v3193_v43 = vadd.f32 %v6020_v40, %v3157_v11  ;;  %v2661_v44 = vld [vmem:[#allocation2 + $0x100] sm:$0xff]  ;;  %v3014_v41 = vpop.f32.mrb[91].mxu1  ;;  %v2617_v45 = vpop.f32.mrb[91].mxu0  ;;  %v3168_v40 = vld [vmem:[#allocation2 + $0x70] sm:$0xff] }
 0x190   :  { %3226 = vst.msk [vmem:[#allocation2] sm:$0xff] %vm381_vm7, %v3190_v38  ;;  %v2697_v46 = vadd.f32 %v2661_v44, %v2614_v36  ;;  %v3191_v49 = vadd.f32 %v3155_v48, %v3014_v41  ;;  %v2664_v50 = vld [vmem:[#allocation2 + $0x118] sm:$0xff] }
 0x191   :  { %2735 = vst.msk [vmem:[#allocation2 + $0x110] sm:$0xff] %vm381_vm7, %v2699_v42  ;;  %3229 = vst.msk [vmem:[#allocation2 + $0x18] sm:$0xff] %vm381_vm7, %v3193_v43  ;;  %v2700_v57 = vadd.f32 %v6014_v37, %v2664_v50  ;;  %v2662_v52 = vld [vmem:[#allocation2 + $0x108] sm:$0xff]  ;;  %v3166_v43 = vld [vmem:[#allocation2 + $0x60] sm:$0xff] }
 0x192   :  { %2733 = vst.msk [vmem:[#allocation2 + $0x100] sm:$0xff] %vm381_vm7, %v2697_v46  ;;  %3227 = vst.msk [vmem:[#allocation2 + $0x8] sm:$0xff] %vm381_vm7, %v3191_v49  ;;  %v2698_v53 = vadd.f32 %v2662_v52, %v2617_v45  ;;  %v3169_v45 = vld [vmem:[#allocation2 + $0x78] sm:$0xff] }
 0x193   :  { %2736 = vst.msk [vmem:[#allocation2 + $0x118] sm:$0xff] %vm381_vm7, %v2700_v57 }
 0x194   :  { %2734 = vst.msk [vmem:[#allocation2 + $0x108] sm:$0xff] %vm381_vm7, %v2698_v53  ;;  %v6023_v55 = vpop.f32.mrb[92].mxu1  ;;  %v6057_v58 = vpop.f32.mrb[92].mxu0  ;;  %v3167_v53 = vld [vmem:[#allocation2 + $0x68] sm:$0xff] }
 0x195   :  { %v3196_v61 = vadd.f32 %v6023_v55, %v3160_v56  ;;  %v3027_v62 = vpop.f32.mrb[93].mxu1  ;;  %v3525_v1 = vpop.f32.mrb[93].mxu0 }
 0x196   :  { %v3194_v4 = vadd.f32 %v3158_v63, %v3027_v62  ;;  %v6024_v3 = vpop.f32.mrb[94].mxu1  ;;  %v3670_v5 = vld [vmem:[#allocation2 + $0x10] sm:$0xff]  ;;  %v6058_v47 = vpop.f32.mrb[94].mxu0 }
 0x197   :  { %3232 = vst.msk [vmem:[#allocation2 + $0x30] sm:$0xff] %vm381_vm7, %v3196_v61  ;;  %v3197_v6 = vadd.f32 %v6024_v3, %v3161_v59  ;;  %v3706_v7 = vadd.f32 %v6057_v58, %v3670_v5  ;;  %v3030_v34 = vpop.f32.mrb[95].mxu1  ;;  %v3668_v8 = vld [vmem:[#allocation2] sm:$0xff]  ;;  %v3528_v9 = vpop.f32.mrb[95].mxu0  ;;  %v3172_v59 = vld [vmem:[#allocation2 + $0x90] sm:$0xff] }
 0x198   :  { %3230 = vst.msk [vmem:[#allocation2 + $0x20] sm:$0xff] %vm381_vm7, %v3194_v4  ;;  %v3195_v10 = vadd.f32 %v3159_v2, %v3030_v34  ;;  %v3704_v12 = vadd.f32 %v3668_v8, %v3525_v1  ;;  %v3671_v13 = vld [vmem:[#allocation2 + $0x18] sm:$0xff] }
 0x199   :  { %3233 = vst.msk [vmem:[#allocation2 + $0x38] sm:$0xff] %vm381_vm7, %v3197_v6  ;;  %3742 = vst.msk [vmem:[#allocation2 + $0x10] sm:$0xff] %vm381_vm7, %v3706_v7  ;;  %v3707_v14 = vadd.f32 %v6058_v47, %v3671_v13  ;;  %v3669_v0 = vld [vmem:[#allocation2 + $0x8] sm:$0xff]  ;;  %v3170_v7 = vld [vmem:[#allocation2 + $0x80] sm:$0xff] }
 0x19a   :  { %3231 = vst.msk [vmem:[#allocation2 + $0x28] sm:$0xff] %vm381_vm7, %v3195_v10  ;;  %3740 = vst.msk [vmem:[#allocation2] sm:$0xff] %vm381_vm7, %v3704_v12  ;;  %v3705_v15 = vadd.f32 %v3669_v0, %v3528_v9  ;;  %v3173_v9 = vld [vmem:[#allocation2 + $0x98] sm:$0xff] }
 0x19b   :  { %3743 = vst.msk [vmem:[#allocation2 + $0x18] sm:$0xff] %vm381_vm7, %v3707_v14 }
 0x19c   :  { %3741 = vst.msk [vmem:[#allocation2 + $0x8] sm:$0xff] %vm381_vm7, %v3705_v15  ;;  %v6027_v16 = vpop.f32.mrb[96].mxu1  ;;  %v6061_v18 = vpop.f32.mrb[96].mxu0  ;;  %v3171_v15 = vld [vmem:[#allocation2 + $0x88] sm:$0xff] }
 0x19d   :  { %v3200_v19 = vadd.f32 %v6027_v16, %v3164_v17  ;;  %v3043_v20 = vpop.f32.mrb[97].mxu1  ;;  %v3541_v54 = vpop.f32.mrb[97].mxu0 }
 0x19e   :  { %v3198_v21 = vadd.f32 %v3162_v24, %v3043_v20  ;;  %v6028_v51 = vpop.f32.mrb[98].mxu1  ;;  %v3674_v26 = vld [vmem:[#allocation2 + $0x30] sm:$0xff]  ;;  %v6062_v27 = vpop.f32.mrb[98].mxu0 }
 0x19f   :  { %3236 = vst.msk [vmem:[#allocation2 + $0x50] sm:$0xff] %vm381_vm7, %v3200_v19  ;;  %v3201_v60 = vadd.f32 %v6028_v51, %v3165_v25  ;;  %v3710_v22 = vadd.f32 %v6061_v18, %v3674_v26  ;;  %v3046_v28 = vpop.f32.mrb[99].mxu1  ;;  %v3672_v23 = vld [vmem:[#allocation2 + $0x20] sm:$0xff]  ;;  %v3544_v30 = vpop.f32.mrb[99].mxu0  ;;  %v3176_v25 = vld [vmem:[#allocation2 + $0xb0] sm:$0xff] }
 0x1a0   :  { %3234 = vst.msk [vmem:[#allocation2 + $0x40] sm:$0xff] %vm381_vm7, %v3198_v21  ;;  %v3199_v31 = vadd.f32 %v3163_v29, %v3046_v28  ;;  %v3708_v32 = vadd.f32 %v3672_v23, %v3541_v54  ;;  %v3675_v33 = vld [vmem:[#allocation2 + $0x38] sm:$0xff] }
 0x1a1   :  { %3237 = vst.msk [vmem:[#allocation2 + $0x58] sm:$0xff] %vm381_vm7, %v3201_v60  ;;  %3746 = vst.msk [vmem:[#allocation2 + $0x30] sm:$0xff] %vm381_vm7, %v3710_v22  ;;  %v3711_v35 = vadd.f32 %v6062_v27, %v3675_v33  ;;  %v3673_v36 = vld [vmem:[#allocation2 + $0x28] sm:$0xff]  ;;  %v3174_v22 = vld [vmem:[#allocation2 + $0xa0] sm:$0xff] }
 0x1a2   :  { %3235 = vst.msk [vmem:[#allocation2 + $0x48] sm:$0xff] %vm381_vm7, %v3199_v31  ;;  %3744 = vst.msk [vmem:[#allocation2 + $0x20] sm:$0xff] %vm381_vm7, %v3708_v32  ;;  %v3709_v38 = vadd.f32 %v3673_v36, %v3544_v30  ;;  %v3177_v30 = vld [vmem:[#allocation2 + $0xb8] sm:$0xff] }
 0x1a3   :  { %3747 = vst.msk [vmem:[#allocation2 + $0x38] sm:$0xff] %vm381_vm7, %v3711_v35 }
 0x1a4   :  { %3745 = vst.msk [vmem:[#allocation2 + $0x28] sm:$0xff] %vm381_vm7, %v3709_v38  ;;  %v6031_v39 = vpop.f32.mrb[100].mxu1  ;;  %v6065_v11 = vpop.f32.mrb[100].mxu0  ;;  %v3175_v38 = vld [vmem:[#allocation2 + $0xa8] sm:$0xff] }
 0x1a5   :  { %v3204_v37 = vadd.f32 %v6031_v39, %v3168_v40  ;;  %v3059_v42 = vpop.f32.mrb[101].mxu1  ;;  %v3557_v44 = vpop.f32.mrb[101].mxu0 }
 0x1a6   :  { %v3202_v41 = vadd.f32 %v3166_v43, %v3059_v42  ;;  %v6032_v48 = vpop.f32.mrb[102].mxu1  ;;  %v3678_v46 = vld [vmem:[#allocation2 + $0x50] sm:$0xff]  ;;  %v6066_v49 = vpop.f32.mrb[102].mxu0 }
 0x1a7   :  { %3240 = vst.msk [vmem:[#allocation2 + $0x70] sm:$0xff] %vm381_vm7, %v3204_v37  ;;  %v3205_v50 = vadd.f32 %v6032_v48, %v3169_v45  ;;  %v3714_v57 = vadd.f32 %v6065_v11, %v3678_v46  ;;  %v3062_v52 = vpop.f32.mrb[103].mxu1  ;;  %v3676_v55 = vld [vmem:[#allocation2 + $0x40] sm:$0xff]  ;;  %v3560_v56 = vpop.f32.mrb[103].mxu0  ;;  %v3180_v45 = vld [vmem:[#allocation2 + $0xd0] sm:$0xff] }
 0x1a8   :  { %3238 = vst.msk [vmem:[#allocation2 + $0x60] sm:$0xff] %vm381_vm7, %v3202_v41  ;;  %v3203_v58 = vadd.f32 %v3167_v53, %v3062_v52  ;;  %v3712_v61 = vadd.f32 %v3676_v55, %v3557_v44  ;;  %v3679_v62 = vld [vmem:[#allocation2 + $0x58] sm:$0xff] }
 0x1a9   :  { %3241 = vst.msk [vmem:[#allocation2 + $0x78] sm:$0xff] %vm381_vm7, %v3205_v50  ;;  %3750 = vst.msk [vmem:[#allocation2 + $0x50] sm:$0xff] %vm381_vm7, %v3714_v57  ;;  %v3715_v63 = vadd.f32 %v6066_v49, %v3679_v62  ;;  %v3677_v1 = vld [vmem:[#allocation2 + $0x48] sm:$0xff]  ;;  %v3178_v57 = vld [vmem:[#allocation2 + $0xc0] sm:$0xff] }
 0x1aa   :  { %3239 = vst.msk [vmem:[#allocation2 + $0x68] sm:$0xff] %vm381_vm7, %v3203_v58  ;;  %3748 = vst.msk [vmem:[#allocation2 + $0x40] sm:$0xff] %vm381_vm7, %v3712_v61  ;;  %v3713_v4 = vadd.f32 %v3677_v1, %v3560_v56  ;;  %v3181_v56 = vld [vmem:[#allocation2 + $0xd8] sm:$0xff] }
 0x1ab   :  { %3751 = vst.msk [vmem:[#allocation2 + $0x58] sm:$0xff] %vm381_vm7, %v3715_v63 }
 0x1ac   :  { %3749 = vst.msk [vmem:[#allocation2 + $0x48] sm:$0xff] %vm381_vm7, %v3713_v4  ;;  %v6035_v3 = vpop.f32.mrb[104].mxu1  ;;  %v6069_v5 = vpop.f32.mrb[104].mxu0  ;;  %v3179_v4 = vld [vmem:[#allocation2 + $0xc8] sm:$0xff] }
 0x1ad   :  { %v3208_v47 = vadd.f32 %v6035_v3, %v3172_v59  ;;  %v3075_v6 = vpop.f32.mrb[105].mxu1  ;;  %v3573_v34 = vpop.f32.mrb[105].mxu0 }
 0x1ae   :  { %v3206_v2 = vadd.f32 %v3170_v7, %v3075_v6  ;;  %v6036_v8 = vpop.f32.mrb[106].mxu1  ;;  %v3682_v10 = vld [vmem:[#allocation2 + $0x70] sm:$0xff]  ;;  %v6070_v12 = vpop.f32.mrb[106].mxu0 }
 0x1af   :  { %3244 = vst.msk [vmem:[#allocation2 + $0x90] sm:$0xff] %vm381_vm7, %v3208_v47  ;;  %v3209_v13 = vadd.f32 %v6036_v8, %v3173_v9  ;;  %v3718_v14 = vadd.f32 %v6069_v5, %v3682_v10  ;;  %v3078_v0 = vpop.f32.mrb[107].mxu1  ;;  %v3680_v16 = vld [vmem:[#allocation2 + $0x60] sm:$0xff]  ;;  %v3576_v17 = vpop.f32.mrb[107].mxu0  ;;  %v3184_v9 = vld [vmem:[#allocation2 + $0xf0] sm:$0xff] }
 0x1b0   :  { %3242 = vst.msk [vmem:[#allocation2 + $0x80] sm:$0xff] %vm381_vm7, %v3206_v2  ;;  %v3207_v18 = vadd.f32 %v3171_v15, %v3078_v0  ;;  %v3716_v19 = vadd.f32 %v3680_v16, %v3573_v34  ;;  %v3683_v20 = vld [vmem:[#allocation2 + $0x78] sm:$0xff] }
 0x1b1   :  { %3245 = vst.msk [vmem:[#allocation2 + $0x98] sm:$0xff] %vm381_vm7, %v3209_v13  ;;  %3754 = vst.msk [vmem:[#allocation2 + $0x70] sm:$0xff] %vm381_vm7, %v3718_v14  ;;  %v3719_v24 = vadd.f32 %v6070_v12, %v3683_v20  ;;  %v3681_v54 = vld [vmem:[#allocation2 + $0x68] sm:$0xff]  ;;  %v3182_v14 = vld [vmem:[#allocation2 + $0xe0] sm:$0xff] }
 0x1b2   :  { %3243 = vst.msk [vmem:[#allocation2 + $0x88] sm:$0xff] %vm381_vm7, %v3207_v18  ;;  %3752 = vst.msk [vmem:[#allocation2 + $0x60] sm:$0xff] %vm381_vm7, %v3716_v19  ;;  %v3717_v21 = vadd.f32 %v3681_v54, %v3576_v17  ;;  %v3185_v17 = vld [vmem:[#allocation2 + $0xf8] sm:$0xff] }
 0x1b3   :  { %3755 = vst.msk [vmem:[#allocation2 + $0x78] sm:$0xff] %vm381_vm7, %v3719_v24 }
 0x1b4   :  { %3753 = vst.msk [vmem:[#allocation2 + $0x68] sm:$0xff] %vm381_vm7, %v3717_v21  ;;  %v6039_v51 = vpop.f32.mrb[108].mxu1  ;;  %v6073_v26 = vpop.f32.mrb[108].mxu0  ;;  %v3183_v21 = vld [vmem:[#allocation2 + $0xe8] sm:$0xff] }
 0x1b5   :  { %v3212_v27 = vadd.f32 %v6039_v51, %v3176_v25  ;;  %v3091_v60 = vpop.f32.mrb[109].mxu1  ;;  %v3589_v28 = vpop.f32.mrb[109].mxu0 }
 0x1b6   :  { %v3210_v29 = vadd.f32 %v3174_v22, %v3091_v60  ;;  %v6040_v23 = vpop.f32.mrb[110].mxu1  ;;  %v3686_v31 = vld [vmem:[#allocation2 + $0x90] sm:$0xff]  ;;  %v6074_v32 = vpop.f32.mrb[110].mxu0 }
 0x1b7   :  { %3248 = vst.msk [vmem:[#allocation2 + $0xb0] sm:$0xff] %vm381_vm7, %v3212_v27  ;;  %v3213_v33 = vadd.f32 %v6040_v23, %v3177_v30  ;;  %v3722_v35 = vadd.f32 %v6073_v26, %v3686_v31  ;;  %v3094_v36 = vpop.f32.mrb[111].mxu1  ;;  %v3684_v39 = vld [vmem:[#allocation2 + $0x80] sm:$0xff]  ;;  %v3592_v40 = vpop.f32.mrb[111].mxu0  ;;  %v3188_v30 = vld [vmem:[#allocation2 + $0x110] sm:$0xff] }
 0x1b8   :  { %3246 = vst.msk [vmem:[#allocation2 + $0xa0] sm:$0xff] %vm381_vm7, %v3210_v29  ;;  %v3211_v11 = vadd.f32 %v3175_v38, %v3094_v36  ;;  %v3720_v37 = vadd.f32 %v3684_v39, %v3589_v28  ;;  %v3687_v42 = vld [vmem:[#allocation2 + $0x98] sm:$0xff] }
 0x1b9   :  { %3249 = vst.msk [vmem:[#allocation2 + $0xb8] sm:$0xff] %vm381_vm7, %v3213_v33  ;;  %3758 = vst.msk [vmem:[#allocation2 + $0x90] sm:$0xff] %vm381_vm7, %v3722_v35  ;;  %v3723_v43 = vadd.f32 %v6074_v32, %v3687_v42  ;;  %v3685_v44 = vld [vmem:[#allocation2 + $0x88] sm:$0xff]  ;;  %v3186_v35 = vld [vmem:[#allocation2 + $0x100] sm:$0xff] }
 0x1ba   :  { %3247 = vst.msk [vmem:[#allocation2 + $0xa8] sm:$0xff] %vm381_vm7, %v3211_v11  ;;  %3756 = vst.msk [vmem:[#allocation2 + $0x80] sm:$0xff] %vm381_vm7, %v3720_v37  ;;  %v3721_v41 = vadd.f32 %v3685_v44, %v3592_v40  ;;  %v3189_v40 = vld [vmem:[#allocation2 + $0x118] sm:$0xff] }
 0x1bb   :  { %3759 = vst.msk [vmem:[#allocation2 + $0x98] sm:$0xff] %vm381_vm7, %v3723_v43 }
 0x1bc   :  { %3757 = vst.msk [vmem:[#allocation2 + $0x88] sm:$0xff] %vm381_vm7, %v3721_v41  ;;  %v6043_v48 = vpop.f32.mrb[112].mxu1  ;;  %v6077_v46 = vpop.f32.mrb[112].mxu0  ;;  %v3187_v41 = vld [vmem:[#allocation2 + $0x108] sm:$0xff] }
 0x1bd   :  { %v3216_v49 = vadd.f32 %v6043_v48, %v3180_v45  ;;  %v3107_v50 = vpop.f32.mrb[113].mxu1  ;;  %v3605_v52 = vpop.f32.mrb[113].mxu0 }
 0x1be   :  { %v3214_v53 = vadd.f32 %v3178_v57, %v3107_v50  ;;  %v6044_v55 = vpop.f32.mrb[114].mxu1  ;;  %v3690_v58 = vld [vmem:[#allocation2 + $0xb0] sm:$0xff]  ;;  %v6078_v61 = vpop.f32.mrb[114].mxu0 }
 0x1bf   :  { %3252 = vst.msk [vmem:[#allocation2 + $0xd0] sm:$0xff] %vm381_vm7, %v3216_v49  ;;  %v3217_v62 = vadd.f32 %v6044_v55, %v3181_v56  ;;  %v3726_v63 = vadd.f32 %v6077_v46, %v3690_v58  ;;  %v3110_v1 = vpop.f32.mrb[115].mxu1  ;;  %v3688_v3 = vld [vmem:[#allocation2 + $0xa0] sm:$0xff]  ;;  %v3608_v59 = vpop.f32.mrb[115].mxu0  ;;  %v4325_v56 = vld [vmem:[#allocation2 + $0x10] sm:$0xff] }
 0x1c0   :  { %3250 = vst.msk [vmem:[#allocation2 + $0xc0] sm:$0xff] %vm381_vm7, %v3214_v53  ;;  %v3215_v5 = vadd.f32 %v3179_v4, %v3110_v1  ;;  %v3724_v47 = vadd.f32 %v3688_v3, %v3605_v52  ;;  %v3691_v6 = vld [vmem:[#allocation2 + $0xb8] sm:$0xff] }
 0x1c1   :  { %3253 = vst.msk [vmem:[#allocation2 + $0xd8] sm:$0xff] %vm381_vm7, %v3217_v62  ;;  %3762 = vst.msk [vmem:[#allocation2 + $0xb0] sm:$0xff] %vm381_vm7, %v3726_v63  ;;  %v3727_v7 = vadd.f32 %v6078_v61, %v3691_v6  ;;  %v3689_v34 = vld [vmem:[#allocation2 + $0xa8] sm:$0xff]  ;;  %v4323_v63 = vld [vmem:[#allocation2] sm:$0xff] }
 0x1c2   :  { %3251 = vst.msk [vmem:[#allocation2 + $0xc8] sm:$0xff] %vm381_vm7, %v3215_v5  ;;  %3760 = vst.msk [vmem:[#allocation2 + $0xa0] sm:$0xff] %vm381_vm7, %v3724_v47  ;;  %v3725_v2 = vadd.f32 %v3689_v34, %v3608_v59  ;;  %v4326_v5 = vld [vmem:[#allocation2 + $0x18] sm:$0xff] }
 0x1c3   :  { %3763 = vst.msk [vmem:[#allocation2 + $0xb8] sm:$0xff] %vm381_vm7, %v3727_v7 }
 0x1c4   :  { %3761 = vst.msk [vmem:[#allocation2 + $0xa8] sm:$0xff] %vm381_vm7, %v3725_v2  ;;  %v6047_v8 = vpop.f32.mrb[116].mxu1  ;;  %v6081_v10 = vpop.f32.mrb[116].mxu0 }
 0x1c5   :  { %v3220_v12 = vadd.f32 %v6047_v8, %v3184_v9  ;;  %v3123_v13 = vpop.f32.mrb[117].mxu1  ;;  %v3621_v0 = vpop.f32.mrb[117].mxu0  ;;  %v4324_v8 = vld [vmem:[#allocation2 + $0x8] sm:$0xff] }
 0x1c6   :  { %v3218_v15 = vadd.f32 %v3182_v14, %v3123_v13  ;;  %v6048_v16 = vpop.f32.mrb[118].mxu1  ;;  %v3694_v18 = vld [vmem:[#allocation2 + $0xd0] sm:$0xff]  ;;  %v6082_v19 = vpop.f32.mrb[118].mxu0 }
 0x1c7   :  { %3256 = vst.msk [vmem:[#allocation2 + $0xf0] sm:$0xff] %vm381_vm7, %v3220_v12  ;;  %v3221_v20 = vadd.f32 %v6048_v16, %v3185_v17  ;;  %v3730_v24 = vadd.f32 %v6081_v10, %v3694_v18  ;;  %v3126_v54 = vpop.f32.mrb[119].mxu1  ;;  %v3692_v51 = vld [vmem:[#allocation2 + $0xc0] sm:$0xff]  ;;  %v3624_v25 = vpop.f32.mrb[119].mxu0  ;;  %v4329_v17 = vld [vmem:[#allocation2 + $0x30] sm:$0xff] }
 0x1c8   :  { %3254 = vst.msk [vmem:[#allocation2 + $0xe0] sm:$0xff] %vm381_vm7, %v3218_v15  ;;  %v3219_v26 = vadd.f32 %v3183_v21, %v3126_v54  ;;  %v3728_v27 = vadd.f32 %v3692_v51, %v3621_v0  ;;  %v3695_v60 = vld [vmem:[#allocation2 + $0xd8] sm:$0xff] }
 0x1c9   :  { %3257 = vst.msk [vmem:[#allocation2 + $0xf8] sm:$0xff] %vm381_vm7, %v3221_v20  ;;  %3766 = vst.msk [vmem:[#allocation2 + $0xd0] sm:$0xff] %vm381_vm7, %v3730_v24  ;;  %v3731_v22 = vadd.f32 %v6082_v19, %v3695_v60  ;;  %v3693_v28 = vld [vmem:[#allocation2 + $0xc8] sm:$0xff]  ;;  %v4327_v24 = vld [vmem:[#allocation2 + $0x20] sm:$0xff] }
 0x1ca   :  { %3255 = vst.msk [vmem:[#allocation2 + $0xe8] sm:$0xff] %vm381_vm7, %v3219_v26  ;;  %3764 = vst.msk [vmem:[#allocation2 + $0xc0] sm:$0xff] %vm381_vm7, %v3728_v27  ;;  %v3729_v29 = vadd.f32 %v3693_v28, %v3624_v25  ;;  %v4330_v25 = vld [vmem:[#allocation2 + $0x38] sm:$0xff] }
 0x1cb   :  { %3767 = vst.msk [vmem:[#allocation2 + $0xd8] sm:$0xff] %vm381_vm7, %v3731_v22 }
 0x1cc   :  { %3765 = vst.msk [vmem:[#allocation2 + $0xc8] sm:$0xff] %vm381_vm7, %v3729_v29  ;;  %v6051_v23 = vpop.f32.mrb[120].mxu1  ;;  %v6085_v31 = vpop.f32.mrb[120].mxu0  ;;  %v4328_v29 = vld [vmem:[#allocation2 + $0x28] sm:$0xff] }
 0x1cd   :  { %v3224_v32 = vadd.f32 %v6051_v23, %v3188_v30  ;;  %v3139_v33 = vpop.f32.mrb[121].mxu1  ;;  %v3637_v36 = vpop.f32.mrb[121].mxu0 }
 0x1ce   :  { %v3222_v38 = vadd.f32 %v3186_v35, %v3139_v33  ;;  %v6052_v39 = vpop.f32.mrb[122].mxu1  ;;  %v3698_v11 = vld [vmem:[#allocation2 + $0xf0] sm:$0xff]  ;;  %v6086_v37 = vpop.f32.mrb[122].mxu0 }
 0x1cf   :  { %3260 = vst.msk [vmem:[#allocation2 + $0x110] sm:$0xff] %vm381_vm7, %v3224_v32  ;;  %v3225_v42 = vadd.f32 %v6052_v39, %v3189_v40  ;;  %v3734_v43 = vadd.f32 %v6085_v31, %v3698_v11  ;;  %v3142_v44 = vpop.f32.mrb[123].mxu1  ;;  %v3696_v48 = vld [vmem:[#allocation2 + $0xe0] sm:$0xff]  ;;  %v3640_v45 = vpop.f32.mrb[123].mxu0  ;;  %v4333_v40 = vld [vmem:[#allocation2 + $0x50] sm:$0xff] }
 0x1d0   :  { %3258 = vst.msk [vmem:[#allocation2 + $0x100] sm:$0xff] %vm381_vm7, %v3222_v38  ;;  %v3223_v46 = vadd.f32 %v3187_v41, %v3142_v44  ;;  %v3732_v49 = vadd.f32 %v3696_v48, %v3637_v36  ;;  %v3699_v50 = vld [vmem:[#allocation2 + $0xf8] sm:$0xff]  ;;  %v7659_v41 = vld [vmem:[%s7903_s2] ss:$0 sm:$0xff] }
 0x1d1   :  { %3261 = vst.msk [vmem:[#allocation2 + $0x118] sm:$0xff] %vm381_vm7, %v3225_v42  ;;  %3770 = vst.msk [vmem:[#allocation2 + $0xf0] sm:$0xff] %vm381_vm7, %v3734_v43  ;;  %v3735_v57 = vadd.f32 %v6086_v37, %v3699_v50  ;;  %v3697_v52 = vld [vmem:[#allocation2 + $0xe8] sm:$0xff]  ;;  %v4331_v43 = vld [vmem:[#allocation2 + $0x40] sm:$0xff] }
 0x1d2   :  { %3259 = vst.msk [vmem:[#allocation2 + $0x108] sm:$0xff] %vm381_vm7, %v3223_v46  ;;  %3768 = vst.msk [vmem:[#allocation2 + $0xe0] sm:$0xff] %vm381_vm7, %v3732_v49  ;;  %v3733_v53 = vadd.f32 %v3697_v52, %v3640_v45  ;;  %v4334_v46 = vld [vmem:[#allocation2 + $0x58] sm:$0xff] }
 0x1d3   :  { %3771 = vst.msk [vmem:[#allocation2 + $0xf8] sm:$0xff] %vm381_vm7, %v3735_v57 }
 0x1d4   :  { %3769 = vst.msk [vmem:[#allocation2 + $0xe8] sm:$0xff] %vm381_vm7, %v3733_v53  ;;  %v6095_v55 = vpop.f32.mrb[124].mxu1  ;;  %v6089_v58 = vpop.f32.mrb[124].mxu0 }
 0x1d5   :  { %v4361_v61 = vadd.f32 %v6095_v55, %v4325_v56  ;;  %v4180_v62 = vpop.f32.mrb[125].mxu1  ;;  %v3653_v1 = vpop.f32.mrb[125].mxu0  ;;  %v4332_v55 = vld [vmem:[#allocation2 + $0x48] sm:$0xff] }
 0x1d6   :  { %v4359_v4 = vadd.f32 %v4323_v63, %v4180_v62  ;;  %v3702_v3 = vld [vmem:[#allocation2 + $0x110] sm:$0xff]  ;;  %v6096_v59 = vpop.f32.mrb[126].mxu1  ;;  %v6090_v47 = vpop.f32.mrb[126].mxu0 }
 0x1d7   :  { %4397 = vst.msk [vmem:[#allocation2 + $0x10] sm:$0xff] %vm381_vm7, %v4361_v61  ;;  %v3738_v6 = vadd.f32 %v6089_v58, %v3702_v3  ;;  %v4362_v7 = vadd.f32 %v6096_v59, %v4326_v5  ;;  %v3700_v34 = vld [vmem:[#allocation2 + $0x100] sm:$0xff]  ;;  %v4183_v2 = vpop.f32.mrb[127].mxu1  ;;  %v3656_v9 = vpop.f32.mrb[127].mxu0 }
 0x1d8   :  { %4395 = vst.msk [vmem:[#allocation2] sm:$0xff] %vm381_vm7, %v4359_v4  ;;  %v3736_v10 = vadd.f32 %v3700_v34, %v3653_v1  ;;  %v4360_v12 = vadd.f32 %v4324_v8, %v4183_v2  ;;  %v3703_v13 = vld [vmem:[#allocation2 + $0x118] sm:$0xff] }
 0x1d9   :  { %3774 = vst.msk [vmem:[#allocation2 + $0x110] sm:$0xff] %vm381_vm7, %v3738_v6  ;;  %4398 = vst.msk [vmem:[#allocation2 + $0x18] sm:$0xff] %vm381_vm7, %v4362_v7  ;;  %v3739_v14 = vadd.f32 %v6090_v47, %v3703_v13  ;;  %v3701_v0 = vld [vmem:[#allocation2 + $0x108] sm:$0xff]  ;;  %v4337_v13 = vld [vmem:[#allocation2 + $0x70] sm:$0xff] }
 0x1da   :  { %3772 = vst.msk [vmem:[#allocation2 + $0x100] sm:$0xff] %vm381_vm7, %v3736_v10  ;;  %4396 = vst.msk [vmem:[#allocation2 + $0x8] sm:$0xff] %vm381_vm7, %v4360_v12  ;;  %v3737_v15 = vadd.f32 %v3701_v0, %v3656_v9 }
 0x1db   :  { %3775 = vst.msk [vmem:[#allocation2 + $0x118] sm:$0xff] %vm381_vm7, %v3739_v14 }
 0x1dc   :  { %3773 = vst.msk [vmem:[#allocation2 + $0x108] sm:$0xff] %vm381_vm7, %v3737_v15  ;;  %v6099_v16 = vpop.f32.mrb[128].mxu1  ;;  %v6133_v18 = vpop.f32.mrb[128].mxu0 }
 0x1dd   :  { %v4365_v19 = vadd.f32 %v6099_v16, %v4329_v17  ;;  %v4196_v20 = vpop.f32.mrb[129].mxu1  ;;  %v4691_v54 = vpop.f32.mrb[129].mxu0 }
 0x1de   :  { %v4363_v21 = vadd.f32 %v4327_v24, %v4196_v20  ;;  %v6100_v51 = vpop.f32.mrb[130].mxu1  ;;  %v4836_v26 = vld [vmem:[#allocation2 + $0x10] sm:$0xff]  ;;  %v6134_v27 = vpop.f32.mrb[130].mxu0 }
 0x1df   :  { %4401 = vst.msk [vmem:[#allocation2 + $0x30] sm:$0xff] %vm381_vm7, %v4365_v19  ;;  %v4366_v60 = vadd.f32 %v6100_v51, %v4330_v25  ;;  %v4872_v22 = vadd.f32 %v6133_v18, %v4836_v26  ;;  %v4199_v28 = vpop.f32.mrb[131].mxu1  ;;  %v4834_v23 = vld [vmem:[#allocation2] sm:$0xff]  ;;  %v4694_v30 = vpop.f32.mrb[131].mxu0  ;;  %v4338_v51 = vld [vmem:[#allocation2 + $0x78] sm:$0xff] }
 0x1e0   :  { %4399 = vst.msk [vmem:[#allocation2 + $0x20] sm:$0xff] %vm381_vm7, %v4363_v21  ;;  %v4364_v31 = vadd.f32 %v4328_v29, %v4199_v28  ;;  %v4870_v32 = vadd.f32 %v4834_v23, %v4691_v54  ;;  %v4837_v33 = vld [vmem:[#allocation2 + $0x18] sm:$0xff]  ;;  %v4335_v18 = vld [vmem:[#allocation2 + $0x60] sm:$0xff]  ;;  %v4336_v29 = vld [vmem:[#allocation2 + $0x68] sm:$0xff] }
 0x1e1   :  { %4402 = vst.msk [vmem:[#allocation2 + $0x38] sm:$0xff] %vm381_vm7, %v4366_v60  ;;  %4908 = vst.msk [vmem:[#allocation2 + $0x10] sm:$0xff] %vm381_vm7, %v4872_v22  ;;  %v4873_v35 = vadd.f32 %v6134_v27, %v4837_v33  ;;  %v4835_v36 = vld [vmem:[#allocation2 + $0x8] sm:$0xff] }
 0x1e2   :  { %4400 = vst.msk [vmem:[#allocation2 + $0x28] sm:$0xff] %vm381_vm7, %v4364_v31  ;;  %4906 = vst.msk [vmem:[#allocation2] sm:$0xff] %vm381_vm7, %v4870_v32  ;;  %v4871_v38 = vadd.f32 %v4835_v36, %v4694_v30 }
 0x1e3   :  { %4909 = vst.msk [vmem:[#allocation2 + $0x18] sm:$0xff] %vm381_vm7, %v4873_v35 }
 0x1e4   :  { %4907 = vst.msk [vmem:[#allocation2 + $0x8] sm:$0xff] %vm381_vm7, %v4871_v38  ;;  %v6103_v39 = vpop.f32.mrb[132].mxu1  ;;  %v6137_v11 = vpop.f32.mrb[132].mxu0 }
 0x1e5   :  { %v4369_v37 = vadd.f32 %v6103_v39, %v4333_v40  ;;  %v4212_v42 = vpop.f32.mrb[133].mxu1  ;;  %v4707_v44 = vpop.f32.mrb[133].mxu0 }
 0x1e6   :  { %v4367_v48 = vadd.f32 %v4331_v43, %v4212_v42  ;;  %v6104_v45 = vpop.f32.mrb[134].mxu1  ;;  %v4840_v49 = vld [vmem:[#allocation2 + $0x30] sm:$0xff]  ;;  %v6138_v50 = vpop.f32.mrb[134].mxu0 }
 0x1e7   :  { %4405 = vst.msk [vmem:[#allocation2 + $0x50] sm:$0xff] %vm381_vm7, %v4369_v37  ;;  %v4370_v57 = vadd.f32 %v6104_v45, %v4334_v46  ;;  %v4876_v52 = vadd.f32 %v6137_v11, %v4840_v49  ;;  %v4215_v53 = vpop.f32.mrb[135].mxu1  ;;  %v4838_v56 = vld [vmem:[#allocation2 + $0x20] sm:$0xff]  ;;  %v4710_v58 = vpop.f32.mrb[135].mxu0 }
 0x1e8   :  { %v4944_v61 = vld [vmem:[#allocation2 + $0x10] sm:$0xff]  ;;  %4403 = vst.msk [vmem:[#allocation2 + $0x40] sm:$0xff] %vm381_vm7, %v4367_v48  ;;  %v4368_v62 = vadd.f32 %v4332_v55, %v4215_v53  ;;  %v4874_v63 = vadd.f32 %v4838_v56, %v4707_v44  ;;  %v4841_v1 = vld [vmem:[#allocation2 + $0x38] sm:$0xff] }
 0x1e9   :  { %v4987_v4 = vadd.f32 %v7659_v41, %v4944_v61  ;;  %v4942_v3 = vld [vmem:[#allocation2] sm:$0xff]  ;;  %4406 = vst.msk [vmem:[#allocation2 + $0x58] sm:$0xff] %vm381_vm7, %v4370_v57  ;;  %4912 = vst.msk [vmem:[#allocation2 + $0x30] sm:$0xff] %vm381_vm7, %v4876_v52  ;;  %v4877_v59 = vadd.f32 %v6138_v50, %v4841_v1  ;;  %v4839_v5 = vld [vmem:[#allocation2 + $0x28] sm:$0xff] }
 0x1ea   :  { %v4985_v47 = vadd.f32 %v7659_v41, %v4942_v3  ;;  %v4945_v6 = vld [vmem:[#allocation2 + $0x18] sm:$0xff]  ;;  %4404 = vst.msk [vmem:[#allocation2 + $0x48] sm:$0xff] %vm381_vm7, %v4368_v62  ;;  %4910 = vst.msk [vmem:[#allocation2 + $0x20] sm:$0xff] %vm381_vm7, %v4874_v63  ;;  %v4875_v7 = vadd.f32 %v4839_v5, %v4710_v58  ;;  %v4341_v57 = vld [vmem:[#allocation2 + $0x90] sm:$0xff] }
 0x1eb   :  { %v5023_v34 = vmax.f32 %v4987_v4, 0.0  ;;  %v4988_v2 = vadd.f32 %v7659_v41, %v4945_v6  ;;  %v4943_v8 = vld [vmem:[#allocation2 + $0x8] sm:$0xff]  ;;  %4913 = vst.msk [vmem:[#allocation2 + $0x38] sm:$0xff] %vm381_vm7, %v4877_v59  ;;  %v4339_v61 = vld [vmem:[#allocation2 + $0x80] sm:$0xff]  ;;  %v4342_v59 = vld [vmem:[#allocation2 + $0x98] sm:$0xff] }
 0x1ec   :  { %v5021_v9 = vmax.f32 %v4985_v47, 0.0  ;;  %v4986_v10 = vadd.f32 %v7659_v41, %v4943_v8  ;;  %4911 = vst.msk [vmem:[#allocation2 + $0x28] sm:$0xff] %vm381_vm7, %v4875_v7  ;;  %v6107_v12 = vpop.f32.mrb[136].mxu1  ;;  %v6141_v14 = vpop.f32.mrb[136].mxu0  ;;  %v4340_v8 = vld [vmem:[#allocation2 + $0x88] sm:$0xff] }
 0x1ed   :  { %v5620_v0 = vpack.c.bf16 %v5023_v34, %v5023_v34  ;;  %v5024_v15 = vmax.f32 %v4988_v2, 0.0  ;;  %v4373_v16 = vadd.f32 %v6107_v12, %v4337_v13  ;;  %v4228_v17 = vpop.f32.mrb[137].mxu1  ;;  %v4723_v19 = vpop.f32.mrb[137].mxu0 }
 0x1ee   :  { %v5618_v20 = vpack.c.bf16 %v5021_v9, %v5021_v9  ;;  %v5022_v24 = vmax.f32 %v4986_v10, 0.0  ;;  %v4371_v54 = vadd.f32 %v4335_v18, %v4228_v17  ;;  %v6108_v21 = vpop.f32.mrb[138].mxu1  ;;  %v4844_v25 = vld [vmem:[#allocation2 + $0x50] sm:$0xff]  ;;  %v6142_v26 = vpop.f32.mrb[138].mxu0 }
 0x1ef   :  { %5204 = vst.msk [vmem:[%s7904_s3 + $0x8] sm:$0xf] %vm5201_vm10, %v5620_v0  ;;  %v5621_v27 = vpack.c.bf16 %v5024_v15, %v5024_v15  ;;  %v4374_v60 = vadd.f32 %v6108_v21, %v4338_v51  ;;  %v4880_v22 = vadd.f32 %v6141_v14, %v4844_v25  ;;  %v4231_v28 = vpop.f32.mrb[139].mxu1  ;;  %v4842_v23 = vld [vmem:[#allocation2 + $0x40] sm:$0xff]  ;;  %v4726_v30 = vpop.f32.mrb[139].mxu0 }
 0x1f0   :  { %4409 = vst.msk [vmem:[#allocation2 + $0x70] sm:$0xff] %vm381_vm7, %v4373_v16  ;;  %v5619_v31 = vpack.c.bf16 %v5022_v24, %v5022_v24  ;;  %v4948_v32 = vld [vmem:[#allocation2 + $0x30] sm:$0xff]  ;;  %4407 = vst.msk [vmem:[#allocation2 + $0x60] sm:$0xff] %vm381_vm7, %v4371_v54  ;;  %v4372_v33 = vadd.f32 %v4336_v29, %v4231_v28  ;;  %v4878_v35 = vadd.f32 %v4842_v23, %v4723_v19  ;;  %v4845_v36 = vld [vmem:[#allocation2 + $0x58] sm:$0xff] }
 0x1f1   :  { %5202 = vst.msk [vmem:[%s7904_s3] sm:$0xf] %vm5201_vm10, %v5618_v20  ;;  %5205 = vst.msk [vmem:[%s7904_s3 + $0xc] sm:$0xf] %vm5201_vm10, %v5621_v27  ;;  %v4991_v38 = vadd.f32 %v7659_v41, %v4948_v32  ;;  %v4946_v39 = vld [vmem:[#allocation2 + $0x20] sm:$0xff]  ;;  %v4881_v40 = vadd.f32 %v6142_v26, %v4845_v36  ;;  %v4843_v11 = vld [vmem:[#allocation2 + $0x48] sm:$0xff] }
 0x1f2   :  { %4410 = vst.msk [vmem:[#allocation2 + $0x78] sm:$0xff] %vm381_vm7, %v4374_v60  ;;  %4916 = vst.msk [vmem:[#allocation2 + $0x50] sm:$0xff] %vm381_vm7, %v4880_v22  ;;  %v4989_v37 = vadd.f32 %v7659_v41, %v4946_v39  ;;  %v4949_v42 = vld [vmem:[#allocation2 + $0x38] sm:$0xff]  ;;  %v4879_v43 = vadd.f32 %v4843_v11, %v4726_v30  ;;  %v4345_v22 = vld [vmem:[#allocation2 + $0xb0] sm:$0xff] }
 0x1f3   :  { %5203 = vst.msk [vmem:[%s7904_s3 + $0x4] sm:$0xf] %vm5201_vm10, %v5619_v31  ;;  %v5027_v44 = vmax.f32 %v4991_v38, 0.0  ;;  %v4992_v48 = vadd.f32 %v7659_v41, %v4949_v42  ;;  %v4947_v45 = vld [vmem:[#allocation2 + $0x28] sm:$0xff]  ;;  %v4343_v32 = vld [vmem:[#allocation2 + $0xa0] sm:$0xff] }
 0x1f4   :  { %4408 = vst.msk [vmem:[#allocation2 + $0x68] sm:$0xff] %vm381_vm7, %v4372_v33  ;;  %4914 = vst.msk [vmem:[#allocation2 + $0x40] sm:$0xff] %vm381_vm7, %v4878_v35  ;;  %v5025_v46 = vmax.f32 %v4989_v37, 0.0  ;;  %v4990_v49 = vadd.f32 %v7659_v41, %v4947_v45  ;;  %v6111_v50 = vpop.f32.mrb[140].mxu1  ;;  %v6145_v52 = vpop.f32.mrb[140].mxu0  ;;  %v4344_v45 = vld [vmem:[#allocation2 + $0xa8] sm:$0xff] }
 0x1f5   :  { %4917 = vst.msk [vmem:[#allocation2 + $0x58] sm:$0xff] %vm381_vm7, %v4881_v40  ;;  %4915 = vst.msk [vmem:[#allocation2 + $0x48] sm:$0xff] %vm381_vm7, %v4879_v43  ;;  %v5624_v53 = vpack.c.bf16 %v5027_v44, %v5027_v44  ;;  %v5028_v55 = vmax.f32 %v4992_v48, 0.0  ;;  %v4377_v56 = vadd.f32 %v6111_v50, %v4341_v57  ;;  %v4244_v58 = vpop.f32.mrb[141].mxu1  ;;  %v4739_v62 = vpop.f32.mrb[141].mxu0  ;;  %v4346_v40 = vld [vmem:[#allocation2 + $0xb8] sm:$0xff] }
 0x1f6   :  { %v5622_v63 = vpack.c.bf16 %v5025_v46, %v5025_v46  ;;  %v5026_v1 = vmax.f32 %v4990_v49, 0.0  ;;  %v4375_v4 = vadd.f32 %v4339_v61, %v4244_v58  ;;  %v6112_v3 = vpop.f32.mrb[142].mxu1  ;;  %v6146_v47 = vpop.f32.mrb[142].mxu0 }
 0x1f7   :  { %v4848_v5 = vld [vmem:[#allocation2 + $0x70] sm:$0xff]  ;;  %5208 = vst.msk [vmem:[%s7904_s3 + $0x18] sm:$0xf] %vm5201_vm10, %v5624_v53  ;;  %v5625_v6 = vpack.c.bf16 %v5028_v55, %v5028_v55  ;;  %v4378_v7 = vadd.f32 %v6112_v3, %v4342_v59  ;;  %v4247_v2 = vpop.f32.mrb[143].mxu1  ;;  %v4846_v9 = vld [vmem:[#allocation2 + $0x60] sm:$0xff]  ;;  %v4742_v10 = vpop.f32.mrb[143].mxu0 }
 0x1f8   :  { %4413 = vst.msk [vmem:[#allocation2 + $0x90] sm:$0xff] %vm381_vm7, %v4377_v56  ;;  %v4884_v34 = vadd.f32 %v6145_v52, %v4848_v5  ;;  %v5623_v12 = vpack.c.bf16 %v5026_v1, %v5026_v1  ;;  %4411 = vst.msk [vmem:[#allocation2 + $0x80] sm:$0xff] %vm381_vm7, %v4375_v4  ;;  %v4376_v14 = vadd.f32 %v4340_v8, %v4247_v2 }
 0x1f9   :  { %5206 = vst.msk [vmem:[%s7904_s3 + $0x10] sm:$0xf] %vm5201_vm10, %v5622_v63  ;;  %v4952_v13 = vld [vmem:[#allocation2 + $0x50] sm:$0xff]  ;;  %v4882_v0 = vadd.f32 %v4846_v9, %v4739_v62  ;;  %v4849_v15 = vld [vmem:[#allocation2 + $0x78] sm:$0xff]  ;;  %5209 = vst.msk [vmem:[%s7904_s3 + $0x1c] sm:$0xf] %vm5201_vm10, %v5625_v6 }
 0x1fa   :  { %v4995_v16 = vadd.f32 %v7659_v41, %v4952_v13  ;;  %4414 = vst.msk [vmem:[#allocation2 + $0x98] sm:$0xff] %vm381_vm7, %v4378_v7  ;;  %4920 = vst.msk [vmem:[#allocation2 + $0x70] sm:$0xff] %vm381_vm7, %v4884_v34  ;;  %v4885_v18 = vadd.f32 %v6146_v47, %v4849_v15  ;;  %v4349_v34 = vld [vmem:[#allocation2 + $0xd0] sm:$0xff]  ;;  %v4347_v13 = vld [vmem:[#allocation2 + $0xc0] sm:$0xff] }
 0x1fb   :  { %v4950_v17 = vld [vmem:[#allocation2 + $0x40] sm:$0xff]  ;;  %v4847_v19 = vld [vmem:[#allocation2 + $0x68] sm:$0xff]  ;;  %5207 = vst.msk [vmem:[%s7904_s3 + $0x14] sm:$0xf] %vm5201_vm10, %v5623_v12 }
 0x1fc   :  { %v4993_v20 = vadd.f32 %v7659_v41, %v4950_v17  ;;  %v4953_v24 = vld [vmem:[#allocation2 + $0x58] sm:$0xff]  ;;  %4412 = vst.msk [vmem:[#allocation2 + $0x88] sm:$0xff] %vm381_vm7, %v4376_v14  ;;  %4918 = vst.msk [vmem:[#allocation2 + $0x60] sm:$0xff] %vm381_vm7, %v4882_v0  ;;  %v4883_v54 = vadd.f32 %v4847_v19, %v4742_v10  ;;  %v5031_v21 = vmax.f32 %v4995_v16, 0.0  ;;  %v4951_v25 = vld [vmem:[#allocation2 + $0x48] sm:$0xff]  ;;  %v6115_v60 = vpop.f32.mrb[144].mxu1 }
 0x1fd   :  { %v4996_v51 = vadd.f32 %v7659_v41, %v4953_v24  ;;  %4921 = vst.msk [vmem:[#allocation2 + $0x78] sm:$0xff] %vm381_vm7, %v4885_v18  ;;  %v4994_v27 = vadd.f32 %v7659_v41, %v4951_v25  ;;  %v6149_v28 = vpop.f32.mrb[144].mxu0  ;;  %v4381_v30 = vadd.f32 %v6115_v60, %v4345_v22  ;;  %v4260_v31 = vpop.f32.mrb[145].mxu1  ;;  %v4350_v18 = vld [vmem:[#allocation2 + $0xd8] sm:$0xff]  ;;  %v4348_v25 = vld [vmem:[#allocation2 + $0xc8] sm:$0xff] }
 0x1fe   :  { %v5029_v26 = vmax.f32 %v4993_v20, 0.0  ;;  %4919 = vst.msk [vmem:[#allocation2 + $0x68] sm:$0xff] %vm381_vm7, %v4883_v54  ;;  %v5628_v29 = vpack.c.bf16 %v5031_v21, %v5031_v21  ;;  %v4755_v33 = vpop.f32.mrb[145].mxu0  ;;  %v4379_v38 = vadd.f32 %v4343_v32, %v4260_v31  ;;  %v6116_v39 = vpop.f32.mrb[146].mxu1 }
 0x1ff   :  { %v5032_v23 = vmax.f32 %v4996_v51, 0.0  ;;  %v5030_v36 = vmax.f32 %v4994_v27, 0.0  ;;  %v4852_v11 = vld [vmem:[#allocation2 + $0x90] sm:$0xff]  ;;  %v6150_v37 = vpop.f32.mrb[146].mxu0  ;;  %4417 = vst.msk [vmem:[#allocation2 + $0xb0] sm:$0xff] %vm381_vm7, %v4381_v30  ;;  %v4382_v43 = vadd.f32 %v6116_v39, %v4346_v40  ;;  %v4263_v48 = vpop.f32.mrb[147].mxu1 }
 0x200   :  { %v5626_v35 = vpack.c.bf16 %v5029_v26, %v5029_v26  ;;  %5212 = vst.msk [vmem:[%s7904_s3 + $0x28] sm:$0xf] %vm5201_vm10, %v5628_v29  ;;  %v4888_v44 = vadd.f32 %v6149_v28, %v4852_v11  ;;  %v4850_v46 = vld [vmem:[#allocation2 + $0x80] sm:$0xff]  ;;  %v4758_v49 = vpop.f32.mrb[147].mxu0  ;;  %v4380_v52 = vadd.f32 %v4344_v45, %v4263_v48 }
 0x201   :  { %v5629_v42 = vpack.c.bf16 %v5032_v23, %v5032_v23  ;;  %v5627_v50 = vpack.c.bf16 %v5030_v36, %v5030_v36  ;;  %v4956_v57 = vld [vmem:[#allocation2 + $0x70] sm:$0xff]  ;;  %4415 = vst.msk [vmem:[#allocation2 + $0xa0] sm:$0xff] %vm381_vm7, %v4379_v38  ;;  %v4886_v53 = vadd.f32 %v4850_v46, %v4755_v33  ;;  %v4853_v55 = vld [vmem:[#allocation2 + $0x98] sm:$0xff]  ;;  %4418 = vst.msk [vmem:[#allocation2 + $0xb8] sm:$0xff] %vm381_vm7, %v4382_v43 }
 0x202   :  { %5210 = vst.msk [vmem:[%s7904_s3 + $0x20] sm:$0xf] %vm5201_vm10, %v5626_v35  ;;  %v4999_v56 = vadd.f32 %v7659_v41, %v4956_v57  ;;  %v4889_v61 = vadd.f32 %v6150_v37, %v4853_v55  ;;  %v4351_v57 = vld [vmem:[#allocation2 + $0xe0] sm:$0xff] }
 0x203   :  { %5213 = vst.msk [vmem:[%s7904_s3 + $0x2c] sm:$0xf] %vm5201_vm10, %v5629_v42  ;;  %v4954_v58 = vld [vmem:[#allocation2 + $0x60] sm:$0xff]  ;;  %v4851_v62 = vld [vmem:[#allocation2 + $0x88] sm:$0xff]  ;;  %5211 = vst.msk [vmem:[%s7904_s3 + $0x24] sm:$0xf] %vm5201_vm10, %v5627_v50 }
 0x204   :  { %4924 = vst.msk [vmem:[#allocation2 + $0x90] sm:$0xff] %vm381_vm7, %v4888_v44  ;;  %v4997_v63 = vadd.f32 %v7659_v41, %v4954_v58  ;;  %v4957_v1 = vld [vmem:[#allocation2 + $0x78] sm:$0xff]  ;;  %4416 = vst.msk [vmem:[#allocation2 + $0xa8] sm:$0xff] %vm381_vm7, %v4380_v52  ;;  %v4887_v4 = vadd.f32 %v4851_v62, %v4758_v49  ;;  %v5035_v3 = vmax.f32 %v4999_v56, 0.0  ;;  %v6119_v7 = vpop.f32.mrb[148].mxu1  ;;  %v6153_v2 = vpop.f32.mrb[148].mxu0 }
 0x205   :  { %4922 = vst.msk [vmem:[#allocation2 + $0x80] sm:$0xff] %vm381_vm7, %v4886_v53  ;;  %v5000_v59 = vadd.f32 %v7659_v41, %v4957_v1  ;;  %v4955_v5 = vld [vmem:[#allocation2 + $0x68] sm:$0xff]  ;;  %4925 = vst.msk [vmem:[#allocation2 + $0x98] sm:$0xff] %vm381_vm7, %v4889_v61  ;;  %v4385_v10 = vadd.f32 %v6119_v7, %v4349_v34  ;;  %v4276_v12 = vpop.f32.mrb[149].mxu1  ;;  %v4771_v14 = vpop.f32.mrb[149].mxu0  ;;  %v4353_v44 = vld [vmem:[#allocation2 + $0xf0] sm:$0xff] }
 0x206   :  { %v5033_v47 = vmax.f32 %v4997_v63, 0.0  ;;  %v4998_v6 = vadd.f32 %v7659_v41, %v4955_v5  ;;  %4923 = vst.msk [vmem:[#allocation2 + $0x88] sm:$0xff] %vm381_vm7, %v4887_v4  ;;  %v5632_v8 = vpack.c.bf16 %v5035_v3, %v5035_v3  ;;  %v4383_v16 = vadd.f32 %v4347_v13, %v4276_v12  ;;  %v6120_v17 = vpop.f32.mrb[150].mxu1  ;;  %v4856_v19 = vld [vmem:[#allocation2 + $0xb0] sm:$0xff]  ;;  %v6154_v20 = vpop.f32.mrb[150].mxu0  ;;  %v4354_v61 = vld [vmem:[#allocation2 + $0xf8] sm:$0xff] }
 0x207   :  { %v5036_v9 = vmax.f32 %v5000_v59, 0.0  ;;  %4421 = vst.msk [vmem:[#allocation2 + $0xd0] sm:$0xff] %vm381_vm7, %v4385_v10  ;;  %v4386_v54 = vadd.f32 %v6120_v17, %v4350_v18  ;;  %v4892_v21 = vadd.f32 %v6153_v2, %v4856_v19  ;;  %v4279_v51 = vpop.f32.mrb[151].mxu1  ;;  %v4774_v27 = vpop.f32.mrb[151].mxu0  ;;  %v4352_v5 = vld [vmem:[#allocation2 + $0xe8] sm:$0xff] }
 0x208   :  { %v5630_v0 = vpack.c.bf16 %v5033_v47, %v5033_v47  ;;  %v5034_v15 = vmax.f32 %v4998_v6, 0.0  ;;  %5216 = vst.msk [vmem:[%s7904_s3 + $0x38] sm:$0xf] %vm5201_vm10, %v5632_v8  ;;  %v4854_v26 = vld [vmem:[#allocation2 + $0xa0] sm:$0xff]  ;;  %v4384_v28 = vadd.f32 %v4348_v25, %v4279_v51  ;;  %v4857_v23 = vld [vmem:[#allocation2 + $0xb8] sm:$0xff] }
 0x209   :  { %v5633_v24 = vpack.c.bf16 %v5036_v9, %v5036_v9  ;;  %4419 = vst.msk [vmem:[#allocation2 + $0xc0] sm:$0xff] %vm381_vm7, %v4383_v16  ;;  %v4890_v29 = vadd.f32 %v4854_v26, %v4771_v14  ;;  %4422 = vst.msk [vmem:[#allocation2 + $0xd8] sm:$0xff] %vm381_vm7, %v4386_v54  ;;  %v4893_v32 = vadd.f32 %v6154_v20, %v4857_v23 }
 0x20a   :  { %5214 = vst.msk [vmem:[%s7904_s3 + $0x30] sm:$0xf] %vm5201_vm10, %v5630_v0  ;;  %v5631_v60 = vpack.c.bf16 %v5034_v15, %v5034_v15 }
 0x20b   :  { %v4960_v22 = vld [vmem:[#allocation2 + $0x90] sm:$0xff]  ;;  %5217 = vst.msk [vmem:[%s7904_s3 + $0x3c] sm:$0xf] %vm5201_vm10, %v5633_v24  ;;  %v4855_v33 = vld [vmem:[#allocation2 + $0xa8] sm:$0xff] }
 0x20c   :  { %v5003_v30 = vadd.f32 %v7659_v41, %v4960_v22  ;;  %v4958_v31 = vld [vmem:[#allocation2 + $0x80] sm:$0xff]  ;;  %4928 = vst.msk [vmem:[#allocation2 + $0xb0] sm:$0xff] %vm381_vm7, %v4892_v21  ;;  %v4961_v36 = vld [vmem:[#allocation2 + $0x98] sm:$0xff]  ;;  %4420 = vst.msk [vmem:[#allocation2 + $0xc8] sm:$0xff] %vm381_vm7, %v4384_v28  ;;  %v4891_v38 = vadd.f32 %v4855_v33, %v4774_v27  ;;  %v6123_v43 = vpop.f32.mrb[152].mxu1  ;;  %v6157_v48 = vpop.f32.mrb[152].mxu0 }
 0x20d   :  { %5215 = vst.msk [vmem:[%s7904_s3 + $0x34] sm:$0xf] %vm5201_vm10, %v5631_v60  ;;  %v5001_v35 = vadd.f32 %v7659_v41, %v4958_v31  ;;  %v5004_v40 = vadd.f32 %v7659_v41, %v4961_v36  ;;  %v4959_v11 = vld [vmem:[#allocation2 + $0x88] sm:$0xff]  ;;  %v4389_v49 = vadd.f32 %v6123_v43, %v4353_v44  ;;  %v4292_v50 = vpop.f32.mrb[153].mxu1  ;;  %v4787_v52 = vpop.f32.mrb[153].mxu0  ;;  %v4357_v21 = vld [vmem:[#allocation2 + $0x110] sm:$0xff] }
 0x20e   :  { %4926 = vst.msk [vmem:[#allocation2 + $0xa0] sm:$0xff] %vm381_vm7, %v4890_v29  ;;  %v5039_v39 = vmax.f32 %v5003_v30, 0.0  ;;  %4929 = vst.msk [vmem:[#allocation2 + $0xb8] sm:$0xff] %vm381_vm7, %v4893_v32  ;;  %v5002_v42 = vadd.f32 %v7659_v41, %v4959_v11  ;;  %v4387_v56 = vadd.f32 %v4351_v57, %v4292_v50  ;;  %v6124_v58 = vpop.f32.mrb[154].mxu1  ;;  %v4860_v62 = vld [vmem:[#allocation2 + $0xd0] sm:$0xff]  ;;  %v6158_v63 = vpop.f32.mrb[154].mxu0 }
 0x20f   :  { %v5037_v37 = vmax.f32 %v5001_v35, 0.0  ;;  %4927 = vst.msk [vmem:[#allocation2 + $0xa8] sm:$0xff] %vm381_vm7, %v4891_v38  ;;  %v5040_v46 = vmax.f32 %v5004_v40, 0.0  ;;  %4425 = vst.msk [vmem:[#allocation2 + $0xf0] sm:$0xff] %vm381_vm7, %v4389_v49  ;;  %v4390_v4 = vadd.f32 %v6124_v58, %v4354_v61  ;;  %v4896_v3 = vadd.f32 %v6157_v48, %v4860_v62  ;;  %v4295_v59 = vpop.f32.mrb[155].mxu1  ;;  %v4790_v6 = vpop.f32.mrb[155].mxu0 }
 0x210   :  { %v5636_v45 = vpack.c.bf16 %v5039_v39, %v5039_v39  ;;  %v5038_v55 = vmax.f32 %v5002_v42, 0.0  ;;  %v4858_v47 = vld [vmem:[#allocation2 + $0xc0] sm:$0xff]  ;;  %4423 = vst.msk [vmem:[#allocation2 + $0xe0] sm:$0xff] %vm381_vm7, %v4387_v56  ;;  %v4388_v2 = vadd.f32 %v4352_v5, %v4295_v59  ;;  %v4861_v9 = vld [vmem:[#allocation2 + $0xd8] sm:$0xff]  ;;  %v4356_v11 = vld [vmem:[#allocation2 + $0x108] sm:$0xff] }
 0x211   :  { %v5634_v53 = vpack.c.bf16 %v5037_v37, %v5037_v37  ;;  %v5637_v1 = vpack.c.bf16 %v5040_v46, %v5040_v46  ;;  %v4894_v8 = vadd.f32 %v4858_v47, %v4787_v52  ;;  %4426 = vst.msk [vmem:[#allocation2 + $0xf8] sm:$0xff] %vm381_vm7, %v4390_v4  ;;  %4932 = vst.msk [vmem:[#allocation2 + $0xd0] sm:$0xff] %vm381_vm7, %v4896_v3  ;;  %v4355_v22 = vld [vmem:[#allocation2 + $0x100] sm:$0xff]  ;;  %v4358_v32 = vld [vmem:[#allocation2 + $0x118] sm:$0xff] }
 0x212   :  { %5220 = vst.msk [vmem:[%s7904_s3 + $0x48] sm:$0xf] %vm5201_vm10, %v5636_v45  ;;  %v5635_v7 = vpack.c.bf16 %v5038_v55, %v5038_v55  ;;  %v4897_v13 = vadd.f32 %v6158_v63, %v4861_v9 }
 0x213   :  { %5218 = vst.msk [vmem:[%s7904_s3 + $0x40] sm:$0xf] %vm5201_vm10, %v5634_v53  ;;  %v4964_v34 = vld [vmem:[#allocation2 + $0xb0] sm:$0xff]  ;;  %5221 = vst.msk [vmem:[%s7904_s3 + $0x4c] sm:$0xf] %vm5201_vm10, %v5637_v1  ;;  %v4859_v14 = vld [vmem:[#allocation2 + $0xc8] sm:$0xff] }
 0x214   :  { %v5007_v10 = vadd.f32 %v7659_v41, %v4964_v34  ;;  %5219 = vst.msk [vmem:[%s7904_s3 + $0x44] sm:$0xf] %vm5201_vm10, %v5635_v7  ;;  %v4895_v16 = vadd.f32 %v4859_v14, %v4790_v6  ;;  %v6127_v54 = vpop.f32.mrb[156].mxu1  ;;  %v6161_v51 = vpop.f32.mrb[156].mxu0 }
 0x215   :  { %v4962_v12 = vld [vmem:[#allocation2 + $0xa0] sm:$0xff]  ;;  %v4965_v15 = vld [vmem:[#allocation2 + $0xb8] sm:$0xff]  ;;  %4424 = vst.msk [vmem:[#allocation2 + $0xe8] sm:$0xff] %vm381_vm7, %v4388_v2  ;;  %4930 = vst.msk [vmem:[#allocation2 + $0xc0] sm:$0xff] %vm381_vm7, %v4894_v8  ;;  %v4393_v27 = vadd.f32 %v6127_v54, %v4357_v21  ;;  %v4308_v60 = vpop.f32.mrb[157].mxu1  ;;  %v4803_v28 = vpop.f32.mrb[157].mxu0 }
 0x216   :  { %v5005_v0 = vadd.f32 %v7659_v41, %v4962_v12  ;;  %v5043_v17 = vmax.f32 %v5007_v10, 0.0  ;;  %v5008_v18 = vadd.f32 %v7659_v41, %v4965_v15  ;;  %v4963_v19 = vld [vmem:[#allocation2 + $0xa8] sm:$0xff]  ;;  %4933 = vst.msk [vmem:[#allocation2 + $0xd8] sm:$0xff] %vm381_vm7, %v4897_v13  ;;  %4931 = vst.msk [vmem:[#allocation2 + $0xc8] sm:$0xff] %vm381_vm7, %v4895_v16  ;;  %v4391_v30 = vadd.f32 %v4355_v22, %v4308_v60  ;;  %v6128_v31 = vpop.f32.mrb[158].mxu1  ;;  %v4864_v33 = vld [vmem:[#allocation2 + $0xf0] sm:$0xff] }
 0x217   :  { %v5006_v24 = vadd.f32 %v7659_v41, %v4963_v19  ;;  %v6162_v35 = vpop.f32.mrb[158].mxu0  ;;  %4429 = vst.msk [vmem:[#allocation2 + $0x110] sm:$0xff] %vm381_vm7, %v4393_v27  ;;  %v4394_v38 = vadd.f32 %v6128_v31, %v4358_v32  ;;  %v4900_v39 = vadd.f32 %v6161_v51, %v4864_v33  ;;  %v4311_v40 = vpop.f32.mrb[159].mxu1  ;;  %v4862_v37 = vld [vmem:[#allocation2 + $0xe0] sm:$0xff] }
 0x218   :  { %v5041_v20 = vmax.f32 %v5005_v0, 0.0  ;;  %v5640_v25 = vpack.c.bf16 %v5043_v17, %v5043_v17  ;;  %v5044_v26 = vmax.f32 %v5008_v18, 0.0  ;;  %v4806_v42 = vpop.f32.mrb[159].mxu0  ;;  %v4968_v44 = vld [vmem:[#allocation2 + $0xd0] sm:$0xff]  ;;  %4427 = vst.msk [vmem:[#allocation2 + $0x100] sm:$0xff] %vm381_vm7, %v4391_v30  ;;  %v4392_v48 = vadd.f32 %v4356_v11, %v4311_v40  ;;  %v4865_v46 = vld [vmem:[#allocation2 + $0xf8] sm:$0xff] }
 0x219   :  { %v5042_v23 = vmax.f32 %v5006_v24, 0.0  ;;  %v4898_v45 = vadd.f32 %v4862_v37, %v4803_v28  ;;  %v5011_v49 = vadd.f32 %v7659_v41, %v4968_v44  ;;  %4430 = vst.msk [vmem:[#allocation2 + $0x118] sm:$0xff] %vm381_vm7, %v4394_v38  ;;  %4936 = vst.msk [vmem:[#allocation2 + $0xf0] sm:$0xff] %vm381_vm7, %v4900_v39  ;;  %v4901_v57 = vadd.f32 %v6162_v35, %v4865_v46 }
 0x21a   :  { %v5638_v29 = vpack.c.bf16 %v5041_v20, %v5041_v20  ;;  %5224 = vst.msk [vmem:[%s7904_s3 + $0x58] sm:$0xf] %vm5201_vm10, %v5640_v25  ;;  %v5641_v36 = vpack.c.bf16 %v5044_v26, %v5044_v26 }
 0x21b   :  { %v5639_v43 = vpack.c.bf16 %v5042_v23, %v5042_v23  ;;  %4428 = vst.msk [vmem:[#allocation2 + $0x108] sm:$0xff] %vm381_vm7, %v4392_v48  ;;  %4934 = vst.msk [vmem:[#allocation2 + $0xe0] sm:$0xff] %vm381_vm7, %v4898_v45  ;;  %v5047_v58 = vmax.f32 %v5011_v49, 0.0 }
 0x21c   :  { %5222 = vst.msk [vmem:[%s7904_s3 + $0x50] sm:$0xf] %vm5201_vm10, %v5638_v29  ;;  %5225 = vst.msk [vmem:[%s7904_s3 + $0x5c] sm:$0xf] %vm5201_vm10, %v5641_v36  ;;  %v4966_v50 = vld [vmem:[#allocation2 + $0xc0] sm:$0xff]  ;;  %v4863_v52 = vld [vmem:[#allocation2 + $0xe8] sm:$0xff] }
 0x21d   :  { %5223 = vst.msk [vmem:[%s7904_s3 + $0x54] sm:$0xf] %vm5201_vm10, %v5639_v43  ;;  %v5009_v53 = vadd.f32 %v7659_v41, %v4966_v50  ;;  %v4969_v55 = vld [vmem:[#allocation2 + $0xd8] sm:$0xff]  ;;  %v4899_v56 = vadd.f32 %v4863_v52, %v4806_v42  ;;  %v4967_v62 = vld [vmem:[#allocation2 + $0xc8] sm:$0xff]  ;;  %v6165_v4 = vpop.f32.mrb[160].mxu0  ;;  %v5644_v3 = vpack.c.bf16 %v5047_v58, %v5047_v58 }
 0x21e   :  { %v5012_v61 = vadd.f32 %v7659_v41, %v4969_v55  ;;  %4937 = vst.msk [vmem:[#allocation2 + $0xf8] sm:$0xff] %vm381_vm7, %v4901_v57  ;;  %v5010_v1 = vadd.f32 %v7659_v41, %v4967_v62  ;;  %v4819_v5 = vpop.f32.mrb[161].mxu0  ;;  %v4868_v7 = vld [vmem:[#allocation2 + $0x110] sm:$0xff] }
 0x21f   :  { %v5045_v63 = vmax.f32 %v5009_v53, 0.0  ;;  %4935 = vst.msk [vmem:[#allocation2 + $0xe8] sm:$0xff] %vm381_vm7, %v4899_v56  ;;  %v6166_v34 = vpop.f32.mrb[162].mxu0  ;;  %v4904_v8 = vadd.f32 %v6165_v4, %v4868_v7  ;;  %v4866_v9 = vld [vmem:[#allocation2 + $0x100] sm:$0xff] }
 0x220   :  { %v5048_v59 = vmax.f32 %v5012_v61, 0.0  ;;  %v5046_v6 = vmax.f32 %v5010_v1, 0.0  ;;  %5228 = vst.msk [vmem:[%s7904_s3 + $0x68] sm:$0xf] %vm5201_vm10, %v5644_v3  ;;  %v4822_v10 = vpop.f32.mrb[163].mxu0  ;;  %v4972_v13 = vld [vmem:[#allocation2 + $0xf0] sm:$0xff]  ;;  %v4902_v14 = vadd.f32 %v4866_v9, %v4819_v5 }
 0x221   :  { %v5642_v47 = vpack.c.bf16 %v5045_v63, %v5045_v63  ;;  %v4869_v0 = vld [vmem:[#allocation2 + $0x118] sm:$0xff]  ;;  %v5015_v15 = vadd.f32 %v7659_v41, %v4972_v13  ;;  %4940 = vst.msk [vmem:[#allocation2 + $0x110] sm:$0xff] %vm381_vm7, %v4904_v8 }
 0x222   :  { %v5645_v2 = vpack.c.bf16 %v5048_v59, %v5048_v59  ;;  %v5643_v12 = vpack.c.bf16 %v5046_v6, %v5046_v6  ;;  %v4970_v16 = vld [vmem:[#allocation2 + $0xe0] sm:$0xff]  ;;  %v4905_v17 = vadd.f32 %v6166_v34, %v4869_v0  ;;  %v4867_v18 = vld [vmem:[#allocation2 + $0x108] sm:$0xff]  ;;  %4938 = vst.msk [vmem:[#allocation2 + $0x100] sm:$0xff] %vm381_vm7, %v4902_v14 }
 0x223   :  { %5226 = vst.msk [vmem:[%s7904_s3 + $0x60] sm:$0xf] %vm5201_vm10, %v5642_v47  ;;  %v5013_v19 = vadd.f32 %v7659_v41, %v4970_v16  ;;  %v4903_v24 = vadd.f32 %v4867_v18, %v4822_v10  ;;  %v5051_v54 = vmax.f32 %v5015_v15, 0.0 }
 0x224   :  { %5229 = vst.msk [vmem:[%s7904_s3 + $0x6c] sm:$0xf] %vm5201_vm10, %v5645_v2  ;;  %5227 = vst.msk [vmem:[%s7904_s3 + $0x64] sm:$0xf] %vm5201_vm10, %v5643_v12 }
 0x225   :  { %v4973_v20 = vld [vmem:[#allocation2 + $0xf8] sm:$0xff]  ;;  %4941 = vst.msk [vmem:[#allocation2 + $0x118] sm:$0xff] %vm381_vm7, %v4905_v17  ;;  %v5049_v25 = vmax.f32 %v5013_v19, 0.0  ;;  %4939 = vst.msk [vmem:[#allocation2 + $0x108] sm:$0xff] %vm381_vm7, %v4903_v24  ;;  %v5648_v27 = vpack.c.bf16 %v5051_v54, %v5051_v54 }
 0x226   :  { %v5016_v21 = vadd.f32 %v7659_v41, %v4973_v20  ;;  %v4971_v51 = vld [vmem:[#allocation2 + $0xe8] sm:$0xff] }
 0x227   :  { %v5014_v26 = vadd.f32 %v7659_v41, %v4971_v51  ;;  %v5646_v22 = vpack.c.bf16 %v5049_v25, %v5049_v25  ;;  %5232 = vst.msk [vmem:[%s7904_s3 + $0x78] sm:$0xf] %vm5201_vm10, %v5648_v27 }
 0x228   :  { %v5052_v60 = vmax.f32 %v5016_v21, 0.0  ;;  %v4976_v30 = vld [vmem:[#allocation2 + $0x110] sm:$0xff] }
 0x229   :  { %v5050_v28 = vmax.f32 %v5014_v26, 0.0  ;;  %5230 = vst.msk [vmem:[%s7904_s3 + $0x70] sm:$0xf] %vm5201_vm10, %v5646_v22  ;;  %v5019_v31 = vadd.f32 %v7659_v41, %v4976_v30  ;;  %v4974_v32 = vld [vmem:[#allocation2 + $0x100] sm:$0xff] }
 0x22a   :  { %v5649_v29 = vpack.c.bf16 %v5052_v60, %v5052_v60  ;;  %v5017_v33 = vadd.f32 %v7659_v41, %v4974_v32 }
 0x22b   :  { %v5647_v23 = vpack.c.bf16 %v5050_v28, %v5050_v28  ;;  %v5055_v36 = vmax.f32 %v5019_v31, 0.0 }
 0x22c   :  { %5233 = vst.msk [vmem:[%s7904_s3 + $0x7c] sm:$0xf] %vm5201_vm10, %v5649_v29  ;;  %v4977_v35 = vld [vmem:[#allocation2 + $0x118] sm:$0xff]  ;;  %v4975_v39 = vld [vmem:[#allocation2 + $0x108] sm:$0xff]  ;;  %v5053_v40 = vmax.f32 %v5017_v33, 0.0 }
 0x22d   :  { %5231 = vst.msk [vmem:[%s7904_s3 + $0x74] sm:$0xf] %vm5201_vm10, %v5647_v23  ;;  %v5020_v38 = vadd.f32 %v7659_v41, %v4977_v35  ;;  %v5018_v11 = vadd.f32 %v7659_v41, %v4975_v39  ;;  %v5652_v37 = vpack.c.bf16 %v5055_v36, %v5055_v36 }
 0x22e   :  { %v5650_v43 = vpack.c.bf16 %v5053_v40, %v5053_v40 }
 0x22f   :  { %v5056_v42 = vmax.f32 %v5020_v38, 0.0  ;;  %v5054_v44 = vmax.f32 %v5018_v11, 0.0  ;;  %5236 = vst.msk [vmem:[%s7904_s3 + $0x88] sm:$0xf] %vm5201_vm10, %v5652_v37 }
 0x230   :  { %5234 = vst.msk [vmem:[%s7904_s3 + $0x80] sm:$0xf] %vm5201_vm10, %v5650_v43 }
 0x231   :  { %v5653_v48 = vpack.c.bf16 %v5056_v42, %v5056_v42  ;;  %v5651_v45 = vpack.c.bf16 %v5054_v44, %v5054_v44 }
 0x233   :  { %5237 = vst.msk [vmem:[%s7904_s3 + $0x8c] sm:$0xf] %vm5201_vm10, %v5653_v48  ;;  %5235 = vst.msk [vmem:[%s7904_s3 + $0x84] sm:$0xf] %vm5201_vm10, %v5651_v45 }

</bundles_post_ra>
